<compile_context>
chip_gen: v5e
topology: v5e:2x2
jax: 0.10.0
libtpu: 0.0.40
codegen_flags: <defaults>
</compile_context>

<pallas_src>
import numpy as np
import jax
import jax.numpy as jnp
from jax.experimental import pallas as pl
from jax.experimental.pallas import tpu as pltpu


# ----------------------------------------------------------------------------
# Host-side separable operator matrices (built once per shape)
# ----------------------------------------------------------------------------
def _box_tap_matrix(n: int, radius: int) -> np.ndarray:
    """1D operator of the grouped Conv2d(k=3, dilation=radius, padding=radius,
    weight=1): taps at offsets {-radius, 0, +radius} with zero padding."""
    idx = np.arange(n)
    d = np.abs(idx[:, None] - idx[None, :])
    return ((d == 0) | (d == radius)).astype(np.float32)


def _bilinear_matrix(out_size: int, in_size: int) -> np.ndarray:
    """Row-stochastic 1D bilinear-resize matrix, align_corners=True."""
    if out_size == 1:
        m = np.zeros((1, in_size), np.float32)
        m[0, 0] = 1.0
        return m
    src = np.arange(out_size, dtype=np.float32) * (in_size - 1) / (out_size - 1)
    i0 = np.clip(np.floor(src).astype(np.int32), 0, in_size - 1)
    i1 = np.minimum(i0 + 1, in_size - 1)
    frac = src - i0.astype(np.float32)
    m = np.zeros((out_size, in_size), np.float32)
    rows = np.arange(out_size)
    np.add.at(m, (rows, i0), 1.0 - frac)
    np.add.at(m, (rows, i1), frac)
    return m


def _block_diag(mat: np.ndarray, n: int) -> np.ndarray:
    k = mat.shape[0]
    out = np.zeros((n * k, n * k), np.float32)
    for p in range(n):
        out[p * k:(p + 1) * k, p * k:(p + 1) * k] = mat
    return out


def _vmem_capacity_bytes() -> int:
    try:
        return int(pltpu.get_tpu_info().vmem_capacity_bytes)
    except Exception:
        return 64 * 1024 * 1024          # conservative: v7x per-TC VMEM


def _pick_row_tile(hh: int, wh: int, vmem_bytes: int) -> int:
    """Largest multiple-of-8 row tile dividing Hh that keeps the streamed
    (double-buffered in + out) hi-res blocks within a VMEM budget."""
    budget = int(0.4 * vmem_bytes)
    per_row = 2 * 2 * 3 * wh * 4         # 2 bufs x (x_hr + out) x 3ch x f32
    max_rows = max(8, budget // per_row)
    cap = 128 if vmem_bytes <= (64 << 20) else 256   # v7x small, v5e/v6e larger
    t = max(8, min(hh, (max_rows // 8) * 8, cap))
    while t >= 8 and hh % t != 0:
        t -= 8
    return t if t >= 8 else hh           # TODO(synk): pad ragged Hh on the host


# ----------------------------------------------------------------------------
# Phase 1: per-batch low-res A/b + hoisted W-pass of the bilinear upsample
# ----------------------------------------------------------------------------
def coeff_kernel(x_lr_ref, y_lr_ref,
                 shn_bd_ref, swn_t_ref, uw_t_ref,
                 w1_ref, s1_ref, b1_ref,
                 w2_ref, s2_ref, b2_ref,
                 w3_ref,
                 planes_ref):
    x = x_lr_ref[0]                                        # (3, Hl, Wl)
    y = y_lr_ref[0]
    hl, wl = x.shape[1], x.shape[2]
    wh = planes_ref.shape[2] // 6

    # 12 planes stacked along sublanes; normalized separable box filter:
    # ONE W-pass matmul + ONE block-diagonal H-pass matmul, no transposes.
    planes = jnp.concatenate([x, y, x * y, x * x], axis=0).reshape(12 * hl, wl)
    qw = jnp.dot(planes, swn_t_ref[...], preferred_element_type=jnp.float32)
    box = jnp.dot(shn_bd_ref[...], qw, preferred_element_type=jnp.float32)
    box = box.reshape(12, hl, wl)                          # already /N

    mean_x = box[0:3]
    mean_y = box[3:6]
    cov_xy = box[6:9] - mean_x * mean_y
    var_x = box[9:12] - mean_x * mean_x

    # conv_a: 1x1 conv stack == channel matmuls over flattened pixels.
    feats = jnp.concatenate([cov_xy, var_x], axis=0).reshape(6, hl * wl)
    h = jnp.dot(w1_ref[...], feats, preferred_element_type=jnp.float32)
    h = jnp.maximum(h * s1_ref[...] + b1_ref[...], 0.0)    # BN(eval, folded)+ReLU
    h = jnp.dot(w2_ref[...], h, preferred_element_type=jnp.float32)
    h = jnp.maximum(h * s2_ref[...] + b2_ref[...], 0.0)
    a = jnp.dot(w3_ref[...], h, preferred_element_type=jnp.float32).reshape(3, hl, wl)
    b = mean_y - a * mean_x

    # Hoisted W-pass of the bilinear upsample: ONE matmul for all 6 planes.
    ab = jnp.concatenate([a, b], axis=0).reshape(6 * hl, wl)          # [A0..2, b0..2]
    m6 = jnp.dot(ab, uw_t_ref[...], preferred_element_type=jnp.float32)  # (6*Hl, Wh)

    # Lane-major half-upsampled planes: [A0 b0 A1 b1 A2 b2] along lanes.
    for c in range(3):
        planes_ref[0, :, (2 * c) * wh:(2 * c + 1) * wh] = m6[c * hl:(c + 1) * hl]
        planes_ref[0, :, (2 * c + 1) * wh:(2 * c + 2) * wh] = m6[(3 + c) * hl:(4 + c) * hl]


# ----------------------------------------------------------------------------
# Phase 2: streamed bilinear H-pass + fuse with the hi-res guide
# ----------------------------------------------------------------------------
def upsample_fuse_kernel(planes_ref, uh_ref, x_hr_ref, out_ref):
    uh_blk = uh_ref[...]                                   # (tile_h, Hl)
    wh = out_ref.shape[3]
    # Per-channel matmul + fuse: keeps live vregs small and overlaps MXU
    # (next channel) with VPU fuse + dense vector stores (current channel).
    for c in range(3):
        pc = planes_ref[0, :, (2 * c) * wh:(2 * c + 2) * wh]      # (Hl, 2*Wh)
        m = jnp.dot(uh_blk, pc, preferred_element_type=jnp.float32)  # (tile_h, 2*Wh)
        out_ref[0, c] = (m[:, :wh] * x_hr_ref[0, c] + m[:, wh:]).astype(out_ref.dtype)


# ----------------------------------------------------------------------------
# Wrapper
# ----------------------------------------------------------------------------
def conv_guided_filter(x_lr, y_lr, x_hr, params, *, radius=1, row_tile=None):
    b, c, hl, wl = x_lr.shape
    _, _, hh, wh = x_hr.shape
    assert c == 3
    # TODO(synk): for real (non-demo) shapes pad Wh to a multiple of 128 and Hh
    #             to a multiple of 8 on the host to keep all stores lane-dense.

    w1, w2, w3, s1, b1, s2, b2 = params

    # Host-built constant operators.  1/N is folded in:
    # N = box(ones) = rowsum(Sh) (outer) rowsum(Sw).
    sh = _box_tap_matrix(hl, radius)
    sw = _box_tap_matrix(wl, radius)
    shn = sh / sh.sum(axis=1, keepdims=True)
    swn = sw / sw.sum(axis=1, keepdims=True)
    # Block-diagonal H-pass operator (12 planes).  Fine for small low-res grids;
    # for very large Hl switch to a batched dot_general instead.
    shn_bd = jnp.asarray(_block_diag(shn, 12))            # (12*Hl, 12*Hl)
    swn_t = jnp.asarray(swn.T)                            # (Wl, Wl)
    uh = jnp.asarray(_bilinear_matrix(hh, hl))            # (Hh, Hl)
    uw_t = jnp.asarray(_bilinear_matrix(wh, wl).T)        # (Wl, Wh)

    s1c, b1c = s1.reshape(32, 1), b1.reshape(32, 1)
    s2c, b2c = s2.reshape(32, 1), b2.reshape(32, 1)

    c1 = lambda a: pl.BlockSpec(a.shape, lambda i: (0,) * a.ndim)

    # ---------------- Phase 1 ------------------------------------------------
    p1_flops = b * (2 * 12 * hl * wl * (12 * hl + wl)
                    + 2 * hl * wl * (6 * 32 + 32 * 32 + 32 * 3)
                    + 2 * 6 * hl * wl * wh)
    p1_bytes = b * 4 * (2 * 3 * hl * wl + hl * 6 * wh)

    planes = pl.pallas_call(
        coeff_kernel,
        out_shape=jax.ShapeDtypeStruct((b, hl, 6 * wh), jnp.float32),
        grid_spec=pltpu.PrefetchScalarGridSpec(
            num_scalar_prefetch=0,
            grid=(b,),
            in_specs=[
                pl.BlockSpec((1, 3, hl, wl), lambda i: (i, 0, 0, 0)),   # x_lr
                pl.BlockSpec((1, 3, hl, wl), lambda i: (i, 0, 0, 0)),   # y_lr
                c1(shn_bd), c1(swn_t), c1(uw_t),
                c1(w1), c1(s1c), c1(b1c),
                c1(w2), c1(s2c), c1(b2c),
                c1(w3),
            ],
            out_specs=pl.BlockSpec((1, hl, 6 * wh), lambda i: (i, 0, 0)),
        ),
        compiler_params=pltpu.CompilerParams(
            dimension_semantics=("parallel",)),
        cost_estimate=pl.CostEstimate(flops=p1_flops, transcendentals=0,
                                      bytes_accessed=p1_bytes),
    )(x_lr, y_lr, shn_bd, swn_t, uw_t, w1, s1c, b1c, w2, s2c, b2c, w3)

    # ---------------- Phase 2 ------------------------------------------------
    vmem_bytes = _vmem_capacity_bytes()
    tile_h = row_tile if row_tile is not None else _pick_row_tile(hh, wh, vmem_bytes)
    assert hh % tile_h == 0, (hh, tile_h)
    n_tiles = hh // tile_h

    blk_hr = 3 * tile_h * wh * 4
    need = (2 * 2 * blk_hr                # double-buffered x_hr in + out blocks
            + 2 * hl * 6 * wh * 4         # coefficient-plane block
            + 2 * tile_h * hl * 4         # Uh row block
            + 2 * tile_h * 2 * wh * 4     # per-channel matmul temporary
            + (4 << 20))                  # headroom / compiler scratch
    vmem_limit = int(min(max(need, 32 << 20), vmem_bytes - (8 << 20)))

    p2_flops = b * (2 * 6 * hh * hl * wh + 2 * 3 * hh * wh)
    p2_bytes = b * 4 * (2 * 3 * hh * wh + n_tiles * hl * 6 * wh + hh * hl)

    return pl.pallas_call(
        upsample_fuse_kernel,
        out_shape=jax.ShapeDtypeStruct((b, 3, hh, wh), jnp.float32),
        grid_spec=pltpu.PrefetchScalarGridSpec(
            num_scalar_prefetch=0,
            grid=(b, n_tiles),
            in_specs=[
                pl.BlockSpec((1, hl, 6 * wh), lambda i, j: (i, 0, 0)),     # A/b planes
                pl.BlockSpec((tile_h, hl), lambda i, j: (j, 0)),           # Uh rows
                pl.BlockSpec((1, 3, tile_h, wh), lambda i, j: (i, 0, j, 0)),  # x_hr
            ],
            out_specs=pl.BlockSpec((1, 3, tile_h, wh), lambda i, j: (i, 0, j, 0)),
        ),
        compiler_params=pltpu.CompilerParams(
            dimension_semantics=("parallel", "parallel"),
            vmem_limit_bytes=vmem_limit,
        ),
        cost_estimate=pl.CostEstimate(flops=p2_flops, transcendentals=0,
                                      bytes_accessed=p2_bytes),
    )(planes, uh, x_hr)


# ----------------------------------------------------------------------------
# Deterministic synthetic parameters (conv_a 1x1 weights + folded BatchNorm)
# ----------------------------------------------------------------------------
def init_params(key):
    ks = jax.random.split(key, 9)
    eps = 1e-5
    w1 = 0.30 * jax.random.normal(ks[0], (32, 6), jnp.float32)
    w2 = 0.20 * jax.random.normal(ks[1], (32, 32), jnp.float32)
    w3 = 0.20 * jax.random.normal(ks[2], (3, 32), jnp.float32)
    # BatchNorm2d(32) x2: eval-mode fold (gamma, beta, running stats).
    # TODO(synk): training-mode BatchNorm (batch statistics) not implemented.
    g1 = 1.0 + 0.10 * jax.random.normal(ks[3], (32,), jnp.float32)
    be1 = 0.10 * jax.random.normal(ks[4], (32,), jnp.float32)
    rm1 = 0.05 * jax.random.normal(ks[5], (32,), jnp.float32)
    rv1 = 1.0 + 0.10 * jnp.abs(jax.random.normal(ks[6], (32,), jnp.float32))
    g2 = 1.0 + 0.10 * jax.random.normal(ks[7], (32,), jnp.float32)
    be2 = 0.10 * jax.random.normal(ks[8], (32,), jnp.float32)
    rm2 = jnp.zeros((32,), jnp.float32)
    rv2 = jnp.ones((32,), jnp.float32)
    s1 = g1 / jnp.sqrt(rv1 + eps)
    b1 = be1 - rm1 * s1
    s2 = g2 / jnp.sqrt(rv2 + eps)
    b2 = be2 - rm2 * s2
    return (w1, w2, w3, s1, b1, s2, b2)


# ----------------------------------------------------------------------------
# Pure-JAX reference (independent of the operator-matrix formulation)
# ----------------------------------------------------------------------------
def reference(x_lr, y_lr, x_hr, params):
    HI = jax.lax.Precision.HIGHEST
    w1, w2, w3, s1, b1, s2, b2 = params
    _, _, hl, wl = x_lr.shape
    _, _, hh, wh = x_hr.shape

    def box(img):
        bb, cc, h, w = img.shape
        p = jnp.pad(img, ((0, 0), (0, 0), (1, 1), (1, 1)))
        out = jnp.zeros_like(img)
        for di in range(3):
            for dj in range(3):
                out = out + p[:, :, di:di + h, dj:dj + w]
        return out

    N = box(jnp.ones((1, 3, hl, wl), jnp.float32))
    mean_x = box(x_lr) / N
    mean_y = box(y_lr) / N
    cov_xy = box(x_lr * y_lr) / N - mean_x * mean_y
    var_x = box(x_lr * x_lr) / N - mean_x * mean_x

    feats = jnp.concatenate([cov_xy, var_x], axis=1)
    h = jnp.einsum('oi,bihw->bohw', w1, feats, precision=HI)
    h = jnp.maximum(h * s1[None, :, None, None] + b1[None, :, None, None], 0.0)
    h = jnp.einsum('oi,bihw->bohw', w2, h, precision=HI)
    h = jnp.maximum(h * s2[None, :, None, None] + b2[None, :, None, None], 0.0)
    A = jnp.einsum('oi,bihw->bohw', w3, h, precision=HI)
    b = mean_y - A * mean_x

    def bilerp(img, oh, ow):  # align_corners=True
        _, _, ih, iw = img.shape
        ys = jnp.arange(oh, dtype=jnp.float32) * (ih - 1) / (oh - 1)
        xs = jnp.arange(ow, dtype=jnp.float32) * (iw - 1) / (ow - 1)
        y0 = jnp.clip(jnp.floor(ys).astype(jnp.int32), 0, ih - 1)
        x0 = jnp.clip(jnp.floor(xs).astype(jnp.int32), 0, iw - 1)
        y1 = jnp.minimum(y0 + 1, ih - 1)
        x1 = jnp.minimum(x0 + 1, iw - 1)
        wy = (ys - y0.astype(jnp.float32))[:, None]
        wx = (xs - x0.astype(jnp.float32))[None, :]
        g00 = img[:, :, y0[:, None], x0[None, :]]
        g01 = img[:, :, y0[:, None], x1[None, :]]
        g10 = img[:, :, y1[:, None], x0[None, :]]
        g11 = img[:, :, y1[:, None], x1[None, :]]
        return (g00 * (1 - wy) * (1 - wx) + g01 * (1 - wy) * wx
                + g10 * wy * (1 - wx) + g11 * wy * wx)

    mean_A = bilerp(A, hh, wh)
    mean_b = bilerp(b, hh, wh)
    return mean_A * x_hr + mean_b


# ----------------------------------------------------------------------------
if __name__ == "__main__":
    B, C = 2, 3
    HL, WL = 32, 32        # low-res input/guidance
    HH, WH = 512, 128      # high-res guidance (Wh=128 -> lane-dense stores)

    key = jax.random.PRNGKey(0)
    kx, ky, kh, kp = jax.random.split(key, 4)
    x_lr = jax.random.normal(kx, (B, C, HL, WL), jnp.float32)
    y_lr = jax.random.normal(ky, (B, C, HL, WL), jnp.float32)
    x_hr = jax.random.normal(kh, (B, C, HH, WH), jnp.float32)
    params = init_params(kp)

    out = conv_guided_filter(x_lr, y_lr, x_hr, params)
    out = jax.block_until_ready(out)

    ref = reference(x_lr, y_lr, x_hr, params)
    assert out.shape == (B, C, HH, WH), out.shape
    np.testing.assert_allclose(np.asarray(out), np.asarray(ref), rtol=1e-3, atol=1e-3)

    print("KERNEL_OK")
</pallas_src>

<mosaic_0001>
module attributes {stable_mosaic.version = 11 : i64} {
  func.func @coeff_kernel(%arg0: i32, %arg1: memref<1x3x32x32xf32, #tpu.memory_space<vmem>>, %arg2: memref<1x3x32x32xf32, #tpu.memory_space<vmem>>, %arg3: memref<384x384xf32, #tpu.memory_space<vmem>>, %arg4: memref<32x32xf32, #tpu.memory_space<vmem>>, %arg5: memref<32x128xf32, #tpu.memory_space<vmem>>, %arg6: memref<32x6xf32, #tpu.memory_space<vmem>>, %arg7: memref<32x1xf32, #tpu.memory_space<vmem>>, %arg8: memref<32x1xf32, #tpu.memory_space<vmem>>, %arg9: memref<32x32xf32, #tpu.memory_space<vmem>>, %arg10: memref<32x1xf32, #tpu.memory_space<vmem>>, %arg11: memref<32x1xf32, #tpu.memory_space<vmem>>, %arg12: memref<3x32xf32, #tpu.memory_space<vmem>>, %arg13: memref<1x32x768xf32, #tpu.memory_space<vmem>>) attributes {dimension_semantics = [#tpu.dimension_semantics<parallel>], iteration_bounds = array<i64: 2>, scalar_prefetch = 0 : i64, scratch_operands = 0 : i64, tpu.core_type = #tpu.core_type<tc>, window_params = [{transform_indices = @transform_0, window_bounds = array<i64: 1, 3, 32, 32>}, {transform_indices = @transform_1, window_bounds = array<i64: 1, 3, 32, 32>}, {pipeline_mode = #tpu.pipeline_mode<synchronous>, transform_indices = @transform_2, window_bounds = array<i64: 384, 384>}, {pipeline_mode = #tpu.pipeline_mode<synchronous>, transform_indices = @transform_3, window_bounds = array<i64: 32, 32>}, {pipeline_mode = #tpu.pipeline_mode<synchronous>, transform_indices = @transform_4, window_bounds = array<i64: 32, 128>}, {pipeline_mode = #tpu.pipeline_mode<synchronous>, transform_indices = @transform_5, window_bounds = array<i64: 32, 6>}, {pipeline_mode = #tpu.pipeline_mode<synchronous>, transform_indices = @transform_6, window_bounds = array<i64: 32, 1>}, {pipeline_mode = #tpu.pipeline_mode<synchronous>, transform_indices = @transform_7, window_bounds = array<i64: 32, 1>}, {pipeline_mode = #tpu.pipeline_mode<synchronous>, transform_indices = @transform_8, window_bounds = array<i64: 32, 32>}, {pipeline_mode = #tpu.pipeline_mode<synchronous>, transform_indices = @transform_9, window_bounds = array<i64: 32, 1>}, {pipeline_mode = #tpu.pipeline_mode<synchronous>, transform_indices = @transform_10, window_bounds = array<i64: 32, 1>}, {pipeline_mode = #tpu.pipeline_mode<synchronous>, transform_indices = @transform_11, window_bounds = array<i64: 3, 32>}, {transform_indices = @transform_12, window_bounds = array<i64: 1, 32, 768>}]} {
    %c0 = arith.constant 0 : index
    %c0_0 = arith.constant 0 : index
    %c0_1 = arith.constant 0 : index
    %c0_2 = arith.constant 0 : index
    %0 = vector.load %arg1[%c0, %c0_0, %c0_1, %c0_2] : memref<1x3x32x32xf32, #tpu.memory_space<vmem>>, vector<1x3x32x32xf32>
    %1 = vector.shape_cast %0 : vector<1x3x32x32xf32> to vector<3x32x32xf32>
    %c0_3 = arith.constant 0 : index
    %c0_4 = arith.constant 0 : index
    %c0_5 = arith.constant 0 : index
    %c0_6 = arith.constant 0 : index
    %2 = vector.load %arg2[%c0_3, %c0_4, %c0_5, %c0_6] : memref<1x3x32x32xf32, #tpu.memory_space<vmem>>, vector<1x3x32x32xf32>
    %3 = vector.shape_cast %2 : vector<1x3x32x32xf32> to vector<3x32x32xf32>
    %4 = arith.mulf %1, %3 : vector<3x32x32xf32>
    %5 = arith.mulf %1, %1 : vector<3x32x32xf32>
    %6 = tpu.concatenate %1, %3, %4, %5 in 0 : vector<3x32x32xf32>, vector<3x32x32xf32>, vector<3x32x32xf32>, vector<3x32x32xf32> -> vector<12x32x32xf32>
    %7 = vector.shape_cast %6 : vector<12x32x32xf32> to vector<384x32xf32>
    %c0_7 = arith.constant 0 : index
    %c0_8 = arith.constant 0 : index
    %8 = vector.load %arg4[%c0_7, %c0_8] : memref<32x32xf32, #tpu.memory_space<vmem>>, vector<32x32xf32>
    %cst = arith.constant dense<0.000000e+00> : vector<384x32xf32>
    %9 = tpu.matmul %7, %8, %cst {dimension_numbers = #tpu.dot_dimension_numbers<[1], [0], [0], [1], [0, 0, 1, 1], [], []>} : vector<384x32xf32>, vector<32x32xf32>, vector<384x32xf32> -> vector<384x32xf32>
    %c0_9 = arith.constant 0 : index
    %c0_10 = arith.constant 0 : index
    %10 = vector.load %arg3[%c0_9, %c0_10] : memref<384x384xf32, #tpu.memory_space<vmem>>, vector<384x384xf32>
    %cst_11 = arith.constant dense<0.000000e+00> : vector<384x32xf32>
    %11 = tpu.matmul %10, %9, %cst_11 {dimension_numbers = #tpu.dot_dimension_numbers<[1], [0], [0], [1], [0, 0, 1, 1], [], []>} : vector<384x384xf32>, vector<384x32xf32>, vector<384x32xf32> -> vector<384x32xf32>
    %12 = vector.shape_cast %11 : vector<384x32xf32> to vector<12x32x32xf32>
    %13 = vector.extract_strided_slice %12 {offsets = [0, 0, 0], sizes = [3, 32, 32], strides = [1, 1, 1]} : vector<12x32x32xf32> to vector<3x32x32xf32>
    %14 = vector.extract_strided_slice %12 {offsets = [3, 0, 0], sizes = [3, 32, 32], strides = [1, 1, 1]} : vector<12x32x32xf32> to vector<3x32x32xf32>
    %15 = vector.extract_strided_slice %12 {offsets = [6, 0, 0], sizes = [3, 32, 32], strides = [1, 1, 1]} : vector<12x32x32xf32> to vector<3x32x32xf32>
    %16 = arith.mulf %13, %14 : vector<3x32x32xf32>
    %17 = arith.subf %15, %16 : vector<3x32x32xf32>
    %18 = vector.extract_strided_slice %12 {offsets = [9, 0, 0], sizes = [3, 32, 32], strides = [1, 1, 1]} : vector<12x32x32xf32> to vector<3x32x32xf32>
    %19 = arith.mulf %13, %13 : vector<3x32x32xf32>
    %20 = arith.subf %18, %19 : vector<3x32x32xf32>
    %21 = tpu.concatenate %17, %20 in 0 : vector<3x32x32xf32>, vector<3x32x32xf32> -> vector<6x32x32xf32>
    %22 = vector.shape_cast %21 : vector<6x32x32xf32> to vector<6x1024xf32>
    %c0_12 = arith.constant 0 : index
    %c0_13 = arith.constant 0 : index
    %23 = vector.load %arg6[%c0_12, %c0_13] : memref<32x6xf32, #tpu.memory_space<vmem>>, vector<32x6xf32>
    %cst_14 = arith.constant dense<0.000000e+00> : vector<32x1024xf32>
    %24 = tpu.matmul %23, %22, %cst_14 {dimension_numbers = #tpu.dot_dimension_numbers<[1], [0], [0], [1], [0, 0, 1, 1], [], []>} : vector<32x6xf32>, vector<6x1024xf32>, vector<32x1024xf32> -> vector<32x1024xf32>
    %c0_15 = arith.constant 0 : index
    %c0_16 = arith.constant 0 : index
    %25 = vector.load %arg7[%c0_15, %c0_16] : memref<32x1xf32, #tpu.memory_space<vmem>>, vector<32x1xf32>
    %26 = vector.broadcast %25 : vector<32x1xf32> to vector<32x1024xf32>
    %27 = arith.mulf %24, %26 : vector<32x1024xf32>
    %c0_17 = arith.constant 0 : index
    %c0_18 = arith.constant 0 : index
    %28 = vector.load %arg8[%c0_17, %c0_18] : memref<32x1xf32, #tpu.memory_space<vmem>>, vector<32x1xf32>
    %29 = vector.broadcast %28 : vector<32x1xf32> to vector<32x1024xf32>
    %30 = arith.addf %27, %29 : vector<32x1024xf32>
    %cst_19 = arith.constant 0.000000e+00 : f32
    %31 = vector.broadcast %cst_19 : f32 to vector<32x1024xf32>
    %32 = arith.maximumf %30, %31 : vector<32x1024xf32>
    %c0_20 = arith.constant 0 : index
    %c0_21 = arith.constant 0 : index
    %33 = vector.load %arg9[%c0_20, %c0_21] : memref<32x32xf32, #tpu.memory_space<vmem>>, vector<32x32xf32>
    %cst_22 = arith.constant dense<0.000000e+00> : vector<32x1024xf32>
    %34 = tpu.matmul %33, %32, %cst_22 {dimension_numbers = #tpu.dot_dimension_numbers<[1], [0], [0], [1], [0, 0, 1, 1], [], []>} : vector<32x32xf32>, vector<32x1024xf32>, vector<32x1024xf32> -> vector<32x1024xf32>
    %c0_23 = arith.constant 0 : index
    %c0_24 = arith.constant 0 : index
    %35 = vector.load %arg10[%c0_23, %c0_24] : memref<32x1xf32, #tpu.memory_space<vmem>>, vector<32x1xf32>
    %36 = vector.broadcast %35 : vector<32x1xf32> to vector<32x1024xf32>
    %37 = arith.mulf %34, %36 : vector<32x1024xf32>
    %c0_25 = arith.constant 0 : index
    %c0_26 = arith.constant 0 : index
    %38 = vector.load %arg11[%c0_25, %c0_26] : memref<32x1xf32, #tpu.memory_space<vmem>>, vector<32x1xf32>
    %39 = vector.broadcast %38 : vector<32x1xf32> to vector<32x1024xf32>
    %40 = arith.addf %37, %39 : vector<32x1024xf32>
    %cst_27 = arith.constant 0.000000e+00 : f32
    %41 = vector.broadcast %cst_27 : f32 to vector<32x1024xf32>
    %42 = arith.maximumf %40, %41 : vector<32x1024xf32>
    %c0_28 = arith.constant 0 : index
    %c0_29 = arith.constant 0 : index
    %43 = vector.load %arg12[%c0_28, %c0_29] : memref<3x32xf32, #tpu.memory_space<vmem>>, vector<3x32xf32>
    %cst_30 = arith.constant dense<0.000000e+00> : vector<3x1024xf32>
    %44 = tpu.matmul %43, %42, %cst_30 {dimension_numbers = #tpu.dot_dimension_numbers<[1], [0], [0], [1], [0, 0, 1, 1], [], []>} : vector<3x32xf32>, vector<32x1024xf32>, vector<3x1024xf32> -> vector<3x1024xf32>
    %45 = vector.shape_cast %44 : vector<3x1024xf32> to vector<3x32x32xf32>
    %46 = arith.mulf %45, %13 : vector<3x32x32xf32>
    %47 = arith.subf %14, %46 : vector<3x32x32xf32>
    %48 = tpu.concatenate %45, %47 in 0 : vector<3x32x32xf32>, vector<3x32x32xf32> -> vector<6x32x32xf32>
    %49 = vector.shape_cast %48 : vector<6x32x32xf32> to vector<192x32xf32>
    %c0_31 = arith.constant 0 : index
    %c0_32 = arith.constant 0 : index
    %50 = vector.load %arg5[%c0_31, %c0_32] : memref<32x128xf32, #tpu.memory_space<vmem>>, vector<32x128xf32>
    %cst_33 = arith.constant dense<0.000000e+00> : vector<192x128xf32>
    %51 = tpu.matmul %49, %50, %cst_33 {dimension_numbers = #tpu.dot_dimension_numbers<[1], [0], [0], [1], [0, 0, 1, 1], [], []>} : vector<192x32xf32>, vector<32x128xf32>, vector<192x128xf32> -> vector<192x128xf32>
    %52 = vector.extract_strided_slice %51 {offsets = [0, 0], sizes = [32, 128], strides = [1, 1]} : vector<192x128xf32> to vector<32x128xf32>
    %c0_34 = arith.constant 0 : index
    %c0_35 = arith.constant 0 : index
    %c0_36 = arith.constant 0 : index
    %53 = vector.load %arg13[%c0_34, %c0_35, %c0_36] : memref<1x32x768xf32, #tpu.memory_space<vmem>>, vector<1x32x128xf32>
    %54 = vector.shape_cast %53 : vector<1x32x128xf32> to vector<32x128xf32>
    %55 = vector.shape_cast %52 : vector<32x128xf32> to vector<1x32x128xf32>
    tpu.vector_store %arg13[%c0_34, %c0_35, %c0_36], %55 {strides = array<i32>} : memref<1x32x768xf32, #tpu.memory_space<vmem>>, vector<1x32x128xf32>,
    %56 = vector.extract_strided_slice %51 {offsets = [96, 0], sizes = [32, 128], strides = [1, 1]} : vector<192x128xf32> to vector<32x128xf32>
    %c0_37 = arith.constant 0 : index
    %c0_38 = arith.constant 0 : index
    %c128 = arith.constant 128 : index
    %57 = vector.load %arg13[%c0_37, %c0_38, %c128] : memref<1x32x768xf32, #tpu.memory_space<vmem>>, vector<1x32x128xf32>
    %58 = vector.shape_cast %57 : vector<1x32x128xf32> to vector<32x128xf32>
    %59 = vector.shape_cast %56 : vector<32x128xf32> to vector<1x32x128xf32>
    tpu.vector_store %arg13[%c0_37, %c0_38, %c128], %59 {strides = array<i32>} : memref<1x32x768xf32, #tpu.memory_space<vmem>>, vector<1x32x128xf32>,
    %60 = vector.extract_strided_slice %51 {offsets = [32, 0], sizes = [32, 128], strides = [1, 1]} : vector<192x128xf32> to vector<32x128xf32>
    %c0_39 = arith.constant 0 : index
    %c0_40 = arith.constant 0 : index
    %c256 = arith.constant 256 : index
    %61 = vector.load %arg13[%c0_39, %c0_40, %c256] : memref<1x32x768xf32, #tpu.memory_space<vmem>>, vector<1x32x128xf32>
    %62 = vector.shape_cast %61 : vector<1x32x128xf32> to vector<32x128xf32>
    %63 = vector.shape_cast %60 : vector<32x128xf32> to vector<1x32x128xf32>
    tpu.vector_store %arg13[%c0_39, %c0_40, %c256], %63 {strides = array<i32>} : memref<1x32x768xf32, #tpu.memory_space<vmem>>, vector<1x32x128xf32>,
    %64 = vector.extract_strided_slice %51 {offsets = [128, 0], sizes = [32, 128], strides = [1, 1]} : vector<192x128xf32> to vector<32x128xf32>
    %c0_41 = arith.constant 0 : index
    %c0_42 = arith.constant 0 : index
    %c384 = arith.constant 384 : index
    %65 = vector.load %arg13[%c0_41, %c0_42, %c384] : memref<1x32x768xf32, #tpu.memory_space<vmem>>, vector<1x32x128xf32>
    %66 = vector.shape_cast %65 : vector<1x32x128xf32> to vector<32x128xf32>
    %67 = vector.shape_cast %64 : vector<32x128xf32> to vector<1x32x128xf32>
    tpu.vector_store %arg13[%c0_41, %c0_42, %c384], %67 {strides = array<i32>} : memref<1x32x768xf32, #tpu.memory_space<vmem>>, vector<1x32x128xf32>,
    %68 = vector.extract_strided_slice %51 {offsets = [64, 0], sizes = [32, 128], strides = [1, 1]} : vector<192x128xf32> to vector<32x128xf32>
    %c0_43 = arith.constant 0 : index
    %c0_44 = arith.constant 0 : index
    %c512 = arith.constant 512 : index
    %69 = vector.load %arg13[%c0_43, %c0_44, %c512] : memref<1x32x768xf32, #tpu.memory_space<vmem>>, vector<1x32x128xf32>
    %70 = vector.shape_cast %69 : vector<1x32x128xf32> to vector<32x128xf32>
    %71 = vector.shape_cast %68 : vector<32x128xf32> to vector<1x32x128xf32>
    tpu.vector_store %arg13[%c0_43, %c0_44, %c512], %71 {strides = array<i32>} : memref<1x32x768xf32, #tpu.memory_space<vmem>>, vector<1x32x128xf32>,
    %72 = vector.extract_strided_slice %51 {offsets = [160, 0], sizes = [32, 128], strides = [1, 1]} : vector<192x128xf32> to vector<32x128xf32>
    %c0_45 = arith.constant 0 : index
    %c0_46 = arith.constant 0 : index
    %c640 = arith.constant 640 : index
    %73 = vector.load %arg13[%c0_45, %c0_46, %c640] : memref<1x32x768xf32, #tpu.memory_space<vmem>>, vector<1x32x128xf32>
    %74 = vector.shape_cast %73 : vector<1x32x128xf32> to vector<32x128xf32>
    %75 = vector.shape_cast %72 : vector<32x128xf32> to vector<1x32x128xf32>
    tpu.vector_store %arg13[%c0_45, %c0_46, %c640], %75 {strides = array<i32>} : memref<1x32x768xf32, #tpu.memory_space<vmem>>, vector<1x32x128xf32>,
    return
  }
  func.func @transform_0(%arg0: i32) -> (i32, i32, i32, i32) {
    %c0_i32 = arith.constant 0 : i32
    %c0_i32_0 = arith.constant 0 : i32
    %c0_i32_1 = arith.constant 0 : i32
    %c0_i32_2 = arith.constant 0 : i32
    return %arg0, %c0_i32, %c0_i32_0, %c0_i32_1 : i32, i32, i32, i32
  }
  func.func @transform_1(%arg0: i32) -> (i32, i32, i32, i32) {
    %c0_i32 = arith.constant 0 : i32
    %c0_i32_0 = arith.constant 0 : i32
    %c0_i32_1 = arith.constant 0 : i32
    %c0_i32_2 = arith.constant 0 : i32
    return %arg0, %c0_i32, %c0_i32_0, %c0_i32_1 : i32, i32, i32, i32
  }
  func.func @transform_2(%arg0: i32) -> (i32, i32) {
    %c0_i32 = arith.constant 0 : i32
    %c0_i32_0 = arith.constant 0 : i32
    %c0_i32_1 = arith.constant 0 : i32
    return %c0_i32, %c0_i32_0 : i32, i32
  }
  func.func @transform_3(%arg0: i32) -> (i32, i32) {
    %c0_i32 = arith.constant 0 : i32
    %c0_i32_0 = arith.constant 0 : i32
    %c0_i32_1 = arith.constant 0 : i32
    return %c0_i32, %c0_i32_0 : i32, i32
  }
  func.func @transform_4(%arg0: i32) -> (i32, i32) {
    %c0_i32 = arith.constant 0 : i32
    %c0_i32_0 = arith.constant 0 : i32
    %c0_i32_1 = arith.constant 0 : i32
    return %c0_i32, %c0_i32_0 : i32, i32
  }
  func.func @transform_5(%arg0: i32) -> (i32, i32) {
    %c0_i32 = arith.constant 0 : i32
    %c0_i32_0 = arith.constant 0 : i32
    %c0_i32_1 = arith.constant 0 : i32
    return %c0_i32, %c0_i32_0 : i32, i32
  }
  func.func @transform_6(%arg0: i32) -> (i32, i32) {
    %c0_i32 = arith.constant 0 : i32
    %c0_i32_0 = arith.constant 0 : i32
    %c0_i32_1 = arith.constant 0 : i32
    return %c0_i32, %c0_i32_0 : i32, i32
  }
  func.func @transform_7(%arg0: i32) -> (i32, i32) {
    %c0_i32 = arith.constant 0 : i32
    %c0_i32_0 = arith.constant 0 : i32
    %c0_i32_1 = arith.constant 0 : i32
    return %c0_i32, %c0_i32_0 : i32, i32
  }
  func.func @transform_8(%arg0: i32) -> (i32, i32) {
    %c0_i32 = arith.constant 0 : i32
    %c0_i32_0 = arith.constant 0 : i32
    %c0_i32_1 = arith.constant 0 : i32
    return %c0_i32, %c0_i32_0 : i32, i32
  }
  func.func @transform_9(%arg0: i32) -> (i32, i32) {
    %c0_i32 = arith.constant 0 : i32
    %c0_i32_0 = arith.constant 0 : i32
    %c0_i32_1 = arith.constant 0 : i32
    return %c0_i32, %c0_i32_0 : i32, i32
  }
  func.func @transform_10(%arg0: i32) -> (i32, i32) {
    %c0_i32 = arith.constant 0 : i32
    %c0_i32_0 = arith.constant 0 : i32
    %c0_i32_1 = arith.constant 0 : i32
    return %c0_i32, %c0_i32_0 : i32, i32
  }
  func.func @transform_11(%arg0: i32) -> (i32, i32) {
    %c0_i32 = arith.constant 0 : i32
    %c0_i32_0 = arith.constant 0 : i32
    %c0_i32_1 = arith.constant 0 : i32
    return %c0_i32, %c0_i32_0 : i32, i32
  }
  func.func @transform_12(%arg0: i32) -> (i32, i32, i32) {
    %c0_i32 = arith.constant 0 : i32
    %c0_i32_0 = arith.constant 0 : i32
    %c0_i32_1 = arith.constant 0 : i32
    return %arg0, %c0_i32, %c0_i32_0 : i32, i32, i32
  }
}

</mosaic_0001>

<bundles_post_ra>
// kernel: tpu_custom_call.1
= control target key start
LH: loop header
LB: loop body
LE: loop exit
PB: predicated region body
PF: predicated region fallthrough
CT: control target
= control target key end

     0   :  { %s6196_s0 = inlined_call_operand.hbm [shape: f32[2,3,32,32], index: 0, kind: input, shape index: {}]   ;;  %s6197_s1 = inlined_call_operand.hbm [shape: f32[2,3,32,32], index: 1, kind: input, shape index: {}]   ;;  %s6198_s2 = inlined_call_operand.hbm [shape: f32[384,384], index: 2, kind: input, shape index: {}]   ;;  %s6199_s3 = inlined_call_operand.vmem [shape: f32[32,32], index: 3, kind: input, shape index: {}]   ;;  %s6200_s4 = inlined_call_operand.vmem [shape: f32[32,128], index: 4, kind: input, shape index: {}]   ;;  %s6201_s5 = inlined_call_operand.vmem [shape: f32[32,6], index: 5, kind: input, shape index: {}]   ;;  %s6202_s6 = inlined_call_operand.vmem [shape: f32[32,1], index: 6, kind: input, shape index: {}]   ;;  %s6203_s7 = inlined_call_operand.vmem [shape: f32[32,1], index: 7, kind: input, shape index: {}]   ;;  %s6204_s8 = inlined_call_operand.vmem [shape: f32[32,32], index: 8, kind: input, shape index: {}]   ;;  %s6205_s9 = inlined_call_operand.vmem [shape: f32[32,1], index: 9, kind: input, shape index: {}]   ;;  %s6206_s10 = inlined_call_operand.vmem [shape: f32[32,1], index: 10, kind: input, shape index: {}]   ;;  %s6207_s11 = inlined_call_operand.vmem [shape: f32[3,32], index: 11, kind: input, shape index: {}]   ;;  %s6208_s12 = inlined_call_operand.hbm [shape: f32[2,32,768], index: 12, kind: output, shape index: {}]  }
   0x1   :  { %6243 = sst [smem:[#allocation106_spill]] %s6196_s0 }
   0x2   :  { %6244 = sst [smem:[#allocation107_spill]] %s6198_s2 }
   0x3   :  { %6245 = sst [smem:[#allocation108_spill]] %s6200_s4 }
   0x4   :  { %6246 = sst [smem:[#allocation109_spill]] %s6207_s11 }
   0x5   :  { %6247 = sst [smem:[#allocation110_spill]] %s6208_s12 }
   0x6   :  { %17 = vsyncpa [#allocation3], 0 }
   0x7   :  { %19 = vsyncpa [#allocation3 + $0x1], 0 }
   0x8   :  { %20 = vsyncpa [#allocation6], 0 }
   0x9   :  { %22 = vsyncpa [#allocation6 + $0x1], 0 }
   0xa   :  { %23 = vsyncpa [#allocation4], 0 }
   0xb   :  { %25 = vsyncpa [#allocation4 + $0x1], 0  ;;  %s4207_s21 = smov 0   ;;  %s4209_s22 = smov 0  }
   0xc   :  { %s4211_s23 = smov 0   ;;  %s4213_s24 = smov 0  }
   0xd LB: > { %6248 = sst [smem:[#allocation13_spill]] %s4115_s21  ;;  %s4228_s25 = sadd.s32 4294967295, %s4127_s24   ;;  %s4127_s24 = sphi %s4213_s24, %s6457_s24   ;;  %s4123_s23 = sphi %s4211_s23, %s6459_s23   ;;  %s4119_s22 = sphi %s4209_s22, %s6461_s22   ;;  %s4115_s21 = sphi %s4207_s21, %s6460_s21  }
   0xe   : > { %6249 = sst [smem:[#allocation14_spill]] %s4123_s23  ;;  %s3684_s26 = sadd.s32 4294967294, %s4127_s24  }
   0xf   : > { %p51_p0 = scmp.ne.s32.totalorder %s4119_s22, %s4115_s21  ;;  %p52_p1 = scmp.eq.s32.totalorder %s4228_s25, 0 }
  0x10   : > { %p311_p2 = scmp.eq.s32.totalorder %s4228_s25, 1  ;;  %p317_p3 = scmp.eq.s32.totalorder %s3684_s26, 1 }
  0x11   : > { %p4237_p4 = por %p52_p1, %p51_p0  ;;  %p3685_p5 = scmp.ge.s32.totalorder %s4127_s24, 1 }
  0x12   : > { %p4242_p6 = por %p317_p3, %p51_p0  ;;  %p324_p7 = scmp.lt.s32.totalorder %s4127_s24, 3 }
  0x13   : > { %s6253_s2 = sld [smem:[#allocation107_spill]]  ;;  %s4129_s15 = smov [#allocation7]  }
  0x14   : > { %s6251_s28 = scalar_select %p4242_p6, 1, 0 }
  0x15   : > { %p4250_p8 = pnand %p3685_p5, %p324_p7  ;;  %s337_s16 = sshll.u32 %s4129_s15, 4  ;;  %s338_s16 = int_to_ptr.vmem [resolvable:$true] %s337_s16 }
  0x16   : > { %6252 = sst [smem:[#allocation15_spill]] %s6251_s28  ;;  %s4260_s17 = sadd.s32 1, %s4127_s24  }
  0x17   : > { %p3896_p9 = pneg %p4250_p8  ;;  %6255 = sst [smem:[#allocation16_spill]] %s4260_s17 }
  0x18   : > { %s4130_s18 = smov 384   ;;  %s4131_s19 = smov 24  }
  0x19   : > { %s335_s13 = sshll.u32 %s6253_s2, 4  ;;  %p3897_p10 = pnand %p3896_p9, %p52_p1  ;;  %s336_s13 = int_to_ptr.hbm [resolvable:$true] %s335_s13 }
  0x1a   : > { %s35_s20 = ssub.s32 %s4127_s24, %s4260_s17  ;;  %s38_s26 = sadd.s32 1, %s4123_s23 }
  0x1b   : > { %3899 = dma.hbm_to_vmem [thread:$0]  (!%p3897_p10), %s336_s13, 18432, %s338_s16, [#allocation6], %s4130_s18, %s4130_s18, %s4131_s19  }
  0x1c   : > { %p36_p12 = scmp.eq.s32.totalorder %s35_s20, 0  ;;  %p45_p13 = scmp.ne.s32.totalorder %s4123_s23, %s4119_s22 }
  0x1d   : > { %p46_p0 = scmp.eq.s32.totalorder %s4127_s24, 0  ;;  %p3912_p3 = scmp.lt.s32.totalorder %s4127_s24, 2 }
  0x1e   : > { %s4270_s29 = scalar_select %p36_p12, %s4123_s23, %s38_s26  }
  0x1f   : > { %p47_p5 = por %p46_p0, %p45_p13  ;;  %p4274_p7 = por %p311_p2, %p45_p13 }
  0x20   : > { %6256 = sst [smem:[#allocation17_spill]] %s4270_s29  ;;  %s378_s15 = sand.u32 1, %s4123_s23  }
  0x21   : > { %s6257_s30 = scalar_select %p4274_p7, 1, 0 }
  0x22   : > { %s6214_s2 = smul.u32 96, %s4127_s24  ;;  %s6259_s0 = sld [smem:[#allocation106_spill]] }
  0x23   : > { %6258 = sst [smem:[#allocation18_spill]] %s6257_s30  ;;  %s4280_s28 = smul.u32 96, %s378_s15 }
  0x24   : > { %p4287_p9 = pnand %p3912_p3, %p47_p5  ;;  %s379_s23 = scalar_lea.sflag [#allocation3], %s378_s15 }
  0x25   : > { %s382_s26 = scalar_lea.vmem [#allocation2], %s4280_s28 }
  0x26   : > { %s390_s29 = sshll.u32 %s382_s26, 4  ;;  %p3997_p10 = pneg %p4287_p9  ;;  %s391_s29 = int_to_ptr.vmem [resolvable:$true] %s390_s29 }
  0x28   : > { %s387_s18 = scalar_lea.hbm %s6259_s0, %s6214_s2  ;;  %s4000_s2 = scalar_lea.hbm %s6259_s0, 192 }
  0x29   : > { %s388_s20 = sshll.u32 %s387_s18, 4  ;;  %s389_s20 = int_to_ptr.hbm [resolvable:$true] %s388_s20 }
  0x2a   : > { %s3993_s17 = sshra.s32 %s389_s20, 4  ;;  %s3994_s17 = int_to_ptr.hbm [resolvable:$true] %s3993_s17 }
  0x2b   : > { %s3995_s21 = scalar_lea.hbm %s3994_s17, 96  ;;  %p4001_p0 = scmp.lt.s32.totalorder %s3994_s17, %s6259_s0 }
  0x2c   : > { %p3996_p2 = scmp.ne.s32.totalorder %s3994_s17, %s3995_s21  ;;  %p4002_p3 = scmp.lt.s32.totalorder %s4000_s2, %s3995_s21 }
  0x2e   : > { %p3998_p12 = pnand %p3997_p10, %p3996_p2  ;;  %p4003_p5 = por %p4002_p3, %p4001_p0 }
  0x30   : > { %p3999_p13 = pneg %p3998_p12 }
  0x32   : > { %p4004_p11 = pnand %p4003_p5, %p3999_p13 }
  0x34   : > { %4007 = shalt.err (!%p4004_p11)
}
  0x35   : > { %s4132_s15 = smov 128   ;;  %s4133_s26 = smov 8  }
  0x36   : > { %3903 = dma.hbm_to_vmem [thread:$0]  (!%p4287_p9), %s389_s20, 1536, %s391_s29, %s379_s23, %s4132_s15, %s4132_s15, %s4133_s26  }
  0x37   : > { %s400_s30 = sand.u32 1, %s4127_s24   ;;  %s6261_s13 = smul.u32 96, %s4127_s24 }
  0x38   : > { %s404_s2 = scalar_lea.vmem [#allocation5], %s4280_s28  ;;  %s401_s18 = scalar_lea.sflag [#allocation6], %s400_s30 }
  0x39   : > { %s409_s12 = scalar_lea.hbm %s6197_s1, %s6261_s13  ;;  %s412_s21 = sshll.u32 %s404_s2, 4  ;;  %s413_s21 = int_to_ptr.vmem [resolvable:$true] %s412_s21 }
  0x3a   : > { %s410_s17 = sshll.u32 %s409_s12, 4  ;;  %s4030_s20 = scalar_lea.hbm %s6197_s1, 192  ;;  %s411_s17 = int_to_ptr.hbm [resolvable:$true] %s410_s17 }
  0x3b   : > { %s4023_s0 = sshra.s32 %s411_s17, 4  ;;  %s4024_s0 = int_to_ptr.hbm [resolvable:$true] %s4023_s0 }
  0x3c   : > { %s4025_s11 = scalar_lea.hbm %s4024_s0, 96  ;;  %p4031_p13 = scmp.lt.s32.totalorder %s4024_s0, %s6197_s1 }
  0x3d   : > { %p4026_p11 = scmp.ne.s32.totalorder %s4024_s0, %s4025_s11  ;;  %p4032_p0 = scmp.lt.s32.totalorder %s4030_s20, %s4025_s11 }
  0x3f   : > { %p4028_p2 = pnand %p4026_p11, %p3997_p10  ;;  %p4033_p3 = por %p4032_p0, %p4031_p13 }
  0x41   : > { %p4029_p12 = pneg %p4028_p2 }
  0x43   : > { %p4034_p5 = pnand %p4033_p3, %p4029_p12 }
  0x45   : > { %4037 = shalt.err (!%p4034_p5)
}
  0x46   : > { %3906 = dma.hbm_to_vmem [thread:$0]  (!%p4287_p9), %s411_s17, 1536, %s413_s21, %s401_s18, %s4132_s15, %s4132_s15, %s4133_s26  }
  0x47   : > { %424 = sbr.rel (%p4250_p8) target bundleno = 2197 (0x895), region = 68 }
  0x4c   : > { %s4326_s28 = sand.u32 1, %s4119_s22  }
  0x4d   : > { %s3883_s30 = smul.u32 96, %s4326_s28  ;;  %s427_s16 = scalar_lea.sflag [#allocation3], %s4326_s28 }
  0x4f   : > { %s4330_s12 = scalar_lea.vmem [#allocation2], %s3883_s30 }
  0x50   : > { %4098 = dma.done.wait (%p4237_p4), %s427_s16, 1536  }
  0x51   : > { %4100 = vsyncadd (%p4237_p4), %s427_s16, 4294965760  ;;  %s436_s0 = sand.u32 1, %s4228_s25   ;;  %s4337_s14 = scalar_lea.vmem [#allocation5], %s3883_s30 }
  0x52   : > { %s437_s11 = scalar_lea.sflag [#allocation6], %s436_s0 }
  0x53   : > { %4102 = dma.done.wait (%p4237_p4), %s437_s11, 1536  }
  0x54   : > { %4104 = vsyncadd (%p4237_p4), %s437_s11, 4294965760 }
  0x55   : > { %4106 = dma.done.wait (%p52_p1), [#allocation6], 18432  }
  0x56   : > { %4108 = vsyncadd (%p52_p1), [#allocation6], 4294948864  ;;  %v543_v0 = vld [vmem:[%s6199_s3 + $0x18] sm:$0xff]  ;;  %v542_v1 = vld [vmem:[%s6199_s3 + $0x10] sm:$0xff]  ;;  %vm544_vm0 = vcmask 261120   ;;  %vm1526_vm1 = vcmask 1047556  }
  0x57   : > { %701 = vmatpush.msra.mxu0 %v543_v0  ;;  %v541_v2 = vld [vmem:[%s6199_s3 + $0x8] sm:$0xff]  ;;  %v540_v3 = vld [vmem:[%s6199_s3] sm:$0xff]  ;;  %v4370_v6 = vld [vmem:[%s4330_s12 + $0x10] sm:$0xff]  ;;  %s4136_s23 = smov 96   ;;  %s4137_s29 = smov 32   ;;  %vm2055_vm2 = vcmask 523264  }
  0x58   : > { %v4360_v4 = vld [vmem:[%s4330_s12] sm:$0xff]  ;;  %v4365_v5 = vld [vmem:[%s4330_s12 + $0x8] sm:$0xff]  ;;  %v4375_v7 = vld [vmem:[%s4330_s12 + $0x18] sm:$0xff]  ;;  %v530_v0 = vmul.f32 %v4370_v6, %v4370_v6  ;;  %s4138_s20 = smov 64   ;;  %vm2057_vm3 = vcmask 785408   ;;  %vm2097_vm4 = vcmask 1045504  }
  0x59   : > { %702 = vmatpush.msra.mxu0 %v542_v1  ;;  %v4380_v8 = vld [vmem:[%s4330_s12 + $0x20] sm:$0xff]  ;;  %v4385_v9 = vld [vmem:[%s4330_s12 + $0x28] sm:$0xff]  ;;  %v4390_v10 = vld [vmem:[%s4330_s12 + $0x30] sm:$0xff]  ;;  %v528_v60 = vmul.f32 %v4360_v4, %v4360_v4  ;;  %v529_v62 = vmul.f32 %v4365_v5, %v4365_v5  ;;  %vm2084_vm5 = vcmask 48128   ;;  %s6426_s30 = sld [smem:[#allocation109_spill]]  ;;  %s3885_s27 = smul.u32 192, %s4228_s25 }
  0x5a   : > { %v4395_v11 = vld [vmem:[%s4330_s12 + $0x38] sm:$0xff]  ;;  %v504_v12 = vld [vmem:[%s4337_s14] sm:$0xff]  ;;  %v4407_v15 = vld [vmem:[%s4330_s12 + $0x48] sm:$0xff]  ;;  %s6427_s0 = sld [smem:[#allocation108_spill]]  ;;  %s3564_s16 = scalar_lea.sflag [#allocation4], %s4326_s28 }
  0x5b   : > { %703 = vmatpush.msra.mxu0 %v541_v2  ;;  %v516_v13 = vmul.f32 %v504_v12, %v4360_v4  ;;  %v4402_v14 = vld [vmem:[%s4330_s12 + $0x40] sm:$0xff]  ;;  %v4412_v16 = vld [vmem:[%s4330_s12 + $0x50] sm:$0xff]  ;;  %v4417_v17 = vld [vmem:[%s4330_s12 + $0x58] sm:$0xff]  ;;  %v531_v2 = vmul.f32 %v4375_v7, %v4375_v7  ;;  %s6453_s18 = sld [smem:[#allocation110_spill]] }
  0x5c   : > { %v505_v18 = vld [vmem:[%s4337_s14 + $0x8] sm:$0xff]  ;;  %v506_v19 = vld [vmem:[%s4337_s14 + $0x10] sm:$0xff]  ;;  %v507_v20 = vld [vmem:[%s4337_s14 + $0x18] sm:$0xff] }
  0x5d   : > { %704 = vmatpush.msra.mxu0 %v540_v3  ;;  %v508_v22 = vld [vmem:[%s4337_s14 + $0x20] sm:$0xff]  ;;  %v509_v24 = vld [vmem:[%s4337_s14 + $0x28] sm:$0xff]  ;;  %v510_v26 = vld [vmem:[%s4337_s14 + $0x30] sm:$0xff]  ;;  %v517_v38 = vmul.f32 %v505_v18, %v4365_v5  ;;  %v518_v40 = vmul.f32 %v506_v19, %v4370_v6  ;;  %v519_v42 = vmul.f32 %v507_v20, %v4375_v7 }
  0x5e   : > { %3692 = vmatmul.msk.f32.vlgmr.msra.gmra.mxu0 %vm544_vm0, %v4360_v4  ;;  %v511_v28 = vld [vmem:[%s4337_s14 + $0x38] sm:$0xff]  ;;  %v512_v30 = vld [vmem:[%s4337_s14 + $0x40] sm:$0xff]  ;;  %v513_v32 = vld [vmem:[%s4337_s14 + $0x48] sm:$0xff]  ;;  %v520_v44 = vmul.f32 %v508_v22, %v4380_v8  ;;  %v521_v46 = vmul.f32 %v509_v24, %v4385_v9  ;;  %v522_v48 = vmul.f32 %v510_v26, %v4390_v10  ;;  %v532_v4 = vmul.f32 %v4380_v8, %v4380_v8 }
  0x5f   : > { %v4455_v34 = vld [vmem:[%s4337_s14 + $0x50] sm:$0xff]  ;;  %v4460_v36 = vld [vmem:[%s4337_s14 + $0x58] sm:$0xff]  ;;  %v523_v50 = vmul.f32 %v511_v28, %v4395_v11  ;;  %v524_v52 = vmul.f32 %v512_v30, %v4402_v14  ;;  %v525_v54 = vmul.f32 %v513_v32, %v4407_v15 }
  0x60   : > { %v526_v56 = vmul.f32 %v4455_v34, %v4412_v16  ;;  %v527_v58 = vmul.f32 %v4460_v36, %v4417_v17 }
  0x61   : > { %s3575_s4 = scalar_lea.hbm %s6453_s18, %s3885_s27  ;;  %s4073_s14 = scalar_lea.hbm %s6453_s18, 384 }
  0x66   : > { %3693 = vmatmul.msk.f32.gmra.mxu0 %vm544_vm0, %v4365_v5  ;;  %v943_v5 = vld [vmem:[#allocation7 + $0x2e8] sm:$0xff] }
  0x6e   : > { %3694 = vmatmul.msk.f32.gmra.mxu0 %vm544_vm0, %v4370_v6  ;;  %v533_v6 = vmul.f32 %v4385_v9, %v4385_v9 }
  0x76   : > { %3695 = vmatmul.msk.f32.gmra.mxu0 %vm544_vm0, %v4375_v7  ;;  %v534_v7 = vmul.f32 %v4390_v10, %v4390_v10 }
  0x7e   : > { %3696 = vmatmul.msk.f32.gmra.mxu0 %vm544_vm0, %v4380_v8  ;;  %v535_v8 = vmul.f32 %v4395_v11, %v4395_v11 }
  0x86   : > { %3697 = vmatmul.msk.f32.gmra.mxu0 %vm544_vm0, %v4385_v9  ;;  %v536_v9 = vmul.f32 %v4402_v14, %v4402_v14 }
  0x8e   : > { %3698 = vmatmul.msk.f32.gmra.mxu0 %vm544_vm0, %v4390_v10  ;;  %v537_v10 = vmul.f32 %v4407_v15, %v4407_v15 }
  0x96   : > { %3699 = vmatmul.msk.f32.gmra.mxu0 %vm544_vm0, %v4395_v11  ;;  %v538_v11 = vmul.f32 %v4412_v16, %v4412_v16 }
  0x9e   : > { %3700 = vmatmul.msk.f32.gmra.mxu0 %vm544_vm0, %v4402_v14  ;;  %v539_v14 = vmul.f32 %v4417_v17, %v4417_v17 }
  0xa6   : > { %3701 = vmatmul.msk.f32.gmra.mxu0 %vm544_vm0, %v4407_v15 }
  0xae   : > { %3702 = vmatmul.msk.f32.gmra.mxu0 %vm544_vm0, %v4412_v16 }
  0xb6   : > { %3703 = vmatmul.msk.f32.gmra.mxu0 %vm544_vm0, %v4417_v17 }
  0xbe   : > { %3704 = vmatmul.msk.f32.gmra.mxu0 %vm544_vm0, %v504_v12 }
  0xc6   : > { %3705 = vmatmul.msk.f32.gmra.mxu0 %vm544_vm0, %v505_v18  ;;  %v946_v18 = vld [vmem:[#allocation7 + $0x300] sm:$0xff] }
  0xce   : > { %3706 = vmatmul.msk.f32.gmra.mxu0 %vm544_vm0, %v506_v19 }
  0xd6   : > { %3707 = vmatmul.msk.f32.gmra.mxu0 %vm544_vm0, %v507_v20  ;;  %v949_v20 = vld [vmem:[#allocation7 + $0x318] sm:$0xff] }
  0xdb   : > { %v4428_v21 = vpop.f32.mrf.mxu0 }
  0xde   : > { %3708 = vmatmul.msk.f32.gmra.mxu0 %vm544_vm0, %v508_v22  ;;  %v952_v22 = vld [vmem:[#allocation7 + $0x330] sm:$0xff] }
  0xe3   : > { %v4432_v23 = vpop.f32.mrf.mxu0 }
  0xe6   : > { %3709 = vmatmul.msk.f32.gmra.mxu0 %vm544_vm0, %v509_v24  ;;  %v955_v24 = vld [vmem:[#allocation7 + $0x348] sm:$0xff] }
  0xeb   : > { %v4436_v25 = vpop.f32.mrf.mxu0 }
  0xee   : > { %3710 = vmatmul.msk.f32.gmra.mxu0 %vm544_vm0, %v510_v26  ;;  %v958_v26 = vld [vmem:[#allocation7 + $0x360] sm:$0xff] }
  0xf3   : > { %v4440_v27 = vpop.f32.mrf.mxu0 }
  0xf6   : > { %3711 = vmatmul.msk.f32.gmra.mxu0 %vm544_vm0, %v511_v28  ;;  %v961_v28 = vld [vmem:[#allocation7 + $0x378] sm:$0xff] }
  0xfb   : > { %v4444_v29 = vpop.f32.mrf.mxu0 }
  0xfe   : > { %3712 = vmatmul.msk.f32.gmra.mxu0 %vm544_vm0, %v512_v30  ;;  %v851_v30 = vld [vmem:[#allocation7 + $0x8] sm:$0xff] }
 0x103   : > { %v4448_v31 = vpop.f32.mrf.mxu0 }
 0x106   : > { %3713 = vmatmul.msk.f32.gmra.mxu0 %vm544_vm0, %v513_v32  ;;  %v854_v32 = vld [vmem:[#allocation7 + $0x20] sm:$0xff] }
 0x10b   : > { %v4452_v33 = vpop.f32.mrf.mxu0 }
 0x10e   : > { %3714 = vmatmul.msk.f32.gmra.mxu0 %vm544_vm0, %v4455_v34  ;;  %v857_v34 = vld [vmem:[#allocation7 + $0x38] sm:$0xff] }
 0x113   : > { %v727_v35 = vpop.f32.mrf.mxu0 }
 0x116   : > { %3715 = vmatmul.msk.f32.gmra.mxu0 %vm544_vm0, %v4460_v36  ;;  %v964_v36 = vld [vmem:[#allocation7 + $0x390] sm:$0xff] }
 0x11b   : > { %v730_v37 = vpop.f32.mrf.mxu0 }
 0x11e   : > { %3716 = vmatmul.msk.f32.gmra.mxu0 %vm544_vm0, %v516_v13 }
 0x123   : > { %v733_v39 = vpop.f32.mrf.mxu0 }
 0x126   : > { %3717 = vmatmul.msk.f32.gmra.mxu0 %vm544_vm0, %v517_v38 }
 0x12b   : > { %v736_v41 = vpop.f32.mrf.mxu0 }
 0x12e   : > { %3718 = vmatmul.msk.f32.gmra.mxu0 %vm544_vm0, %v518_v40  ;;  %v863_v40 = vld [vmem:[#allocation7 + $0x68] sm:$0xff] }
 0x133   : > { %v739_v43 = vpop.f32.mrf.mxu0 }
 0x136   : > { %3719 = vmatmul.msk.f32.gmra.mxu0 %vm544_vm0, %v519_v42  ;;  %v970_v42 = vld [vmem:[#allocation7 + $0x3c0] sm:$0xff] }
 0x13b   : > { %v742_v45 = vpop.f32.mrf.mxu0 }
 0x13e   : > { %3720 = vmatmul.msk.f32.gmra.mxu0 %vm544_vm0, %v520_v44 }
 0x143   : > { %v745_v47 = vpop.f32.mrf.mxu0 }
 0x146   : > { %3721 = vmatmul.msk.f32.gmra.mxu0 %vm544_vm0, %v521_v46  ;;  %v869_v46 = vld [vmem:[#allocation7 + $0x98] sm:$0xff] }
 0x14b   : > { %v748_v49 = vpop.f32.mrf.mxu0 }
 0x14e   : > { %3722 = vmatmul.msk.f32.gmra.mxu0 %vm544_vm0, %v522_v48  ;;  %v976_v48 = vld [vmem:[#allocation7 + $0x3f0] sm:$0xff] }
 0x153   : > { %v751_v51 = vpop.f32.mrf.mxu0 }
 0x154   : > { %994 = vmatpush.msra.mxu1 %v751_v51  ;;  %3847 = vmatpush.msra.mxu2 %v751_v51 }
 0x155   : > { %3848 = vmatpush.msra.mxu3 %v751_v51  ;;  %v979_v51 = vld [vmem:[#allocation7 + $0x408] sm:$0xff] }
 0x156   : > { %3723 = vmatmul.msk.f32.gmra.mxu0 %vm544_vm0, %v523_v50  ;;  %995 = vmatpush.msra.mxu1 %v748_v49 }
 0x157   : > { %3849 = vmatpush.msra.mxu2 %v748_v49  ;;  %3850 = vmatpush.msra.mxu3 %v748_v49  ;;  %v872_v49 = vld [vmem:[#allocation7 + $0xb0] sm:$0xff] }
 0x158   : > { %996 = vmatpush.msra.mxu1 %v745_v47 }
 0x159   : > { %3851 = vmatpush.msra.mxu2 %v745_v47  ;;  %3852 = vmatpush.msra.mxu3 %v745_v47 }
 0x15a   : > { %997 = vmatpush.msra.mxu1 %v742_v45 }
 0x15b   : > { %3853 = vmatpush.msra.mxu2 %v742_v45  ;;  %3854 = vmatpush.msra.mxu3 %v742_v45  ;;  %v4480_v53 = vpop.f32.mrf.mxu0  ;;  %v973_v45 = vld [vmem:[#allocation7 + $0x3d8] sm:$0xff] }
 0x15c   : > { %998 = vmatpush.msra.mxu1 %v739_v43 }
 0x15d   : > { %3855 = vmatpush.msra.mxu2 %v739_v43  ;;  %3856 = vmatpush.msra.mxu3 %v739_v43  ;;  %v866_v43 = vld [vmem:[#allocation7 + $0x80] sm:$0xff] }
 0x15e   : > { %3724 = vmatmul.msk.f32.gmra.mxu0 %vm544_vm0, %v524_v52  ;;  %999 = vmatpush.msra.mxu1 %v736_v41  ;;  %v875_v52 = vld [vmem:[#allocation7 + $0xc8] sm:$0xff] }
 0x15f   : > { %3857 = vmatpush.msra.mxu2 %v736_v41  ;;  %3858 = vmatpush.msra.mxu3 %v736_v41 }
 0x160   : > { %1000 = vmatpush.msra.mxu1 %v733_v39 }
 0x161   : > { %3859 = vmatpush.msra.mxu2 %v733_v39  ;;  %3860 = vmatpush.msra.mxu3 %v733_v39  ;;  %v967_v39 = vld [vmem:[#allocation7 + $0x3a8] sm:$0xff] }
 0x162   : > { %1001 = vmatpush.msra.mxu1 %v730_v37 }
 0x163   : > { %3861 = vmatpush.msra.mxu2 %v730_v37  ;;  %3862 = vmatpush.msra.mxu3 %v730_v37  ;;  %v4484_v55 = vpop.f32.mrf.mxu0  ;;  %v860_v37 = vld [vmem:[#allocation7 + $0x50] sm:$0xff] }
 0x164   : > { %1002 = vmatpush.msra.mxu1 %v727_v35 }
 0x165   : > { %3863 = vmatpush.msra.mxu2 %v727_v35  ;;  %3864 = vmatpush.msra.mxu3 %v727_v35 }
 0x166   : > { %3725 = vmatmul.msk.f32.gmra.mxu0 %vm544_vm0, %v525_v54  ;;  %1003 = vmatpush.msra.mxu1 %v4452_v33 }
 0x167   : > { %3865 = vmatpush.msra.mxu2 %v4452_v33  ;;  %3866 = vmatpush.msra.mxu3 %v4452_v33 }
 0x168   : > { %1004 = vmatpush.msra.mxu1 %v4448_v31 }
 0x169   : > { %3867 = vmatpush.msra.mxu2 %v4448_v31  ;;  %3868 = vmatpush.msra.mxu3 %v4448_v31 }
 0x16a   : > { %1005 = vmatpush.msra.mxu1 %v4444_v29 }
 0x16b   : > { %3869 = vmatpush.msra.mxu2 %v4444_v29  ;;  %3870 = vmatpush.msra.mxu3 %v4444_v29  ;;  %v4498_v57 = vpop.f32.mrf.mxu0 }
 0x16c   : > { %1006 = vmatpush.msra.mxu1 %v4440_v27 }
 0x16d   : > { %3871 = vmatpush.msra.mxu2 %v4440_v27  ;;  %3872 = vmatpush.msra.mxu3 %v4440_v27 }
 0x16e   : > { %3726 = vmatmul.msk.f32.gmra.mxu0 %vm544_vm0, %v526_v56  ;;  %1007 = vmatpush.msra.mxu1 %v4436_v25  ;;  %v878_v56 = vld [vmem:[#allocation7 + $0xe0] sm:$0xff] }
 0x16f   : > { %3873 = vmatpush.msra.mxu2 %v4436_v25  ;;  %3874 = vmatpush.msra.mxu3 %v4436_v25 }
 0x170   : > { %1008 = vmatpush.msra.mxu1 %v4432_v23 }
 0x171   : > { %3875 = vmatpush.msra.mxu2 %v4432_v23  ;;  %3876 = vmatpush.msra.mxu3 %v4432_v23 }
 0x172   : > { %1009 = vmatpush.msra.mxu1 %v4428_v21 }
 0x173   : > { %3877 = vmatpush.msra.mxu2 %v4428_v21  ;;  %3878 = vmatpush.msra.mxu3 %v4428_v21  ;;  %v4515_v59 = vpop.f32.mrf.mxu0 }
 0x174   : > { %1103 = vmatmul.f32.vlgmr.msra.gmra.mxu2 %v943_v5  ;;  %1124 = vmatmul.f32.vlgmr.msra.gmra.mxu3 %v964_v36  ;;  %v850_v5 = vld [vmem:[#allocation7] sm:$0xff] }
 0x175   : > { %1010 = vmatmul.f32.vlgmr.msra.gmra.mxu1 %v850_v5  ;;  %v914_v36 = vld [vmem:[#allocation7 + $0x200] sm:$0xff] }
 0x176   : > { %3727 = vmatmul.msk.f32.gmra.mxu0 %vm544_vm0, %v527_v58 }
 0x17b   : > { %v766_v61 = vpop.f32.mrf.mxu0 }
 0x17c   : > { %1106 = vmatmul.f32.gmra.mxu2 %v946_v18  ;;  %1127 = vmatmul.f32.gmra.mxu3 %v967_v39  ;;  %v853_v18 = vld [vmem:[#allocation7 + $0x18] sm:$0xff] }
 0x17d   : > { %1013 = vmatmul.f32.gmra.mxu1 %v853_v18  ;;  %v877_v39 = vld [vmem:[#allocation7 + $0xd8] sm:$0xff]  ;;  %v935_v18 = vld [vmem:[#allocation7 + $0x2a8] sm:$0xff] }
 0x17e   : > { %3728 = vmatmul.msk.f32.gmra.mxu0 %vm544_vm0, %v528_v60  ;;  %v881_v60 = vld [vmem:[#allocation7 + $0xf8] sm:$0xff] }
 0x183   : > { %v769_v63 = vpop.f32.mrf.mxu0 }
 0x184   : > { %1109 = vmatmul.f32.gmra.mxu2 %v949_v20  ;;  %1130 = vmatmul.f32.gmra.mxu3 %v970_v42  ;;  %v856_v20 = vld [vmem:[#allocation7 + $0x30] sm:$0xff] }
 0x185   : > { %1016 = vmatmul.f32.gmra.mxu1 %v856_v20 }
 0x186   : > { %3729 = vmatmul.msk.f32.gmra.mxu0 %vm544_vm0, %v529_v62 }
 0x18b   : > { %v772_v1 = vpop.f32.mrf.mxu0 }
 0x18c   : > { %1112 = vmatmul.f32.gmra.mxu2 %v952_v22  ;;  %1133 = vmatmul.f32.gmra.mxu3 %v973_v45  ;;  %v920_v45 = vld [vmem:[#allocation7 + $0x230] sm:$0xff] }
 0x18e   : > { %3730 = vmatmul.msk.f32.gmra.mxu0 %vm544_vm0, %v530_v0  ;;  %v884_v0 = vld [vmem:[#allocation7 + $0x110] sm:$0xff] }
 0x193   : > { %v775_v3 = vpop.f32.mrf.mxu0 }
 0x194   : > { %1115 = vmatmul.f32.gmra.mxu2 %v955_v24  ;;  %1136 = vmatmul.f32.gmra.mxu3 %v976_v48  ;;  %v862_v24 = vld [vmem:[#allocation7 + $0x60] sm:$0xff]  ;;  %v883_v48 = vld [vmem:[#allocation7 + $0x108] sm:$0xff] }
 0x196   : > { %3731 = vmatmul.msk.f32.gmra.mxu0 %vm544_vm0, %v531_v2 }
 0x19b   : > { %v778_v12 = vpop.f32.mrf.mxu0 }
 0x19c   : > { %1118 = vmatmul.f32.gmra.mxu2 %v958_v26  ;;  %1139 = vmatmul.f32.gmra.mxu3 %v979_v51 }
 0x19e   : > { %3732 = vmatmul.msk.f32.gmra.mxu0 %vm544_vm0, %v532_v4 }
 0x1a3   : > { %v781_v13 = vpop.f32.mrf.mxu0 }
 0x1a4   : > { %1121 = vmatmul.f32.gmra.mxu2 %v961_v28  ;;  %v858_v28 = vld [vmem:[#allocation7 + $0x40] sm:$0xff] }
 0x1a6   : > { %3733 = vmatmul.msk.f32.gmra.mxu0 %vm544_vm0, %v533_v6  ;;  %v890_v6 = vld [vmem:[#allocation7 + $0x140] sm:$0xff] }
 0x1ab   : > { %v784_v19 = vpop.f32.mrf.mxu0 }
 0x1ae   : > { %3734 = vmatmul.msk.f32.gmra.mxu0 %vm544_vm0, %v534_v7  ;;  %v893_v7 = vld [vmem:[#allocation7 + $0x158] sm:$0xff] }
 0x1b3   : > { %v787_v21 = vpop.f32.mrf.mxu0 }
 0x1b6   : > { %3735 = vmatmul.msk.f32.gmra.mxu0 %vm544_vm0, %v535_v8  ;;  %v896_v8 = vld [vmem:[#allocation7 + $0x170] sm:$0xff] }
 0x1bb   : > { %v790_v23 = vpop.f32.mrf.mxu0 }
 0x1be   : > { %3736 = vmatmul.msk.f32.gmra.mxu0 %vm544_vm0, %v536_v9  ;;  %v899_v9 = vld [vmem:[#allocation7 + $0x188] sm:$0xff] }
 0x1c3   : > { %v793_v25 = vpop.f32.mrf.mxu0 }
 0x1c6   : > { %3737 = vmatmul.msk.f32.gmra.mxu0 %vm544_vm0, %v537_v10  ;;  %v902_v10 = vld [vmem:[#allocation7 + $0x1a0] sm:$0xff] }
 0x1cb   : > { %v796_v27 = vpop.f32.mrf.mxu0 }
 0x1ce   : > { %3738 = vmatmul.msk.f32.gmra.mxu0 %vm544_vm0, %v538_v11  ;;  %v865_v11 = vld [vmem:[#allocation7 + $0x78] sm:$0xff] }
 0x1d3   : > { %v799_v29 = vpop.f32.mrf.mxu0 }
 0x1d4   : > { %1155 = vmatpush.msrb.mxu2 %v799_v29  ;;  %v868_v29 = vld [vmem:[#allocation7 + $0x90] sm:$0xff] }
 0x1d6   : > { %3739 = vmatmul.msk.f32.gmra.mxu0 %vm544_vm0, %v539_v14  ;;  %1156 = vmatpush.msrb.mxu2 %v796_v27  ;;  %v905_v27 = vld [vmem:[#allocation7 + $0x1b8] sm:$0xff] }
 0x1d8   : > { %1157 = vmatpush.msrb.mxu2 %v793_v25  ;;  %v855_v25 = vld [vmem:[#allocation7 + $0x28] sm:$0xff] }
 0x1da   : > { %1158 = vmatpush.msrb.mxu2 %v790_v23  ;;  %v852_v23 = vld [vmem:[#allocation7 + $0x10] sm:$0xff] }
 0x1db   : > { %v4554_v15 = vpop.f32.mrf.mxu0 }
 0x1dc   : > { %1159 = vmatpush.msrb.mxu2 %v787_v21  ;;  %v859_v21 = vld [vmem:[#allocation7 + $0x48] sm:$0xff] }
 0x1dd   : > { %1019 = vmatmul.f32.gmra.mxu1 %v859_v21  ;;  %v938_v21 = vld [vmem:[#allocation7 + $0x2c0] sm:$0xff] }
 0x1de   : > { %1160 = vmatpush.msrb.mxu2 %v784_v19 }
 0x1e0   : > { %1161 = vmatpush.msrb.mxu2 %v781_v13 }
 0x1e2   : > { %1162 = vmatpush.msrb.mxu2 %v778_v12 }
 0x1e3   : > { %v4556_v16 = vpop.f32.mrf.mxu0 }
 0x1e4   : > { %1163 = vmatpush.msrb.mxu2 %v775_v3  ;;  %v887_v3 = vld [vmem:[#allocation7 + $0x128] sm:$0xff] }
 0x1e5   : > { %1022 = vmatmul.f32.gmra.mxu1 %v862_v24 }
 0x1e6   : > { %1164 = vmatpush.msrb.mxu2 %v772_v1  ;;  %v991_v1 = vld [vmem:[#allocation7 + $0x468] sm:$0xff] }
 0x1e8   : > { %1165 = vmatpush.msrb.mxu2 %v769_v63 }
 0x1ea   : > { %1166 = vmatpush.msrb.mxu2 %v766_v61  ;;  %v988_v61 = vld [vmem:[#allocation7 + $0x450] sm:$0xff] }
 0x1eb   : > { %v4558_v17 = vpop.f32.mrf.mxu0 }
 0x1ec   : > { %1167 = vmatpush.msrb.mxu2 %v4515_v59 }
 0x1ed   : > { %1025 = vmatmul.f32.gmra.mxu1 %v865_v11  ;;  %v894_v11 = vld [vmem:[#allocation7 + $0x160] sm:$0xff] }
 0x1ee   : > { %1168 = vmatpush.msrb.mxu2 %v4498_v57  ;;  %v985_v57 = vld [vmem:[#allocation7 + $0x438] sm:$0xff] }
 0x1f0   : > { %1169 = vmatpush.msrb.mxu2 %v4484_v55  ;;  %v982_v55 = vld [vmem:[#allocation7 + $0x420] sm:$0xff] }
 0x1f1   : > { %1142 = vmatmul.f32.gmra.mxu3 %v982_v55  ;;  %v926_v55 = vld [vmem:[#allocation7 + $0x260] sm:$0xff] }
 0x1f2   : > { %1170 = vmatpush.msrb.mxu2 %v4480_v53 }
 0x1f3   : > { %v4564_v31 = vpop.f32.mrf.mxu0  ;;  %1171 = vmatmul.f32.vlgmr.msrb.gmra.mxu2 %v851_v30  ;;  %v871_v30 = vld [vmem:[#allocation7 + $0xa8] sm:$0xff] }
 0x1f5   : > { %1028 = vmatmul.f32.gmra.mxu1 %v868_v29  ;;  %v904_v29 = vld [vmem:[#allocation7 + $0x1b0] sm:$0xff] }
 0x1f7   : > { %v4572_v54 = vpop.f32.mrf.mxu2 }
 0x1f8   : > { %6262 = vst [vmem:[#allocation19_spill] sm:$0xff] %v4572_v54 }
 0x1f9   : > { %1145 = vmatmul.f32.gmra.mxu3 %v985_v57 }
 0x1fb   : > { %v4566_v33 = vpop.f32.mrf.mxu0  ;;  %1174 = vmatmul.f32.gmra.mxu2 %v854_v32  ;;  %v864_v32 = vld [vmem:[#allocation7 + $0x70] sm:$0xff] }
 0x1fd   : > { %1031 = vmatmul.f32.gmra.mxu1 %v871_v30 }
 0x1ff   : > { %v4574_v59 = vpop.f32.mrf.mxu2 }
 0x200   : > { %6263 = vst [vmem:[#allocation20_spill] sm:$0xff] %v4574_v59 }
 0x201   : > { %1148 = vmatmul.f32.gmra.mxu3 %v988_v61  ;;  %v929_v61 = vld [vmem:[#allocation7 + $0x278] sm:$0xff] }
 0x203   : > { %v4568_v35 = vpop.f32.mrf.mxu0  ;;  %1177 = vmatmul.f32.gmra.mxu2 %v857_v34  ;;  %v874_v34 = vld [vmem:[#allocation7 + $0xc0] sm:$0xff] }
 0x205   : > { %1034 = vmatmul.f32.gmra.mxu1 %v874_v34  ;;  %v900_v34 = vld [vmem:[#allocation7 + $0x190] sm:$0xff] }
 0x207   : > { %v4576_v63 = vpop.f32.mrf.mxu2 }
 0x208   : > { %6264 = vst [vmem:[#allocation21_spill] sm:$0xff] %v4576_v63 }
 0x209   : > { %1151 = vmatmul.f32.gmra.mxu3 %v991_v1  ;;  %v892_v1 = vld [vmem:[#allocation7 + $0x150] sm:$0xff] }
 0x20b   : > { %v4570_v38 = vpop.f32.mrf.mxu0  ;;  %1180 = vmatmul.f32.gmra.mxu2 %v860_v37  ;;  %v867_v37 = vld [vmem:[#allocation7 + $0x88] sm:$0xff] }
 0x20d   : > { %1037 = vmatmul.f32.gmra.mxu1 %v877_v39  ;;  %v910_v39 = vld [vmem:[#allocation7 + $0x1e0] sm:$0xff] }
 0x20f   : > { %v4578_v4 = vpop.f32.mrf.mxu2 }
 0x210   : > { %6265 = vst [vmem:[#allocation22_spill] sm:$0xff] %v4578_v4 }
 0x213   : > { %v823_v41 = vpop.f32.mrf.mxu0  ;;  %1183 = vmatmul.f32.gmra.mxu2 %v863_v40  ;;  %v917_v40 = vld [vmem:[#allocation7 + $0x218] sm:$0xff] }
 0x217   : > { %v4580_v13 = vpop.f32.mrf.mxu2 }
 0x218   : > { %6266 = vst [vmem:[#allocation23_spill] sm:$0xff] %v4580_v13 }
 0x21b   : > { %v826_v44 = vpop.f32.mrf.mxu0  ;;  %1186 = vmatmul.f32.gmra.mxu2 %v866_v43 }
 0x21f   : > { %v4582_v19 = vpop.f32.mrf.mxu2 }
 0x220   : > { %6267 = vst [vmem:[#allocation24_spill] sm:$0xff] %v4582_v19  ;;  %v957_v19 = vld [vmem:[#allocation7 + $0x358] sm:$0xff] }
 0x223   : > { %v829_v47 = vpop.f32.mrf.mxu0  ;;  %1189 = vmatmul.f32.gmra.mxu2 %v869_v46  ;;  %v873_v46 = vld [vmem:[#allocation7 + $0xb8] sm:$0xff] }
 0x227   : > { %v4589_v22 = vpop.f32.mrf.mxu2 }
 0x228   : > { %6268 = vst [vmem:[#allocation25_spill] sm:$0xff] %v4589_v22 }
 0x22b   : > { %v832_v50 = vpop.f32.mrf.mxu0  ;;  %1192 = vmatmul.f32.gmra.mxu2 %v872_v49  ;;  %v923_v49 = vld [vmem:[#allocation7 + $0x248] sm:$0xff] }
 0x233   : > { %v835_v53 = vpop.f32.mrf.mxu0  ;;  %1195 = vmatmul.f32.gmra.mxu2 %v875_v52 }
 0x23b   : > { %v838_v58 = vpop.f32.mrf.mxu0  ;;  %1198 = vmatmul.f32.gmra.mxu2 %v878_v56  ;;  %v879_v56 = vld [vmem:[#allocation7 + $0xe8] sm:$0xff] }
 0x243   : > { %v841_v62 = vpop.f32.mrf.mxu0  ;;  %1201 = vmatmul.f32.gmra.mxu2 %v881_v60 }
 0x24b   : > { %v844_v2 = vpop.f32.mrf.mxu0  ;;  %1204 = vmatmul.f32.gmra.mxu2 %v884_v0 }
 0x253   : > { %v847_v12 = vpop.f32.mrf.mxu0  ;;  %1207 = vmatmul.f32.gmra.mxu2 %v887_v3  ;;  %v885_v3 = vld [vmem:[#allocation7 + $0x118] sm:$0xff] }
 0x254   : > { %1316 = vmatpush.msrb.mxu3 %v847_v12 }
 0x256   : > { %1317 = vmatpush.msrb.mxu3 %v844_v2  ;;  %v932_v2 = vld [vmem:[#allocation7 + $0x290] sm:$0xff] }
 0x258   : > { %1318 = vmatpush.msrb.mxu3 %v841_v62  ;;  %v882_v62 = vld [vmem:[#allocation7 + $0x100] sm:$0xff] }
 0x25a   : > { %1319 = vmatpush.msrb.mxu3 %v838_v58  ;;  %v889_v58 = vld [vmem:[#allocation7 + $0x138] sm:$0xff] }
 0x25b   : > { %1210 = vmatmul.f32.gmra.mxu2 %v890_v6  ;;  %v895_v6 = vld [vmem:[#allocation7 + $0x168] sm:$0xff] }
 0x25c   : > { %1320 = vmatpush.msrb.mxu3 %v835_v53  ;;  %v886_v53 = vld [vmem:[#allocation7 + $0x120] sm:$0xff] }
 0x25e   : > { %1321 = vmatpush.msrb.mxu3 %v832_v50  ;;  %v876_v50 = vld [vmem:[#allocation7 + $0xd0] sm:$0xff] }
 0x260   : > { %1322 = vmatpush.msrb.mxu3 %v829_v47 }
 0x262   : > { %1323 = vmatpush.msrb.mxu3 %v826_v44  ;;  %v880_v44 = vld [vmem:[#allocation7 + $0xf0] sm:$0xff] }
 0x263   : > { %1213 = vmatmul.f32.gmra.mxu2 %v893_v7  ;;  %1040 = vmatmul.f32.gmra.mxu1 %v880_v44  ;;  %v888_v7 = vld [vmem:[#allocation7 + $0x130] sm:$0xff] }
 0x264   : > { %1324 = vmatpush.msrb.mxu3 %v823_v41  ;;  %v870_v41 = vld [vmem:[#allocation7 + $0xa0] sm:$0xff] }
 0x266   : > { %1325 = vmatpush.msrb.mxu3 %v4570_v38 }
 0x268   : > { %1326 = vmatpush.msrb.mxu3 %v4568_v35 }
 0x26a   : > { %1327 = vmatpush.msrb.mxu3 %v4566_v33  ;;  %v4599_v33 = vpop.f32.mrf.mxu3 }
 0x26b   : > { %1216 = vmatmul.f32.gmra.mxu2 %v896_v8  ;;  %6269 = vst [vmem:[#allocation26_spill] sm:$0xff] %v4599_v33  ;;  %1043 = vmatmul.f32.gmra.mxu1 %v883_v48  ;;  %v898_v8 = vld [vmem:[#allocation7 + $0x180] sm:$0xff]  ;;  %v953_v48 = vld [vmem:[#allocation7 + $0x338] sm:$0xff] }
 0x26c   : > { %1328 = vmatpush.msrb.mxu3 %v4564_v31  ;;  %v911_v31 = vld [vmem:[#allocation7 + $0x1e8] sm:$0xff] }
 0x26e   : > { %1329 = vmatpush.msrb.mxu3 %v4558_v17 }
 0x270   : > { %1330 = vmatpush.msrb.mxu3 %v4556_v16  ;;  %v861_v16 = vld [vmem:[#allocation7 + $0x58] sm:$0xff] }
 0x272   : > { %1331 = vmatpush.msrb.mxu3 %v4554_v15  ;;  %v908_v15 = vld [vmem:[#allocation7 + $0x1d0] sm:$0xff]  ;;  %v4603_v38 = vpop.f32.mrf.mxu3 }
 0x273   : > { %1219 = vmatmul.f32.gmra.mxu2 %v899_v9  ;;  %1332 = vmatmul.f32.vlgmr.msrb.gmra.mxu3 %v852_v23  ;;  %6270 = vst [vmem:[#allocation27_spill] sm:$0xff] %v4603_v38  ;;  %v891_v9 = vld [vmem:[#allocation7 + $0x148] sm:$0xff] }
 0x274   : > { %1046 = vmatmul.f32.gmra.mxu1 %v886_v53 }
 0x276   : > { %v4593_v26 = vpop.f32.mrf.mxu2 }
 0x27a   : > { %v4607_v43 = vpop.f32.mrf.mxu3 }
 0x27b   : > { %1222 = vmatmul.f32.gmra.mxu2 %v902_v10  ;;  %1335 = vmatmul.f32.gmra.mxu3 %v855_v25  ;;  %6271 = vst [vmem:[#allocation28_spill] sm:$0xff] %v4607_v43  ;;  %v901_v10 = vld [vmem:[#allocation7 + $0x198] sm:$0xff] }
 0x27c   : > { %1049 = vmatmul.f32.gmra.mxu1 %v889_v58  ;;  %v941_v25 = vld [vmem:[#allocation7 + $0x2d8] sm:$0xff] }
 0x27d   : > { %v909_v58 = vld [vmem:[#allocation7 + $0x1d8] sm:$0xff] }
 0x27e   : > { %v4595_v14 = vpop.f32.mrf.mxu2 }
 0x282   : > { %v4611_v51 = vpop.f32.mrf.mxu3 }
 0x283   : > { %1225 = vmatmul.f32.gmra.mxu2 %v905_v27  ;;  %1338 = vmatmul.f32.gmra.mxu3 %v858_v28  ;;  %6272 = vst [vmem:[#allocation29_spill] sm:$0xff] %v4611_v51 }
 0x284   : > { %1052 = vmatmul.f32.gmra.mxu1 %v892_v1 }
 0x286   : > { %v4597_v17 = vpop.f32.mrf.mxu2 }
 0x28a   : > { %v4615_v57 = vpop.f32.mrf.mxu3 }
 0x28b   : > { %1228 = vmatmul.f32.gmra.mxu2 %v908_v15  ;;  %1341 = vmatmul.f32.gmra.mxu3 %v861_v16  ;;  %6273 = vst [vmem:[#allocation30_spill] sm:$0xff] %v4615_v57  ;;  %v944_v15 = vld [vmem:[#allocation7 + $0x2f0] sm:$0xff]  ;;  %v897_v16 = vld [vmem:[#allocation7 + $0x178] sm:$0xff] }
 0x28c   : > { %1055 = vmatmul.f32.gmra.mxu1 %v895_v6  ;;  %v912_v6 = vld [vmem:[#allocation7 + $0x1f0] sm:$0xff]  ;;  %v945_v57 = vld [vmem:[#allocation7 + $0x2f8] sm:$0xff] }
 0x28e   : > { %v4601_v35 = vpop.f32.mrf.mxu2 }
 0x292   : > { %v4619_v0 = vpop.f32.mrf.mxu3 }
 0x293   : > { %1231 = vmatmul.f32.gmra.mxu2 %v911_v31  ;;  %1344 = vmatmul.f32.gmra.mxu3 %v864_v32  ;;  %6274 = vst [vmem:[#allocation31_spill] sm:$0xff] %v4619_v0  ;;  %v907_v31 = vld [vmem:[#allocation7 + $0x1c8] sm:$0xff]  ;;  %v942_v0 = vld [vmem:[#allocation7 + $0x2e0] sm:$0xff] }
 0x294   : > { %1058 = vmatmul.f32.gmra.mxu1 %v898_v8  ;;  %v947_v32 = vld [vmem:[#allocation7 + $0x308] sm:$0xff]  ;;  %v922_v8 = vld [vmem:[#allocation7 + $0x240] sm:$0xff] }
 0x296   : > { %v4605_v42 = vpop.f32.mrf.mxu2 }
 0x29a   : > { %v4623_v5 = vpop.f32.mrf.mxu3 }
 0x29b   : > { %1234 = vmatmul.f32.gmra.mxu2 %v914_v36  ;;  %1347 = vmatmul.f32.gmra.mxu3 %v867_v37  ;;  %6275 = vst [vmem:[#allocation32_spill] sm:$0xff] %v4623_v5 }
 0x29c   : > { %1061 = vmatmul.f32.gmra.mxu1 %v901_v10 }
 0x29e   : > { %v4609_v47 = vpop.f32.mrf.mxu2 }
 0x2a2   : > { %v4627_v23 = vpop.f32.mrf.mxu3 }
 0x2a3   : > { %1237 = vmatmul.f32.gmra.mxu2 %v917_v40  ;;  %1350 = vmatmul.f32.gmra.mxu3 %v870_v41  ;;  %6276 = vst [vmem:[#allocation33_spill] sm:$0xff] %v4627_v23  ;;  %v950_v40 = vld [vmem:[#allocation7 + $0x320] sm:$0xff]  ;;  %v903_v41 = vld [vmem:[#allocation7 + $0x1a8] sm:$0xff] }
 0x2a4   : > { %1064 = vmatmul.f32.gmra.mxu1 %v904_v29  ;;  %v939_v23 = vld [vmem:[#allocation7 + $0x2c8] sm:$0xff] }
 0x2a6   : > { %v4613_v52 = vpop.f32.mrf.mxu2 }
 0x2aa   : > { %v4631_v27 = vpop.f32.mrf.mxu3 }
 0x2ab   : > { %1240 = vmatmul.f32.gmra.mxu2 %v920_v45  ;;  %1353 = vmatmul.f32.gmra.mxu3 %v873_v46  ;;  %6277 = vst [vmem:[#allocation34_spill] sm:$0xff] %v4631_v27  ;;  %v913_v46 = vld [vmem:[#allocation7 + $0x1f8] sm:$0xff]  ;;  %v986_v27 = vld [vmem:[#allocation7 + $0x440] sm:$0xff] }
 0x2ac   : > { %1067 = vmatmul.f32.gmra.mxu1 %v907_v31 }
 0x2ae   : > { %v4617_v60 = vpop.f32.mrf.mxu2 }
 0x2b2   : > { %v4635_v30 = vpop.f32.mrf.mxu3 }
 0x2b3   : > { %1243 = vmatmul.f32.gmra.mxu2 %v923_v49  ;;  %1356 = vmatmul.f32.gmra.mxu3 %v876_v50  ;;  %6278 = vst [vmem:[#allocation35_spill] sm:$0xff] %v4635_v30  ;;  %v906_v49 = vld [vmem:[#allocation7 + $0x1c0] sm:$0xff]  ;;  %v983_v30 = vld [vmem:[#allocation7 + $0x428] sm:$0xff] }
 0x2b4   : > { %1070 = vmatmul.f32.gmra.mxu1 %v910_v39  ;;  %v968_v39 = vld [vmem:[#allocation7 + $0x3b0] sm:$0xff] }
 0x2b6   : > { %v4621_v12 = vpop.f32.mrf.mxu2 }
 0x2bb   : > { %1246 = vmatmul.f32.gmra.mxu2 %v926_v55  ;;  %1359 = vmatmul.f32.gmra.mxu3 %v879_v56  ;;  %v916_v55 = vld [vmem:[#allocation7 + $0x210] sm:$0xff] }
 0x2bc   : > { %1073 = vmatmul.f32.gmra.mxu1 %v913_v46  ;;  %v956_v56 = vld [vmem:[#allocation7 + $0x350] sm:$0xff] }
 0x2be   : > { %v4625_v20 = vpop.f32.mrf.mxu2 }
 0x2c3   : > { %1249 = vmatmul.f32.gmra.mxu2 %v929_v61  ;;  %1362 = vmatmul.f32.gmra.mxu3 %v882_v62  ;;  %v4649_v61 = vpop.f32.mrf.mxu1 }
 0x2c4   : > { %1076 = vmatmul.f32.gmra.mxu1 %v916_v55  ;;  %v971_v55 = vld [vmem:[#allocation7 + $0x3c8] sm:$0xff] }
 0x2c6   : > { %v4629_v24 = vpop.f32.mrf.mxu2 }
 0x2cb   : > { %1252 = vmatmul.f32.gmra.mxu2 %v932_v2  ;;  %1365 = vmatmul.f32.gmra.mxu3 %v885_v3  ;;  %v919_v2 = vld [vmem:[#allocation7 + $0x228] sm:$0xff] }
 0x2cc   : > { %v959_v3 = vld [vmem:[#allocation7 + $0x368] sm:$0xff]  ;;  %1079 = vmatmul.f32.gmra.mxu1 %v919_v2 }
 0x2ce   : > { %v4633_v28 = vpop.f32.mrf.mxu2 }
 0x2d3   : > { %1255 = vmatmul.f32.gmra.mxu2 %v935_v18  ;;  %1368 = vmatmul.f32.gmra.mxu3 %v888_v7  ;;  %v4655_v18 = vpop.f32.mrf.mxu1 }
 0x2d4   : > { %1082 = vmatmul.f32.gmra.mxu1 %v922_v8  ;;  %v974_v8 = vld [vmem:[#allocation7 + $0x3e0] sm:$0xff] }
 0x2d6   : > { %v4637_v36 = vpop.f32.mrf.mxu2 }
 0x2db   : > { %1258 = vmatmul.f32.gmra.mxu2 %v938_v21  ;;  %1371 = vmatmul.f32.gmra.mxu3 %v891_v9  ;;  %v962_v21 = vld [vmem:[#allocation7 + $0x380] sm:$0xff]  ;;  %v915_v9 = vld [vmem:[#allocation7 + $0x208] sm:$0xff]  ;;  %v4663_v29 = vpop.f32.mrf.mxu1 }
 0x2de   : > { %v4641_v44 = vpop.f32.mrf.mxu2 }
 0x2e3   : > { %1261 = vmatmul.f32.gmra.mxu2 %v941_v25  ;;  %1374 = vmatmul.f32.gmra.mxu3 %v894_v11  ;;  %v925_v11 = vld [vmem:[#allocation7 + $0x258] sm:$0xff] }
 0x2e4   : > { %1085 = vmatmul.f32.gmra.mxu1 %v925_v11 }
 0x2e6   : > { %v4645_v50 = vpop.f32.mrf.mxu2 }
 0x2eb   : > { %1264 = vmatmul.f32.gmra.mxu2 %v944_v15  ;;  %1377 = vmatmul.f32.gmra.mxu3 %v897_v16  ;;  %v965_v15 = vld [vmem:[#allocation7 + $0x398] sm:$0xff]  ;;  %v918_v16 = vld [vmem:[#allocation7 + $0x220] sm:$0xff] }
 0x2ee   : > { %v4653_v1 = vpop.f32.mrf.mxu2 }
 0x2f3   : > { %1267 = vmatmul.f32.gmra.mxu2 %v947_v32  ;;  %1380 = vmatmul.f32.gmra.mxu3 %v900_v34  ;;  %v928_v34 = vld [vmem:[#allocation7 + $0x270] sm:$0xff] }
 0x2f4   : > { %1088 = vmatmul.f32.gmra.mxu1 %v928_v34  ;;  %v930_v34 = vld [vmem:[#allocation7 + $0x280] sm:$0xff] }
 0x2f6   : > { %v4639_v37 = vpop.f32.mrf.mxu3  ;;  %v4659_v10 = vpop.f32.mrf.mxu2 }
 0x2fb   : > { %1270 = vmatmul.f32.gmra.mxu2 %v950_v40  ;;  %1383 = vmatmul.f32.gmra.mxu3 %v903_v41  ;;  %v921_v40 = vld [vmem:[#allocation7 + $0x238] sm:$0xff]  ;;  %v4669_v41 = vpop.f32.mrf.mxu1 }
 0x2fe   : > { %v4643_v45 = vpop.f32.mrf.mxu3  ;;  %v4665_v31 = vpop.f32.mrf.mxu2 }
 0x303   : > { %1273 = vmatmul.f32.gmra.mxu2 %v953_v48  ;;  %1386 = vmatmul.f32.gmra.mxu3 %v906_v49  ;;  %v931_v49 = vld [vmem:[#allocation7 + $0x288] sm:$0xff] }
 0x304   : > { %1091 = vmatmul.f32.gmra.mxu1 %v931_v49  ;;  %v940_v49 = vld [vmem:[#allocation7 + $0x2d0] sm:$0xff] }
 0x306   : > { %v4647_v53 = vpop.f32.mrf.mxu3  ;;  %v4671_v46 = vpop.f32.mrf.mxu2 }
 0x307   : > { %6279 = vst [vmem:[#allocation36_spill] sm:$0xff] %v4671_v46 }
 0x30b   : > { %1276 = vmatmul.f32.gmra.mxu2 %v956_v56  ;;  %1389 = vmatmul.f32.gmra.mxu3 %v909_v58  ;;  %v924_v56 = vld [vmem:[#allocation7 + $0x250] sm:$0xff]  ;;  %v4675_v58 = vpop.f32.mrf.mxu1 }
 0x30e   : > { %v4651_v62 = vpop.f32.mrf.mxu3 }
 0x313   : > { %1279 = vmatmul.f32.gmra.mxu2 %v959_v3  ;;  %1392 = vmatmul.f32.gmra.mxu3 %v912_v6  ;;  %v4679_v3 = vpop.f32.mrf.mxu2  ;;  %v934_v6 = vld [vmem:[#allocation7 + $0x2a0] sm:$0xff] }
 0x314   : > { %6280 = vst [vmem:[#allocation37_spill] sm:$0xff] %v4679_v3  ;;  %1094 = vmatmul.f32.gmra.mxu1 %v934_v6  ;;  %v933_v6 = vld [vmem:[#allocation7 + $0x298] sm:$0xff] }
 0x316   : > { %v4657_v7 = vpop.f32.mrf.mxu3 }
 0x31b   : > { %1282 = vmatmul.f32.gmra.mxu2 %v962_v21  ;;  %1395 = vmatmul.f32.gmra.mxu3 %v915_v9  ;;  %v927_v21 = vld [vmem:[#allocation7 + $0x268] sm:$0xff]  ;;  %v4681_v9 = vpop.f32.mrf.mxu1 }
 0x31e   : > { %v4661_v25 = vpop.f32.mrf.mxu3 }
 0x323   : > { %1285 = vmatmul.f32.gmra.mxu2 %v965_v15  ;;  %1398 = vmatmul.f32.gmra.mxu3 %v918_v16  ;;  %v937_v15 = vld [vmem:[#allocation7 + $0x2b8] sm:$0xff] }
 0x324   : > { %v977_v16 = vld [vmem:[#allocation7 + $0x3f8] sm:$0xff]  ;;  %1097 = vmatmul.f32.gmra.mxu1 %v937_v15  ;;  %v936_v15 = vld [vmem:[#allocation7 + $0x2b0] sm:$0xff] }
 0x326   : > { %v4667_v32 = vpop.f32.mrf.mxu3 }
 0x32b   : > { %1288 = vmatmul.f32.gmra.mxu2 %v968_v39  ;;  %1401 = vmatmul.f32.gmra.mxu3 %v921_v40  ;;  %v4685_v39 = vpop.f32.mrf.mxu2 }
 0x32c   : > { %6281 = vst [vmem:[#allocation38_spill] sm:$0xff] %v4685_v39 }
 0x32e   : > { %v4673_v48 = vpop.f32.mrf.mxu3 }
 0x333   : > { %1291 = vmatmul.f32.gmra.mxu2 %v971_v55  ;;  %1404 = vmatmul.f32.gmra.mxu3 %v924_v56  ;;  %v4689_v55 = vpop.f32.mrf.mxu1  ;;  %v980_v56 = vld [vmem:[#allocation7 + $0x410] sm:$0xff] }
 0x334   : > { %1100 = vmatmul.f32.gmra.mxu1 %v940_v49 }
 0x336   : > { %v4677_v2 = vpop.f32.mrf.mxu3 }
 0x33b   : > { %1294 = vmatmul.f32.gmra.mxu2 %v974_v8  ;;  %1407 = vmatmul.f32.gmra.mxu3 %v927_v21  ;;  %v4691_v8 = vpop.f32.mrf.mxu2  ;;  %v4701_v49 = vpop.f32.mrf.mxu1 }
 0x33c   : > { %6282 = vst [vmem:[#allocation39_spill] sm:$0xff] %v4691_v8 }
 0x33e   : > { %v4683_v11 = vpop.f32.mrf.mxu3 }
 0x343   : > { %1297 = vmatmul.f32.gmra.mxu2 %v977_v16  ;;  %1410 = vmatmul.f32.gmra.mxu3 %v930_v34  ;;  %v4695_v16 = vpop.f32.mrf.mxu2  ;;  %v4707_v51 = vpop.f32.mrf.mxu1 }
 0x344   : > { %6283 = vst [vmem:[#allocation40_spill] sm:$0xff] %v4695_v16 }
 0x346   : > { %v4687_v40 = vpop.f32.mrf.mxu3 }
 0x34b   : > { %1300 = vmatmul.f32.gmra.mxu2 %v980_v56  ;;  %1413 = vmatmul.f32.gmra.mxu3 %v933_v6  ;;  %v4703_v56 = vpop.f32.mrf.mxu2  ;;  %v989_v6 = vld [vmem:[#allocation7 + $0x458] sm:$0xff]  ;;  %v4713_v38 = vpop.f32.mrf.mxu1 }
 0x34c   : > { %6284 = vst [vmem:[#allocation41_spill] sm:$0xff] %v4703_v56 }
 0x34e   : > { %v4693_v21 = vpop.f32.mrf.mxu3 }
 0x353   : > { %1303 = vmatmul.f32.gmra.mxu2 %v983_v30  ;;  %1416 = vmatmul.f32.gmra.mxu3 %v936_v15  ;;  %v992_v15 = vld [vmem:[#allocation7 + $0x470] sm:$0xff]  ;;  %v4709_v43 = vpop.f32.mrf.mxu2  ;;  %v4719_v22 = vpop.f32.mrf.mxu1 }
 0x354   : > { %6285 = vst [vmem:[#allocation42_spill] sm:$0xff] %v4709_v43  ;;  %v963_v43 = vld [vmem:[#allocation7 + $0x388] sm:$0xff] }
 0x356   : > { %v4697_v34 = vpop.f32.mrf.mxu3 }
 0x35b   : > { %1306 = vmatmul.f32.gmra.mxu2 %v986_v27  ;;  %1419 = vmatmul.f32.gmra.mxu3 %v939_v23  ;;  %v948_v27 = vld [vmem:[#allocation7 + $0x310] sm:$0xff]  ;;  %v4715_v33 = vpop.f32.mrf.mxu2  ;;  %v4727_v56 = vpop.f32.mrf.mxu1 }
 0x35c   : > { %6286 = vst [vmem:[#allocation43_spill] sm:$0xff] %v4715_v33  ;;  %v960_v33 = vld [vmem:[#allocation7 + $0x370] sm:$0xff] }
 0x35e   : > { %v4699_v5 = vpop.f32.mrf.mxu3 }
 0x363   : > { %1309 = vmatmul.f32.gmra.mxu2 %v989_v6  ;;  %1422 = vmatmul.f32.gmra.mxu3 %v942_v0  ;;  %v951_v0 = vld [vmem:[#allocation7 + $0x328] sm:$0xff]  ;;  %v4721_v13 = vpop.f32.mrf.mxu2 }
 0x364   : > { %6287 = vst [vmem:[#allocation44_spill] sm:$0xff] %v4721_v13 }
 0x366   : > { %v4705_v30 = vpop.f32.mrf.mxu3 }
 0x36b   : > { %1312 = vmatmul.f32.gmra.mxu2 %v992_v15  ;;  %1425 = vmatmul.f32.gmra.mxu3 %v945_v57  ;;  %v954_v15 = vld [vmem:[#allocation7 + $0x340] sm:$0xff]  ;;  %v4729_v63 = vpop.f32.mrf.mxu2 }
 0x36c   : > { %6290 = vst [vmem:[#allocation47_spill] sm:$0xff] %v4729_v63  ;;  %v966_v63 = vld [vmem:[#allocation7 + $0x3a0] sm:$0xff] }
 0x36e   : > { %v4711_v23 = vpop.f32.mrf.mxu3 }
 0x373   : > { %1428 = vmatmul.f32.gmra.mxu3 %v948_v27  ;;  %v4735_v16 = vpop.f32.mrf.mxu2 }
 0x374   : > { %6292 = vst [vmem:[#allocation49_spill] sm:$0xff] %v4735_v16  ;;  %v969_v16 = vld [vmem:[#allocation7 + $0x3b8] sm:$0xff] }
 0x376   : > { %v4717_v6 = vpop.f32.mrf.mxu3 }
 0x37b   : > { %1431 = vmatmul.f32.gmra.mxu3 %v951_v0  ;;  %v4733_v0 = vpop.f32.mrf.mxu1 }
 0x37e   : > { %v4723_v4 = vpop.f32.mrf.mxu3 }
 0x37f   : > { %6288 = vst [vmem:[#allocation45_spill] sm:$0xff] %v4723_v4 }
 0x383   : > { %1434 = vmatmul.f32.gmra.mxu3 %v954_v15  ;;  %v4739_v15 = vpop.f32.mrf.mxu1 }
 0x386   : > { %v4725_v57 = vpop.f32.mrf.mxu3 }
 0x387   : > { %6289 = vst [vmem:[#allocation46_spill] sm:$0xff] %v4725_v57  ;;  %v4741_v57 = vpop.f32.mrf.mxu2 }
 0x388   : > { %6294 = vst [vmem:[#allocation51_spill] sm:$0xff] %v4741_v57  ;;  %v972_v57 = vld [vmem:[#allocation7 + $0x3d0] sm:$0xff] }
 0x38b   : > { %1437 = vmatmul.f32.gmra.mxu3 %v957_v19  ;;  %v4745_v19 = vpop.f32.mrf.mxu1 }
 0x38e   : > { %v4731_v27 = vpop.f32.mrf.mxu3 }
 0x38f   : > { %6291 = vst [vmem:[#allocation48_spill] sm:$0xff] %v4731_v27  ;;  %v4747_v27 = vpop.f32.mrf.mxu2 }
 0x390   : > { %6296 = vst [vmem:[#allocation53_spill] sm:$0xff] %v4747_v27 }
 0x393   : > { %1440 = vmatmul.f32.gmra.mxu3 %v960_v33 }
 0x396   : > { %v4737_v13 = vpop.f32.mrf.mxu3 }
 0x397   : > { %6293 = vst [vmem:[#allocation50_spill] sm:$0xff] %v4737_v13  ;;  %v4753_v13 = vpop.f32.mrf.mxu1  ;;  %v4755_v4 = vpop.f32.mrf.mxu2 }
 0x398   : > { %6299 = vst [vmem:[#allocation56_spill] sm:$0xff] %v4755_v4  ;;  %v981_v4 = vld [vmem:[#allocation7 + $0x418] sm:$0xff] }
 0x39b   : > { %1443 = vmatmul.f32.gmra.mxu3 %v963_v43 }
 0x39e   : > { %v4743_v8 = vpop.f32.mrf.mxu3 }
 0x39f   : > { %6295 = vst [vmem:[#allocation52_spill] sm:$0xff] %v4743_v8  ;;  %v975_v8 = vld [vmem:[#allocation7 + $0x3e8] sm:$0xff]  ;;  %v4761_v54 = vpop.f32.mrf.mxu2 }
 0x3a0   : > { %6301 = vst [vmem:[#allocation58_spill] sm:$0xff] %v4761_v54  ;;  %v984_v54 = vld [vmem:[#allocation7 + $0x430] sm:$0xff] }
 0x3a3   : > { %1446 = vmatmul.f32.gmra.mxu3 %v966_v63  ;;  %v4759_v63 = vpop.f32.mrf.mxu1 }
 0x3a6   : > { %v4749_v59 = vpop.f32.mrf.mxu3 }
 0x3a7   : > { %6297 = vst [vmem:[#allocation54_spill] sm:$0xff] %v4749_v59  ;;  %v978_v59 = vld [vmem:[#allocation7 + $0x400] sm:$0xff] }
 0x3ab   : > { %1449 = vmatmul.f32.gmra.mxu3 %v969_v16  ;;  %v4765_v16 = vpop.f32.mrf.mxu1 }
 0x3ae   : > { %v4751_v33 = vpop.f32.mrf.mxu3 }
 0x3af   : > { %6298 = vst [vmem:[#allocation55_spill] sm:$0xff] %v4751_v33  ;;  %v4767_v33 = vpop.f32.mrf.mxu2 }
 0x3b0   : > { %6303 = vst [vmem:[#allocation60_spill] sm:$0xff] %v4767_v33  ;;  %v987_v33 = vld [vmem:[#allocation7 + $0x448] sm:$0xff] }
 0x3b3   : > { %1452 = vmatmul.f32.gmra.mxu3 %v972_v57  ;;  %v4771_v57 = vpop.f32.mrf.mxu1 }
 0x3b4   : > { %6305 = vst [vmem:[#allocation62_spill] sm:$0xff] %v4771_v57 }
 0x3b6   : > { %v4757_v43 = vpop.f32.mrf.mxu3 }
 0x3b7   : > { %6300 = vst [vmem:[#allocation57_spill] sm:$0xff] %v4757_v43  ;;  %v4773_v43 = vpop.f32.mrf.mxu2 }
 0x3b8   : > { %6306 = vst [vmem:[#allocation63_spill] sm:$0xff] %v4773_v43 }
 0x3bb   : > { %1455 = vmatmul.f32.gmra.mxu3 %v975_v8 }
 0x3be   : > { %v4763_v27 = vpop.f32.mrf.mxu3 }
 0x3bf   : > { %6302 = vst [vmem:[#allocation59_spill] sm:$0xff] %v4763_v27  ;;  %v4779_v27 = vpop.f32.mrf.mxu1  ;;  %v4781_v46 = vpop.f32.mrf.mxu2 }
 0x3c0   : > { %6309 = vst [vmem:[#allocation66_spill] sm:$0xff] %v4779_v27 }
 0x3c1   : > { %6310 = vst [vmem:[#allocation67_spill] sm:$0xff] %v4781_v46 }
 0x3c3   : > { %1458 = vmatmul.f32.gmra.mxu3 %v978_v59 }
 0x3c6   : > { %v4769_v39 = vpop.f32.mrf.mxu3 }
 0x3c7   : > { %6304 = vst [vmem:[#allocation61_spill] sm:$0xff] %v4769_v39  ;;  %v990_v39 = vld [vmem:[#allocation7 + $0x460] sm:$0xff]  ;;  %v4787_v57 = vpop.f32.mrf.mxu2 }
 0x3c8   : > { %6313 = vst [vmem:[#allocation70_spill] sm:$0xff] %v4787_v57 }
 0x3cb   : > { %1461 = vmatmul.f32.gmra.mxu3 %v981_v4  ;;  %v4785_v4 = vpop.f32.mrf.mxu1 }
 0x3cc   : > { %6312 = vst [vmem:[#allocation69_spill] sm:$0xff] %v4785_v4 }
 0x3ce   : > { %v4775_v3 = vpop.f32.mrf.mxu3 }
 0x3cf   : > { %6307 = vst [vmem:[#allocation64_spill] sm:$0xff] %v4775_v3  ;;  %v993_v3 = vld [vmem:[#allocation7 + $0x478] sm:$0xff] }
 0x3d3   : > { %1464 = vmatmul.f32.gmra.mxu3 %v984_v54  ;;  %v4791_v54 = vpop.f32.mrf.mxu1 }
 0x3d4   : > { %6315 = vst [vmem:[#allocation72_spill] sm:$0xff] %v4791_v54 }
 0x3d6   : > { %v4777_v8 = vpop.f32.mrf.mxu3 }
 0x3d7   : > { %6308 = vst [vmem:[#allocation65_spill] sm:$0xff] %v4777_v8  ;;  %v4793_v8 = vpop.f32.mrf.mxu2 }
 0x3d8   : > { %6316 = vst [vmem:[#allocation73_spill] sm:$0xff] %v4793_v8 }
 0x3db   : > { %1467 = vmatmul.f32.gmra.mxu3 %v987_v33  ;;  %v4797_v46 = vpop.f32.mrf.mxu1 }
 0x3dc   : > { %6318 = vst [vmem:[#allocation75_spill] sm:$0xff] %v4797_v46 }
 0x3de   : > { %v4783_v59 = vpop.f32.mrf.mxu3 }
 0x3df   : > { %6311 = vst [vmem:[#allocation68_spill] sm:$0xff] %v4783_v59  ;;  %v4799_v33 = vpop.f32.mrf.mxu2 }
 0x3e0   : > { %6319 = vst [vmem:[#allocation76_spill] sm:$0xff] %v4799_v33 }
 0x3e3   : > { %1470 = vmatmul.f32.gmra.mxu3 %v990_v39  ;;  %v4805_v57 = vpop.f32.mrf.mxu1 }
 0x3e4   : > { %6322 = vst [vmem:[#allocation79_spill] sm:$0xff] %v4805_v57 }
 0x3e6   : > { %v4789_v43 = vpop.f32.mrf.mxu3 }
 0x3e7   : > { %6314 = vst [vmem:[#allocation71_spill] sm:$0xff] %v4789_v43  ;;  %v4807_v39 = vpop.f32.mrf.mxu2 }
 0x3e8   : > { %6323 = vst [vmem:[#allocation80_spill] sm:$0xff] %v4807_v39 }
 0x3eb   : > { %1473 = vmatmul.f32.gmra.mxu3 %v993_v3  ;;  %v4811_v54 = vpop.f32.mrf.mxu1 }
 0x3ee   : > { %v4795_v27 = vpop.f32.mrf.mxu3 }
 0x3ef   : > { %6317 = vst [vmem:[#allocation74_spill] sm:$0xff] %v4795_v27  ;;  %v4813_v8 = vpop.f32.mrf.mxu2 }
 0x3f0   : > { %6325 = vst [vmem:[#allocation82_spill] sm:$0xff] %v4813_v8 }
 0x3f3   : > { %v4817_v27 = vpop.f32.mrf.mxu1 }
 0x3f6   : > { %v4801_v59 = vpop.f32.mrf.mxu3 }
 0x3f7   : > { %6320 = vst [vmem:[#allocation77_spill] sm:$0xff] %v4801_v59  ;;  %v4819_v46 = vpop.f32.mrf.mxu2 }
 0x3f8   : > { %6327 = vst [vmem:[#allocation84_spill] sm:$0xff] %v4819_v46  ;;  %v1176_v46 = vadd.f32 %v4595_v14, %v4655_v18  ;;  %v1191_v14 = vadd.f32 %v4613_v52, %v4689_v55 }
 0x3fb   : > { %v4823_v59 = vpop.f32.mrf.mxu1 }
 0x3fe   : > { %v4803_v4 = vpop.f32.mrf.mxu3 }
 0x3ff   : > { %6321 = vst [vmem:[#allocation78_spill] sm:$0xff] %v4803_v4  ;;  %v4825_v4 = vpop.f32.mrf.mxu2 }
 0x400   : > { %6329 = vst [vmem:[#allocation86_spill] sm:$0xff] %v4825_v4  ;;  %v1179_v4 = vadd.f32 %v4597_v17, %v4663_v29  ;;  %v1197_v17 = vadd.f32 %v4621_v12, %v4707_v51  ;;  %v1206_v12 = vadd.f32 %v4633_v28, %v4727_v56  ;;  %v4896_v28 = vadd.f32 %v4667_v32, %v1191_v14 }
 0x401   : > { %v1221_v29 = vadd.f32 %v4659_v10, %v4759_v63 }
 0x402   : > { %6338 = vst [vmem:[#allocation95_spill] sm:$0xff] %v4896_v28 }
 0x403   : > { %v4833_v8 = vpop.f32.mrf.mxu1  ;;  %v4962_v55 = vadd.f32 %v4717_v6, %v1221_v29  ;;  %v6354_v6 = vld [vmem:[#allocation38_spill] sm:$0xff] }
 0x404   : > { %v6363_v29 = vld [vmem:[#allocation42_spill] sm:$0xff] }
 0x405   : > { %6348 = vst [vmem:[#allocation105_spill] sm:$0xff] %v4962_v55 }
 0x406   : > { %v4809_v43 = vpop.f32.mrf.mxu3 }
 0x407   : > { %6324 = vst [vmem:[#allocation81_spill] sm:$0xff] %v4809_v43  ;;  %v1173_v43 = vadd.f32 %v4593_v26, %v4649_v61  ;;  %v4849_v26 = vadd.f32 %v4643_v45, %v1176_v46  ;;  %v1188_v61 = vadd.f32 %v4609_v47, %v4681_v9  ;;  %v1203_v47 = vadd.f32 %v4629_v24, %v4719_v22 }
 0x408   : > { %v1209_v45 = vadd.f32 %v4637_v36, %v4733_v0  ;;  %v1212_v22 = vadd.f32 %v4641_v44, %v4739_v15  ;;  %v1218_v44 = vadd.f32 %v4653_v1, %v4753_v13  ;;  %v6351_v0 = vld [vmem:[#allocation66_spill] sm:$0xff]  ;;  %v6352_v15 = vld [vmem:[#allocation37_spill] sm:$0xff] }
 0x409   : > { %6333 = vst [vmem:[#allocation90_spill] sm:$0xff] %v4849_v26 }
 0x40a   : > { %v4922_v46 = vadd.f32 %v4697_v34, %v1209_v45  ;;  %v4933_v10 = vadd.f32 %v4699_v5, %v1212_v22  ;;  %v4945_v9 = vadd.f32 %v4711_v23, %v1218_v44  ;;  %v6350_v34 = vld [vmem:[#allocation36_spill] sm:$0xff] }
 0x40b   : > { %v1095_v24 = vpop.f32.mrf.mxu1  ;;  %v6361_v22 = vld [vmem:[#allocation72_spill] sm:$0xff] }
 0x40c   : > { %6344 = vst [vmem:[#allocation101_spill] sm:$0xff] %v4922_v46 }
 0x40d   : > { %6345 = vst [vmem:[#allocation102_spill] sm:$0xff] %v4933_v10 }
 0x40e   : > { %v4815_v3 = vpop.f32.mrf.mxu3  ;;  %6347 = vst [vmem:[#allocation104_spill] sm:$0xff] %v4945_v9 }
 0x40f   : > { %6326 = vst [vmem:[#allocation83_spill] sm:$0xff] %v4815_v3  ;;  %v4835_v3 = vpop.f32.mrf.mxu2 }
 0x416   : > { %v4821_v33 = vpop.f32.mrf.mxu3 }
 0x417   : > { %6328 = vst [vmem:[#allocation85_spill] sm:$0xff] %v4821_v33  ;;  %v4840_v33 = vadd.f32 %v4639_v37, %v1173_v43  ;;  %v1194_v37 = vadd.f32 %v4617_v60, %v4701_v49  ;;  %v6353_v43 = vld [vmem:[#allocation69_spill] sm:$0xff] }
 0x418   : > { %v1233_v63 = vadd.f32 %v6354_v6, %v6353_v43  ;;  %v6367_v43 = vld [vmem:[#allocation40_spill] sm:$0xff] }
 0x419   : > { %6332 = vst [vmem:[#allocation89_spill] sm:$0xff] %v4840_v33  ;;  %v4870_v52 = vmul.f32 %v4840_v33, %v4840_v33  ;;  %v4899_v36 = vadd.f32 %v4673_v48, %v1194_v37  ;;  %v1477_v23 = vmul.f32 %v4922_v46, %v4840_v33  ;;  %v6357_v37 = vld [vmem:[#allocation45_spill] sm:$0xff]  ;;  %v6400_v46 = vld [vmem:[#allocation51_spill] sm:$0xff] }
 0x41b   : > { %6339 = vst [vmem:[#allocation96_spill] sm:$0xff] %v4899_v36  ;;  %v4955_v5 = vmul.f32 %v4899_v36, %v4899_v36 }
 0x41e   : > { %v4827_v57 = vpop.f32.mrf.mxu3 }
 0x41f   : > { %6330 = vst [vmem:[#allocation87_spill] sm:$0xff] %v4827_v57  ;;  %v1182_v57 = vadd.f32 %v4601_v35, %v4669_v41  ;;  %v4862_v35 = vadd.f32 %v4647_v53, %v1179_v4  ;;  %v4889_v53 = vpop.f32.mrf.mxu2  ;;  %v4919_v41 = vadd.f32 %v4693_v21, %v1206_v12  ;;  %v6349_v21 = vld [vmem:[#allocation62_spill] sm:$0xff] }
 0x420   : > { %v1227_v49 = vadd.f32 %v6350_v34, %v6349_v21  ;;  %v6360_v12 = vld [vmem:[#allocation58_spill] sm:$0xff]  ;;  %v1245_v21 = vadd.f32 %v6363_v29, %v4811_v54 }
 0x421   : > { %6334 = vst [vmem:[#allocation91_spill] sm:$0xff] %v4862_v35  ;;  %v4873_v60 = vadd.f32 %v4651_v62, %v1182_v57  ;;  %v4893_v62 = vmul.f32 %v4849_v26, %v4849_v26  ;;  %v4916_v32 = vmul.f32 %v4862_v35, %v4862_v35  ;;  %v1478_v57 = vmul.f32 %v4933_v10, %v4849_v26  ;;  %v6372_v54 = vld [vmem:[#allocation70_spill] sm:$0xff]  ;;  %v6382_v10 = vld [vmem:[#allocation63_spill] sm:$0xff] }
 0x422   : > { %6343 = vst [vmem:[#allocation100_spill] sm:$0xff] %v4919_v41 }
 0x423   : > { %6335 = vst [vmem:[#allocation92_spill] sm:$0xff] %v4873_v60  ;;  %v4926_v13 = vmul.f32 %v4873_v60, %v4873_v60 }
 0x426   : > { %v4829_v39 = vpop.f32.mrf.mxu3 }
 0x427   : > { %6331 = vst [vmem:[#allocation88_spill] sm:$0xff] %v4829_v39  ;;  %v1185_v39 = vadd.f32 %v4605_v42, %v4675_v58  ;;  %v1200_v42 = vadd.f32 %v4625_v20, %v4713_v38  ;;  %v4883_v38 = vadd.f32 %v4661_v25, %v1188_v61  ;;  %v1215_v20 = vadd.f32 %v4645_v50, %v4745_v19  ;;  %v6356_v61 = vld [vmem:[#allocation56_spill] sm:$0xff] }
 0x428   : > { %v4910_v25 = vadd.f32 %v4687_v40, %v1203_v47  ;;  %v1224_v58 = vadd.f32 %v4665_v31, %v4765_v16  ;;  %v4951_v40 = vmul.f32 %v4896_v28, %v4896_v28  ;;  %v1230_v19 = vadd.f32 %v6352_v15, %v6351_v0  ;;  %v6359_v47 = vld [vmem:[#allocation20_spill] sm:$0xff]  ;;  %v6364_v0 = vld [vmem:[#allocation46_spill] sm:$0xff] }
 0x429   : > { %v4876_v51 = vadd.f32 %v4657_v7, %v1185_v39  ;;  %6337 = vst [vmem:[#allocation94_spill] sm:$0xff] %v4883_v38  ;;  %v4902_v7 = vadd.f32 %v4677_v2, %v1197_v17  ;;  %v4907_v50 = vadd.f32 %v4683_v11, %v1200_v42  ;;  %v4936_v48 = vadd.f32 %v4705_v30, %v1215_v20  ;;  %v6355_v39 = vld [vmem:[#allocation19_spill] sm:$0xff] }
 0x42a   : > { %6342 = vst [vmem:[#allocation99_spill] sm:$0xff] %v4910_v25  ;;  %v4942_v2 = vmul.f32 %v4883_v38, %v4883_v38  ;;  %v4972_v30 = vmul.f32 %v4910_v25, %v4910_v25  ;;  %v4982_v16 = vmul.f32 %v4919_v41, %v4919_v41  ;;  %v4990_v14 = vadd.f32 %v6356_v61, %v6355_v39  ;;  %v6362_v20 = vld [vmem:[#allocation39_spill] sm:$0xff] }
 0x42b   : > { %6336 = vst [vmem:[#allocation93_spill] sm:$0xff] %v4876_v51  ;;  %v4930_v1 = vmul.f32 %v4876_v51, %v4876_v51  ;;  %v4959_v31 = vmul.f32 %v4902_v7, %v4902_v7  ;;  %v4968_v56 = vmul.f32 %v4907_v50, %v4907_v50  ;;  %v1479_v4 = vmul.f32 %v4936_v48, %v4862_v35  ;;  %v6368_v39 = vld [vmem:[#allocation43_spill] sm:$0xff]  ;;  %v6381_v35 = vld [vmem:[#allocation22_spill] sm:$0xff] }
 0x42c   : > { %6340 = vst [vmem:[#allocation97_spill] sm:$0xff] %v4902_v7  ;;  %v4993_v17 = vadd.f32 %v6357_v37, %v1224_v58  ;;  %v4997_v42 = vmul.f32 %v4945_v9, %v4873_v60  ;;  %v1269_v45 = vadd.f32 %v6360_v12, %v6359_v47  ;;  %v1236_v44 = vadd.f32 %v6362_v20, %v6361_v22  ;;  %v6366_v58 = vld [vmem:[#allocation75_spill] sm:$0xff]  ;;  %v1098_v37 = vpop.f32.mrf.mxu1  ;;  %v5014_v47 = vpop.f32.mrf.mxu2  ;;  %v6369_v12 = vld [vmem:[#allocation48_spill] sm:$0xff]  ;;  %v6373_v9 = vld [vmem:[#allocation50_spill] sm:$0xff] }
 0x42d   : > { %6341 = vst [vmem:[#allocation98_spill] sm:$0xff] %v4907_v50  ;;  %v1481_v34 = vmul.f32 %v4962_v55, %v4876_v51  ;;  %v5008_v15 = vadd.f32 %v6364_v0, %v1227_v49  ;;  %v1239_v6 = vadd.f32 %v6367_v43, %v6366_v58  ;;  %v1248_v61 = vadd.f32 %v6368_v39, %v4817_v27  ;;  %v6371_v20 = vld [vmem:[#allocation24_spill] sm:$0xff]  ;;  %v6375_v49 = vld [vmem:[#allocation49_spill] sm:$0xff]  ;;  %v6378_v43 = vld [vmem:[#allocation79_spill] sm:$0xff] }
 0x42e   : > { %v4859_v18 = vpop.f32.mrf.mxu3  ;;  %6346 = vst [vmem:[#allocation103_spill] sm:$0xff] %v4936_v48  ;;  %v5017_v22 = vadd.f32 %v6369_v12, %v1230_v19  ;;  %v1281_v29 = vadd.f32 %v6372_v54, %v6371_v20  ;;  %v5022_v55 = vadd.f32 %v6373_v9, %v1233_v63  ;;  %v1257_v0 = vadd.f32 %v6375_v49, %v1095_v24  ;;  %v6376_v51 = vld [vmem:[#allocation21_spill] sm:$0xff]  ;;  %v6377_v60 = vld [vmem:[#allocation60_spill] sm:$0xff] }
 0x42f   : > { %6358 = vst [vmem:[#allocation62_spill] sm:$0xff] %v4993_v17  ;;  %v1272_v58 = vadd.f32 %v6377_v60, %v6376_v51  ;;  %v1482_v27 = vmul.f32 %v4993_v17, %v4883_v38  ;;  %v6379_v39 = vld [vmem:[#allocation41_spill] sm:$0xff]  ;;  %v6380_v19 = vld [vmem:[#allocation44_spill] sm:$0xff]  ;;  %v1275_v20 = vadd.f32 %v6382_v10, %v6381_v35  ;;  %v5044_v51 = vmul.f32 %v5008_v15, %v4896_v28  ;;  %v6391_v35 = vld [vmem:[#allocation59_spill] sm:$0xff] }
 0x430   : > { %6365 = vst [vmem:[#allocation36_spill] sm:$0xff] %v5008_v15  ;;  %v1242_v48 = vadd.f32 %v6379_v39, %v6378_v43  ;;  %v1251_v12 = vadd.f32 %v6380_v19, %v4823_v59  ;;  %v6383_v54 = vld [vmem:[#allocation52_spill] sm:$0xff]  ;;  %v6385_v63 = vld [vmem:[#allocation57_spill] sm:$0xff]  ;;  %v6387_v43 = vld [vmem:[#allocation23_spill] sm:$0xff]  ;;  %v1409_v10 = vadd.f32 %v6391_v35, %v1248_v61 }
 0x431   : > { %6370 = vst [vmem:[#allocation66_spill] sm:$0xff] %v5017_v22  ;;  %v5036_v9 = vadd.f32 %v6383_v54, %v1236_v44  ;;  %v1406_v24 = vadd.f32 %v6385_v63, %v1245_v21  ;;  %v6386_v49 = vld [vmem:[#allocation85_spill] sm:$0xff]  ;;  %v6388_v39 = vld [vmem:[#allocation67_spill] sm:$0xff]  ;;  %v6389_v59 = vld [vmem:[#allocation54_spill] sm:$0xff]  ;;  %v5054_v44 = vmul.f32 %v5017_v22, %v4899_v36  ;;  %v1485_v21 = vmul.f32 %v5022_v55, %v4902_v7 }
 0x432   : > { %6374 = vst [vmem:[#allocation37_spill] sm:$0xff] %v5022_v55  ;;  %v1442_v26 = vadd.f32 %v6386_v49, %v1281_v29  ;;  %v1278_v17 = vadd.f32 %v6388_v39, %v6387_v43  ;;  %v5049_v19 = vadd.f32 %v6389_v59, %v1239_v6  ;;  %v6392_v29 = vld [vmem:[#allocation65_spill] sm:$0xff]  ;;  %v6396_v43 = vld [vmem:[#allocation55_spill] sm:$0xff]  ;;  %v6399_v61 = vld [vmem:[#allocation78_spill] sm:$0xff]  ;;  %v1260_v55 = vadd.f32 %v6400_v46, %v1098_v37 }
 0x433   : > { %6384 = vst [vmem:[#allocation69_spill] sm:$0xff] %v5036_v9  ;;  %v1418_v54 = vadd.f32 %v6392_v29, %v1257_v0  ;;  %v6393_v63 = vld [vmem:[#allocation77_spill] sm:$0xff]  ;;  %v5063_v39 = vadd.f32 %v6396_v43, %v1242_v48  ;;  %v1433_v35 = vadd.f32 %v6399_v61, %v1272_v58  ;;  %v1486_v22 = vmul.f32 %v5036_v9, %v4907_v50  ;;  %v6401_v29 = vld [vmem:[#allocation26_spill] sm:$0xff]  ;;  %v6404_v58 = vld [vmem:[#allocation27_spill] sm:$0xff] }
 0x434   : > { %6390 = vst [vmem:[#allocation38_spill] sm:$0xff] %v5049_v19  ;;  %v1430_v49 = vadd.f32 %v6393_v63, %v1269_v45  ;;  %v6394_v15 = vld [vmem:[#allocation25_spill] sm:$0xff]  ;;  %v1489_v36 = vsub.f32 %v1406_v24, %v1477_v23  ;;  %v1513_v0 = vsub.f32 %v1442_v26, %v4870_v52  ;;  %v6402_v45 = vld [vmem:[#allocation76_spill] sm:$0xff]  ;;  %v1490_v48 = vsub.f32 %v1409_v10, %v1478_v57  ;;  %v6407_v46 = vld [vmem:[#allocation82_spill] sm:$0xff] }
 0x435   : > { %v6395_v28 = vld [vmem:[#allocation73_spill] sm:$0xff]  ;;  %6397 = vst [vmem:[#allocation19_spill] sm:$0xff] %v5063_v39  ;;  %v5073_v63 = vadd.f32 %v6402_v45, %v6401_v29  ;;  %v6405_v43 = vld [vmem:[#allocation80_spill] sm:$0xff]  ;;  %v1493_v23 = vsub.f32 %v1418_v54, %v1481_v34  ;;  %v1488_v26 = vmul.f32 %v5063_v39, %v4919_v41  ;;  %v1101_v29 = vpop.f32.mrf.mxu1  ;;  %v1310_v45 = vpop.f32.mrf.mxu2  ;;  %v1498_v57 = vsub.f32 %v1433_v35, %v1486_v22 }
 0x436   : > { %v4947_v11 = vpop.f32.mrf.mxu3  ;;  %v1284_v38 = vadd.f32 %v6395_v28, %v6394_v15  ;;  %v6398_v6 = vld [vmem:[#allocation61_spill] sm:$0xff]  ;;  %v1487_v28 = vmul.f32 %v5049_v19, %v4910_v25  ;;  %v6403_v15 = vld [vmem:[#allocation47_spill] sm:$0xff]  ;;  %v1497_v24 = vsub.f32 %v1430_v49, %v1485_v21  ;;  %v6406_v52 = vld [vmem:[#allocation28_spill] sm:$0xff]  ;;  %v1528_v10 = vrot.slane %v1489_v36, 4 }
 0x437   : > { %v1412_v59 = vadd.f32 %v6398_v6, %v1251_v12  ;;  %v1254_v12 = vadd.f32 %v6403_v15, %v4833_v8  ;;  %v5081_v6 = vadd.f32 %v6405_v43, %v6404_v58  ;;  %v1293_v37 = vadd.f32 %v6407_v46, %v6406_v52  ;;  %v6408_v19 = vld [vmem:[#allocation29_spill] sm:$0xff]  ;;  %v6409_v8 = vld [vmem:[#allocation84_spill] sm:$0xff]  ;;  %v6413_v46 = vld [vmem:[#allocation30_spill] sm:$0xff] }
 0x438   : > { %v5091_v15 = vadd.f32 %v6409_v8, %v6408_v19  ;;  %v6410_v58 = vld [vmem:[#allocation68_spill] sm:$0xff]  ;;  %v1538_v34 = vrot.slane %v1513_v0, 4  ;;  %v1636_v54 = vrot.slane %v1490_v48, 4  ;;  %v4134_v41 = vmov 1983009808   ;;  %v6414_v25 = vld [vmem:[#allocation86_spill] sm:$0xff] }
 0x439   : > { %v5087_v61 = vsub.f32 %v1412_v59, %v1479_v4  ;;  %v1421_v43 = vadd.f32 %v6410_v58, %v1260_v55  ;;  %v6411_v49 = vld [vmem:[#allocation64_spill] sm:$0xff]  ;;  %v1531_v52 = vunpack.c.l.s4 %v4134_v41  ;;  %v6412_v4 = vld [vmem:[#allocation87_spill] sm:$0xff]  ;;  %v5100_v22 = vadd.f32 %v6414_v25, %v6413_v46  ;;  %v6415_v9 = vld [vmem:[#allocation53_spill] sm:$0xff] }
 0x43a   : > { %v1415_v39 = vadd.f32 %v6411_v49, %v1254_v12  ;;  %v1445_v59 = vadd.f32 %v6412_v4, %v1284_v38  ;;  %v1540_v35 = vrot.slane %v1493_v23, 4  ;;  %v1263_v19 = vadd.f32 %v6415_v9, %v1101_v29  ;;  %v6416_v50 = vld [vmem:[#allocation81_spill] sm:$0xff]  ;;  %v6417_v12 = vld [vmem:[#allocation83_spill] sm:$0xff] }
 0x43b   : > { %v1525_v8 = vrot.slane %v1497_v24, 4  ;;  %v1744_v55 = vrot.slane %v5087_v61, 4  ;;  %v1634_v58 = vrot.slane %v1498_v57, 4  ;;  %v1436_v7 = vadd.f32 %v6416_v50, %v1275_v20  ;;  %v6418_v25 = vld [vmem:[#allocation31_spill] sm:$0xff]  ;;  %v6419_v50 = vld [vmem:[#allocation32_spill] sm:$0xff] }
 0x43c   : > { %v5105_v33 = vsub.f32 %v1421_v43, %v1482_v27  ;;  %v1439_v41 = vadd.f32 %v6417_v12, %v1278_v17  ;;  %v1539_v38 = vsel %vm1526_vm1, %v1538_v34, %v1493_v23  ;;  %v1541_v49 = vsel %vm1526_vm1, %v1513_v0, %v1540_v35  ;;  %v6421_v34 = vld [vmem:[#allocation71_spill] sm:$0xff]  ;;  %v6423_v35 = vld [vmem:[#allocation34_spill] sm:$0xff] }
 0x43d   : > { %v5112_v4 = vadd.f32 %v4835_v3, %v6418_v25  ;;  %v5115_v9 = vsub.f32 %v1415_v39, %v4997_v42  ;;  %v5117_v29 = vunpack.c.0.s8 %v1531_v52  ;;  %v1514_v46 = vsub.f32 %v1445_v59, %v4893_v62  ;;  %v6420_v42 = vld [vmem:[#allocation33_spill] sm:$0xff]  ;;  %v6424_v25 = vld [vmem:[#allocation35_spill] sm:$0xff] }
 0x43e   : > { %v5040_v60 = vpop.f32.mrf.mxu3  ;;  %v1305_v27 = vadd.f32 %v4889_v53, %v6419_v50  ;;  %v1527_v17 = vsel %vm1526_vm1, %v1525_v8, %v1489_v36  ;;  %v1529_v20 = vsel %vm1526_vm1, %v1497_v24, %v1528_v10  ;;  %v1635_v0 = vsel %vm1526_vm1, %v1634_v58, %v1490_v48  ;;  %v1313_v24 = vpop.f32.mrf.mxu2  ;;  %v6422_v48 = vld [vmem:[#allocation74_spill] sm:$0xff] }
 0x43f   : > { %v1499_v23 = vsub.f32 %v1436_v7, %v1487_v28  ;;  %v1545_v3 = vperm.slane %v1539_v38, %v5117_v29  ;;  %v1549_v43 = vperm.slane %v1541_v49, %v5117_v29  ;;  %v5129_v39 = vadd.f32 %v5014_v47, %v6420_v42 }
 0x440   : > { %v1648_v62 = vrot.slane %v5105_v33, 4  ;;  %v1424_v52 = vadd.f32 %v6421_v34, %v1263_v19  ;;  %v5133_v53 = vsub.f32 %v1439_v41, %v1488_v26  ;;  %v1427_v7 = vadd.f32 %v6422_v48, %v4990_v14 }
 0x441   : > { %v1533_v28 = vperm.slane %v1527_v17, %v5117_v29  ;;  %v1646_v10 = vrot.slane %v1514_v46, 4  ;;  %v1454_v59 = vadd.f32 %v4947_v11, %v1293_v37  ;;  %v5142_v47 = vadd.f32 %v1310_v45, %v6423_v35  ;;  %v6425_v45 = vld [vmem:[#allocation88_spill] sm:$0xff] }
 0x442   : > { %v1537_v8 = vperm.slane %v1529_v20, %v5117_v29  ;;  %v5146_v19 = vperm.slane %v1635_v0, %v5117_v29  ;;  %v4135_v26 = vmov 1934713408   ;;  %v1637_v12 = vsel %vm1526_vm1, %v1498_v57, %v1636_v54 }
 0x443   : > { %v1575_v58 = vunpack.c.l.s4 %v4135_v26  ;;  %v1742_v41 = vrot.slane %v1499_v23, 4  ;;  %v1582_v38 = vrot.slane %v1549_v43, 4  ;;  %v1570_v14 = vrot.slane %v1545_v3, 4 }
 0x444   : > { %v5150_v49 = vsub.f32 %v1424_v52, %v5044_v51  ;;  %v5153_v11 = vadd.f32 %v1313_v24, %v6424_v25  ;;  %v1850_v37 = vrot.slane %v5133_v53, 4  ;;  %v1448_v50 = vadd.f32 %v6425_v45, %v5073_v63 }
 0x445   : > { %v5159_v17 = vsub.f32 %v1427_v7, %v5054_v44  ;;  %v1647_v57 = vsel %vm1526_vm1, %v1646_v10, %v5105_v33  ;;  %v1517_v54 = vsub.f32 %v1454_v59, %v4930_v1  ;;  %v1572_v20 = vrot.slane %v1533_v28, 4 }
 0x446   : > { %v5094_v21 = vpop.f32.mrf.mxu3  ;;  %v1584_v0 = vrot.slane %v1537_v8, 4  ;;  %v5165_v51 = vperm.slane %v1637_v12, %v5117_v29  ;;  %v5167_v42 = vunpack.c.0.s8 %v1575_v58  ;;  %v1680_v34 = vrot.slane %v5146_v19, 4 }
 0x447   : > { %v1743_v63 = vsel %vm1526_vm1, %v1742_v41, %v5087_v61  ;;  %v1573_v44 = vsel %vm1526_vm1, %v1545_v3, %v1572_v20  ;;  %v1571_v52 = vsel %vm1526_vm1, %v1570_v14, %v1533_v28  ;;  %v1583_v33 = vsel %vm1526_vm1, %v1582_v38, %v1537_v8 }
 0x448   : > { %v5176_v1 = vsel %vm1526_vm1, %v1499_v23, %v1744_v55  ;;  %v1851_v24 = vsel %vm1526_vm1, %v1850_v37, %v5115_v9  ;;  %v5181_v48 = vperm.slane %v1647_v57, %v5117_v29  ;;  %v5184_v7 = vsub.f32 %v1448_v50, %v4916_v32 }
 0x449   : > { %v1555_v61 = vperm.slane %v1517_v54, %v5117_v29  ;;  %v1457_v3 = vadd.f32 %v5040_v60, %v5091_v15  ;;  %v1585_v59 = vsel %vm1526_vm1, %v1549_v43, %v1584_v0  ;;  %v5191_v55 = vperm.slane %v1743_v63, %v5117_v29 }
 0x44a   : > { %v5194_v23 = vperm.slane %v1573_v44, %v5167_v42  ;;  %v1577_v35 = vperm.slane %v1571_v52, %v5167_v42  ;;  %v5198_v32 = vperm.slane %v1583_v33, %v5167_v42  ;;  %v5201_v8 = vperm.slane %v1851_v24, %v5117_v29 }
 0x44b   : > { %v1649_v26 = vsel %vm1526_vm1, %v1514_v46, %v1648_v62  ;;  %v1550_v60 = vrot.slane %v1517_v54, 4  ;;  %v1754_v43 = vrot.slane %v5184_v7, 4  ;;  %v1451_v58 = vadd.f32 %v4859_v18, %v5081_v6 }
 0x44c   : > { %v5210_v12 = vperm.slane %v1585_v59, %v5167_v42  ;;  %v1596_v41 = vrot.slane %v1555_v61, 4  ;;  %v1518_v38 = vsub.f32 %v1457_v3, %v4942_v2  ;;  %v5215_v46 = vperm.slane %v1649_v26, %v5117_v29 }
 0x44d   : > { %v1620_v62 = vrot.slane %v1577_v35, 4  ;;  %v1628_v37 = vrot.slane %v5198_v32, 4  ;;  %v1551_v45 = vsel %vm1526_vm1, 0.0, %v1550_v60  ;;  %v1755_v2 = vsel %vm1526_vm1, %v1754_v43, %v5150_v49 }
 0x44e   : > { %v5135_v36 = vpop.f32.mrf.mxu3  ;;  %v5229_v63 = vsub.f32 %v1451_v58, %v4926_v13  ;;  %v1663_v44 = vperm.slane %v1518_v38, %v5117_v29  ;;  %v1559_v24 = vperm.slane %v1551_v45, %v5117_v29  ;;  %v1690_v59 = vrot.slane %v5215_v46, 4 }
 0x44f   : > { %v1460_v26 = vadd.f32 %v5094_v21, %v5100_v22  ;;  %v5246_v43 = vperm.slane %v1755_v2, %v5117_v29  ;;  %v1681_v2 = vsel %vm1526_vm1, %v5181_v48, %v1680_v34 }
 0x450   : > { %v1704_v58 = vrot.slane %v1663_v44, 4  ;;  %v1862_v21 = vrot.slane %v5229_v63, 4  ;;  %v1608_v22 = vrot.slane %v1559_v24, 4 }
 0x456   : > { %v1465_v10 = vpop.f32.mrf.mxu3 }
 0x457   : > { %v1466_v28 = vadd.f32 %v1465_v10, %v1305_v27  ;;  %v1678_v27 = vrot.slane %v5181_v48, 4 }
 0x459   : > { %v1521_v15 = vsub.f32 %v1466_v28, %v4959_v31  ;;  %v1624_v31 = vrot.slane %v5194_v23, 4  ;;  %v1679_v0 = vsel %vm1526_vm1, %v1678_v27, %v5146_v19 }
 0x45b   : > { %v1560_v14 = vrot.slane %v1521_v15, 4  ;;  %v1565_v25 = vperm.slane %v1521_v15, %v5117_v29 }
 0x45d   : > { %v1561_v18 = vsel %vm1526_vm1, 0.0, %v1560_v14  ;;  %v1594_v6 = vrot.slane %v1565_v25, 4  ;;  %v1597_v50 = vsel %vm1526_vm1, %v1565_v25, %v1596_v41  ;;  %v1519_v25 = vsub.f32 %v1460_v26, %v4951_v40 }
 0x45e   : > { %v1569_v57 = vperm.slane %v1561_v18, %v5117_v29  ;;  %v1468_v54 = vpop.f32.mrf.mxu3  ;;  %v1605_v20 = vperm.slane %v1597_v50, %v5167_v42 }
 0x45f   : > { %v1469_v52 = vadd.f32 %v1468_v54, %v5129_v39  ;;  %v1595_v33 = vsel %vm1526_vm1, %v1594_v6, %v1555_v61  ;;  %v1685_v39 = vperm.slane %v1679_v0, %v5167_v42  ;;  %v1658_v61 = vrot.slane %v1518_v38, 4 }
 0x460   : > { %v1606_v10 = vrot.slane %v1569_v57, 4  ;;  %v1625_v3 = vsel %vm1526_vm1, %v1605_v20, %v1624_v31  ;;  %v1601_v28 = vperm.slane %v1595_v33, %v5167_v42  ;;  %v1622_v45 = vrot.slane %v1605_v20, 4 }
 0x461   : > { %v1522_v13 = vsub.f32 %v1469_v52, %v4968_v56  ;;  %1967 = vrot.lane.b32.xlu1 %v1625_v3, %s4136_s23  ;;  %v1659_v18 = vsel %vm1526_vm1, 0.0, %v1658_v61  ;;  %v1728_v20 = vrot.slane %v1685_v39, 4  ;;  %v1609_v0 = vsel %vm1526_vm1, %v1569_v57, %v1608_v22 }
 0x462   : > { %v1618_v60 = vrot.slane %v1601_v28, 4  ;;  %v1621_v15 = vsel %vm1526_vm1, %v1601_v28, %v1620_v62  ;;  %v1607_v27 = vsel %vm1526_vm1, %v1606_v10, %v1559_v24  ;;  %v1786_v52 = vrot.slane %v5246_v43, 4 }
 0x463   : > { %v1673_v41 = vperm.slane %v1522_v13, %v5117_v29  ;;  %1959 = vrot.lane.b32.xlu0 %v1621_v15, %s4137_s29  ;;  %v5251_v56 = vperm.slane %v1607_v27, %v5167_v42  ;;  %v1668_v38 = vrot.slane %v1522_v13, 4  ;;  %v1667_v48 = vperm.slane %v1659_v18, %v5117_v29 }
 0x464   : > { %v5255_v14 = vsel %vm1526_vm1, %v1618_v60, %v1577_v35  ;;  %v1766_v33 = vrot.slane %v1519_v25, 4  ;;  %v1617_v3 = vperm.slane %v1609_v0, %v5167_v42  ;;  %v1692_v28 = vrot.slane %v5165_v51, 4 }
 0x465   : > { %v1702_v31 = vrot.slane %v1673_v41, 4  ;;  %v1705_v62 = vsel %vm1526_vm1, %v1673_v41, %v1704_v58  ;;  %v1629_v50 = vsel %vm1526_vm1, %v5251_v56, %v1628_v37  ;;  %v1863_v37 = vsel %vm1526_vm1, %v1862_v21, %v5159_v17 }
 0x466   : > { %v1471_v6 = vpop.f32.mrf.mxu3  ;;  %v1713_v35 = vperm.slane %v1705_v62, %v5167_v42  ;;  %1971 = vrot.lane.b32.xlu2 %v1629_v50, %s4137_s29  ;;  %v1669_v19 = vsel %vm1526_vm1, 0.0, %v1668_v38  ;;  %v1787_v60 = vsel %vm1526_vm1, %v1786_v52, %v5191_v55  ;;  %v1716_v27 = vrot.slane %v1667_v48, 4 }
 0x467   : > { %v1472_v54 = vadd.f32 %v1471_v6, %v5142_v47  ;;  %v1703_v40 = vsel %vm1526_vm1, %v1702_v31, %v1663_v44  ;;  %v1623_v44 = vsel %vm1526_vm1, %v1622_v45, %v5194_v23  ;;  %v1677_v26 = vperm.slane %v1669_v19, %v5117_v29 }
 0x468   : > { %v1709_v34 = vperm.slane %v1703_v40, %v5167_v42  ;;  %v1730_v10 = vrot.slane %v1713_v35, 4  ;;  %v1869_v23 = vperm.slane %v1863_v37, %v5117_v29  ;;  %v5297_v58 = vperm.slane %v1519_v25, %v5117_v29 }
 0x469   : > { %v1523_v47 = vsub.f32 %v1472_v54, %v4972_v30  ;;  %v1689_v30 = vperm.slane %v1681_v2, %v5167_v42  ;;  %v1463_v41 = vadd.f32 %v5135_v36, %v5112_v4  ;;  %v1767_v22 = vsel %vm1526_vm1, 0.0, %v1766_v33 }
 0x46a   : > { %v1726_v24 = vrot.slane %v1709_v34, 4  ;;  %v1729_v57 = vsel %vm1526_vm1, %v1709_v34, %v1728_v20  ;;  %v1630_v62 = vrot.slane %v1617_v3, 4  ;;  %v1714_v45 = vrot.slane %v1677_v26, 4 }
 0x46b   : > { %v5285_v13 = vperm.slane %v1523_v47, %v5117_v29  ;;  %1983 = vrot.lane.b32.xlu1 %v1729_v57, %s4137_s29  ;;  %1963 = vrot.lane.b32.xlu0 %v1623_v44, %s4138_s20  ;;  %v1776_v61 = vrot.slane %v1523_v47, 4  ;;  %v1731_v31 = vsel %vm1526_vm1, %v1730_v10, %v1689_v30  ;;  %v1717_v4 = vsel %vm1526_vm1, %v1677_v26, %v1716_v27 }
 0x46c   : > { %v5294_v15 = vsel %vm1526_vm1, %v1726_v24, %v1685_v39  ;;  %v1691_v39 = vsel %vm1526_vm1, %v1690_v59, %v5165_v51  ;;  %v1732_v6 = vrot.slane %v1689_v30, 4  ;;  %v5315_v50 = vperm.slane %v1787_v60, %v5167_v42 }
 0x46d   : > { %v1810_v21 = vrot.slane %v5285_v13, 4  ;;  %v1777_v18 = vsel %vm1526_vm1, 0.0, %v1776_v61  ;;  %v1894_v51 = vrot.slane %v1869_v23, 4  ;;  %v5321_v59 = vperm.slane %v1767_v22, %v5117_v29 }
 0x46e   : > { %v1474_v38 = vpop.f32.mrf.mxu3  ;;  %1987 = vrot.lane.b32.xlu2 %v1731_v31, %s4138_s20  ;;  %v1631_v40 = vsel %vm1526_vm1, %v1630_v62, %v5210_v12  ;;  %v1733_v20 = vsel %vm1526_vm1, %v1713_v35, %v1732_v6  ;;  %v1725_v0 = vperm.slane %v1717_v4, %v5167_v42  ;;  %v1756_v37 = vrot.slane %v5150_v49, 4 }
 0x46f   : > { %v1475_v25 = vadd.f32 %v1474_v38, %v5153_v11  ;;  %v1811_v36 = vsel %vm1526_vm1, %v1810_v21, %v5297_v58  ;;  %v1520_v11 = vsub.f32 %v1463_v41, %v4955_v5  ;;  %v5332_v19 = vperm.slane %v1777_v18, %v5117_v29 }
 0x470   : > { %v5318_v2 = vperm.slane %v1811_v36, %v5167_v42  ;;  %v1715_v5 = vsel %vm1526_vm1, %v1714_v45, %v1667_v48  ;;  %v1693_v35 = vsel %vm1526_vm1, %v5215_v46, %v1692_v28  ;;  %v5342_v33 = vperm.slane %v1691_v39, %v5167_v42 }
 0x471   : > { %v1524_v54 = vsub.f32 %v1475_v25, %v4982_v16  ;;  %v1632_v16 = vrot.slane %v5210_v12, 4  ;;  %v1757_v47 = vsel %vm1526_vm1, %v5184_v7, %v1756_v37  ;;  %v1824_v44 = vrot.slane %v5321_v59, 4 }
 0x472   : > { %v1834_v52 = vrot.slane %v5318_v2, 4  ;;  %v1879_v24 = vperm.slane %v1520_v11, %v5117_v29  ;;  %v1738_v57 = vrot.slane %v1725_v0, 4  ;;  %v5354_v46 = vperm.slane %v1715_v5, %v5167_v42 }
 0x473   : > { %v1889_v34 = vperm.slane %v1524_v54, %v5117_v29  ;;  %1975 = vrot.lane.b32.xlu1 %v1631_v40, %s4138_s20  ;;  %1991 = vrot.lane.b32.xlu0 %v1733_v20, %s4136_s23  ;;  %v1633_v12 = vsel %vm1526_vm1, %v1617_v3, %v1632_v16  ;;  %v1895_v10 = vsel %vm1526_vm1, %v1894_v51, %v5201_v8  ;;  %v1896_v26 = vrot.slane %v5201_v8, 4 }
 0x474   : > { %v5346_v49 = vsel %vm1526_vm1, %v1834_v52, %v5315_v50  ;;  %v1753_v28 = vperm.slane %v5176_v1, %v5117_v29  ;;  %v1825_v7 = vsel %vm1526_vm1, %v5332_v19, %v1824_v44  ;;  %v1765_v3 = vperm.slane %v1757_v47, %v5117_v29 }
 0x475   : > { %v1918_v48 = vrot.slane %v1889_v34, 4  ;;  %v1701_v61 = vperm.slane %v1693_v35, %v5167_v42  ;;  %v1736_v60 = vrot.slane %v5342_v33, 4  ;;  %v1874_v41 = vrot.slane %v1520_v11, 4 }
 0x476   : > { %1979 = vrot.lane.b32.xlu2 %v1633_v12, %s4136_s23  ;;  %v1920_v21 = vrot.slane %v1879_v24, 4  ;;  %v1897_v1 = vsel %vm1526_vm1, %v1869_v23, %v1896_v26  ;;  %v1901_v8 = vperm.slane %v1895_v10, %v5167_v42  ;;  %v1833_v31 = vperm.slane %v1825_v7, %v5167_v42 }
 0x477   : > { %v1919_v30 = vsel %vm1526_vm1, %v1918_v48, %v1879_v24  ;;  %v1739_v22 = vsel %vm1526_vm1, %v1738_v57, %v1701_v61  ;;  %v1737_v38 = vsel %vm1526_vm1, %v5354_v46, %v1736_v60  ;;  %v1864_v39 = vrot.slane %v5159_v17, 4 }
 0x478   : > { %v1925_v27 = vperm.slane %v1919_v30, %v5167_v42  ;;  %v1800_v45 = vrot.slane %v1753_v28, 4  ;;  %v1921_v25 = vsel %vm1526_vm1, %v1889_v34, %v1920_v21  ;;  %v1884_v23 = vrot.slane %v1524_v54, 4 }
 0x479   : > { %v1740_v4 = vrot.slane %v1701_v61, 4  ;;  %v1905_v36 = vperm.slane %v1897_v1, %v5167_v42  ;;  %v1865_v6 = vsel %vm1526_vm1, %v5229_v63, %v1864_v39  ;;  %v1875_v17 = vsel %vm1526_vm1, 0.0, %v1874_v41 }
 0x47a   : > { %v1942_v62 = vrot.slane %v1925_v27, 4  ;;  %v1801_v51 = vsel %vm1526_vm1, %v1765_v3, %v1800_v45  ;;  %v1846_v40 = vrot.slane %v1833_v31, 4  ;;  %v1929_v20 = vperm.slane %v1921_v25, %v5167_v42 }
 0x47b   : > { %1999 = vrot.lane.b32.xlu1 %v1739_v22, %s4138_s20  ;;  %1995 = vrot.lane.b32.xlu0 %v1737_v38, %s4137_s29  ;;  %v1741_v11 = vsel %vm1526_vm1, %v1725_v0, %v1740_v4  ;;  %v1885_v54 = vsel %vm1526_vm1, 0.0, %v1884_v23  ;;  %v1809_v52 = vperm.slane %v1801_v51, %v5167_v42  ;;  %v1948_v37 = vrot.slane %v1905_v36, 4 }
 0x47c   : > { %v5381_v18 = vsel %vm1526_vm1, %v1942_v62, %v1901_v8  ;;  %v1798_v34 = vrot.slane %v1765_v3, 4  ;;  %v1873_v5 = vperm.slane %v1865_v6, %v5117_v29  ;;  %v1883_v63 = vperm.slane %v1875_v17, %v5117_v29 }
 0x47d   : > { %v1852_v16 = vrot.slane %v5115_v9, 4  ;;  %v1847_v35 = vsel %vm1526_vm1, %v1846_v40, %v1809_v52  ;;  %v1949_v0 = vsel %vm1526_vm1, %v1929_v20, %v1948_v37  ;;  %v1822_v47 = vrot.slane %v5332_v19, 4 }
 0x47e   : > { %2003 = vrot.lane.b32.xlu2 %v1741_v11, %s4136_s23  ;;  %v1893_v44 = vperm.slane %v1885_v54, %v5117_v29  ;;  %v1848_v48 = vrot.slane %v1809_v52, 4  ;;  %v1906_v12 = vrot.slane %v1873_v5, 4  ;;  %v1932_v57 = vrot.slane %v1883_v63, 4 }
 0x47f   : > { %v1853_v24 = vsel %vm1526_vm1, %v5133_v53, %v1852_v16  ;;  %v1799_v9 = vsel %vm1526_vm1, %v1798_v34, %v1753_v28  ;;  %v1946_v26 = vrot.slane %v1929_v20, 4  ;;  %v1823_v30 = vsel %vm1526_vm1, %v1822_v47, %v5321_v59  ;;  %v2355_v16 = vld [vmem:[%s6202_s6 + $0x8] sm:$0xff] }
 0x480   : > { %v1849_v10 = vsel %vm1526_vm1, %v1833_v31, %v1848_v48  ;;  %v1861_v7 = vperm.slane %v1853_v24, %v5117_v29  ;;  %v1930_v19 = vrot.slane %v1893_v44, 4  ;;  %v1933_v3 = vsel %vm1526_vm1, %v1893_v44, %v1932_v57  ;;  %v2413_v48 = vld [vmem:[%s6203_s7 + $0x18] sm:$0xff] }
 0x481   : > { %v1944_v61 = vrot.slane %v1901_v8, 4  ;;  %v5411_v53 = vperm.slane %v1799_v9, %v5167_v42  ;;  %v1947_v28 = vsel %vm1526_vm1, %v1946_v26, %v1905_v36  ;;  %v5417_v21 = vperm.slane %v1823_v30, %v5167_v42 }
 0x482   : > { %v1907_v60 = vsel %vm1526_vm1, %v1906_v12, %v1861_v7  ;;  %v1941_v1 = vperm.slane %v1933_v3, %v5167_v42  ;;  %v1908_v22 = vrot.slane %v1861_v7, 4  ;;  %v1931_v59 = vsel %vm1526_vm1, %v1930_v19, %v1883_v63  ;;  %v2748_v12 = vld [vmem:[%s6205_s9 + $0x10] sm:$0xff]  ;;  %v5486_v19 = vld [vmem:[%s6201_s5] sm:$0xff] }
 0x483   : > { %2023 = vrot.lane.b32.xlu1 %v1847_v35, %s4138_s20  ;;  %2039 = vrot.lane.b32.xlu0 %v1949_v0, %s4136_s23  ;;  %v1945_v41 = vsel %vm1526_vm1, %v1925_v27, %v1944_v61  ;;  %v1844_v8 = vrot.slane %v5411_v53, 4  ;;  %v5425_v38 = vperm.slane %v1907_v60, %v5167_v42  ;;  %v1812_v31 = vrot.slane %v5297_v58, 4  ;;  %v2354_v35 = vld [vmem:[%s6202_s6] sm:$0xff]  ;;  %v2411_v0 = vld [vmem:[%s6203_s7 + $0x8] sm:$0xff] }
 0x484   : > { %v1909_v27 = vsel %vm1526_vm1, %v1873_v5, %v1908_v22  ;;  %v1954_v39 = vrot.slane %v1941_v1, 4  ;;  %v5432_v45 = vperm.slane %v1931_v59, %v5167_v42  ;;  %v1788_v51 = vrot.slane %v5191_v55, 4  ;;  %v2412_v61 = vld [vmem:[%s6203_s7 + $0x10] sm:$0xff]  ;;  %v2749_v60 = vld [vmem:[%s6205_s9 + $0x18] sm:$0xff] }
 0x485   : > { %v1845_v62 = vsel %vm1526_vm1, %v5417_v21, %v1844_v8  ;;  %v1813_v25 = vsel %vm1526_vm1, %v5285_v13, %v1812_v31  ;;  %v1917_v23 = vperm.slane %v1909_v27, %v5167_v42  ;;  %v1952_v4 = vrot.slane %v5425_v38, 4  ;;  %v5513_v31 = vld [vmem:[%s6201_s5 + $0x8] sm:$0xff] }
 0x486   : > { %2027 = vrot.lane.b32.xlu2 %v1849_v10, %s4136_s23  ;;  %v1821_v6 = vperm.slane %v1813_v25, %v5167_v42  ;;  %v1789_v17 = vsel %vm1526_vm1, %v5246_v43, %v1788_v51  ;;  %v1836_v54 = vrot.slane %v5315_v50, 4  ;;  %v4139_v5 = vmov 0   ;;  %v2356_v50 = vld [vmem:[%s6202_s6 + $0x10] sm:$0xff]  ;;  %v2747_v25 = vld [vmem:[%s6205_s9 + $0x8] sm:$0xff] }
 0x487   : > { %v1955_v58 = vsel %vm1526_vm1, %v1954_v39, %v1917_v23  ;;  %v1953_v36 = vsel %vm1526_vm1, %v5432_v45, %v1952_v4  ;;  %v1956_v13 = vrot.slane %v1917_v23, 4  ;;  %v1797_v20 = vperm.slane %v1789_v17, %v5167_v42  ;;  %3961 = vset.pattern.permute.xlu1 %v4139_v5  ;;  %3960 = vset.pattern.permute.xlu0 %v4139_v5  ;;  %v2410_v39 = vld [vmem:[%s6203_s7] sm:$0xff] }
 0x488   : > { %v1838_v40 = vrot.slane %v1821_v6, 4  ;;  %v1837_v37 = vsel %vm1526_vm1, %v5318_v2, %v1836_v54  ;;  %3962 = vset.pattern.permute.xlu2 %v4139_v5  ;;  %v2357_v2 = vld [vmem:[%s6202_s6 + $0x18] sm:$0xff]  ;;  %v1626_v3 = vrot.slane %v5251_v56, 4  ;;  %v2804_v56 = vld [vmem:[%s6206_s10 + $0x10] sm:$0xff]  ;;  %v2802_v23 = vld [vmem:[%s6206_s10] sm:$0xff] }
 0x489   : > { %v1957_v11 = vsel %vm1526_vm1, %v1941_v1, %v1956_v13  ;;  %v1840_v55 = vrot.slane %v1797_v20, 4  ;;  %v1842_v13 = vrot.slane %v5417_v21, 4 }
 0x48a   : > { %v1839_v52 = vsel %vm1526_vm1, %v1838_v40, %v1797_v20 }
 0x48b   : > { %2035 = vrot.lane.b32.xlu1 %v1947_v28, %s4138_s20  ;;  %2031 = vrot.lane.b32.xlu0 %v1945_v41, %s4137_s29  ;;  %v1841_v43 = vsel %vm1526_vm1, %v1821_v6, %v1840_v55  ;;  %v1627_v28 = vsel %vm1526_vm1, %v1626_v3, %v5198_v32  ;;  %v5540_v6 = vld [vmem:[%s6201_s5 + $0x10] sm:$0xff]  ;;  %v1843_v21 = vsel %vm1526_vm1, %v1842_v13, %v5411_v53  ;;  %v2805_v53 = vld [vmem:[%s6206_s10 + $0x18] sm:$0xff] }
 0x48e   : > { %2019 = vrot.lane.b32.xlu2 %v1845_v62, %s4137_s29  ;;  %v1734_v62 = vrot.slane %v5354_v46, 4 }
 0x490   : > { %v1735_v4 = vsel %vm1526_vm1, %v1734_v62, %v5342_v33 }
 0x493   : > { %2047 = vrot.lane.b32.xlu1 %v1955_v58, %s4138_s20  ;;  %2043 = vrot.lane.b32.xlu0 %v1953_v36, %s4137_s29 }
 0x496   : > { %2051 = vrot.lane.b32.xlu2 %v1957_v11, %s4136_s23  ;;  %v2803_v11 = vld [vmem:[%s6206_s10 + $0x8] sm:$0xff] }
 0x49b   : > { %2011 = vrot.lane.b32.xlu1 %v1839_v52, %s4138_s20  ;;  %2007 = vrot.lane.b32.xlu0 %v1837_v37, %s4137_s29  ;;  %v2083_v37 = vld [vmem:[%s6201_s5 + $0x18] sm:$0xff] }
 0x49e   : > { %2015 = vrot.lane.b32.xlu2 %v1841_v43, %s4136_s23 }
 0x4a3   : > { %2370 = vperm.xlu1 %3961, %v2356_v50   ;;  %2375 = vperm.xlu0 %3960, %v2357_v2  }
 0x4a6   : > { %2431 = vperm.xlu2 %3962, %v2413_v48  }
 0x4ab   : > { %2365 = vperm.xlu1 %3961, %v2355_v16   ;;  %2360 = vperm.xlu0 %3960, %v2354_v35  }
 0x4ae   : > { %2426 = vperm.xlu2 %3962, %v2412_v61  }
 0x4b3   : > { %2421 = vperm.xlu1 %3961, %v2411_v0   ;;  %2767 = vperm.xlu0 %3960, %v2749_v60  }
 0x4b6   : > { %2416 = vperm.xlu2 %3962, %v2410_v39  }
 0x4bb   : > { %2762 = vperm.xlu1 %3961, %v2748_v12   ;;  %2757 = vperm.xlu0 %3960, %v2747_v25  }
 0x4be   : > { %2823 = vperm.xlu2 %3962, %v2805_v53  }
 0x4c0   : > { %v1972_v34 = vpop.permute.xlu2 %1971 }
 0x4c3   : > { %2818 = vperm.xlu1 %3961, %v2804_v56   ;;  %2813 = vperm.xlu0 %3960, %v2803_v11  }
 0x4c8   : > { %v1988_v63 = vpop.permute.xlu2 %1987 }
 0x4cb   : > { %2808 = vperm.xlu1 %3961, %v2802_v23  }
 0x4d0   : > { %v1980_v47 = vpop.permute.xlu2 %1979 }
 0x4d3   : > { %v1968_v44 = vpop.permute.xlu1 %1967 }
 0x4d5   : > { %v1960_v24 = vpop.permute.xlu0 %1959 }
 0x4d6   : > { %v2054_v57 = vsel %vm544_vm0, %v5255_v14, %v1960_v24 }
 0x4d8   : > { %v2004_v26 = vpop.permute.xlu2 %2003 }
 0x4dd   : > { %v1984_v9 = vpop.permute.xlu1 %1983  ;;  %v1964_v10 = vpop.permute.xlu0 %1963 }
 0x4de   : > { %v2056_v7 = vsel %vm2055_vm2, %v2054_v57, %v1964_v10  ;;  %v2062_v14 = vsel %vm544_vm0, %v5294_v15, %v1984_v9  ;;  %v2059_v15 = vsel %vm544_vm0, %v1627_v28, %v1972_v34 }
 0x4df   : > { %v2058_v30 = vsel %vm2057_vm3, %v2056_v7, %v1968_v44  ;;  %v2063_v1 = vsel %vm2055_vm2, %v2062_v14, %v1988_v63  ;;  %v1950_v63 = vrot.slane %v5432_v45, 4 }
 0x4e0   : > { %3740 = vmatpush.msk.msrb.mxu0 %vm2097_vm4, %v2058_v30  ;;  %v2028_v27 = vpop.permute.xlu2 %2027 }
 0x4e1   : > { %3741 = vmatmul.msk.f32.vlgmr.msrb.gmra.mxu0 %vm2084_vm5, %v5486_v19  ;;  %v1951_v0 = vsel %vm1526_vm1, %v1950_v63, %v5425_v38 }
 0x4e5   : > { %v1976_v41 = vpop.permute.xlu1 %1975  ;;  %v1992_v22 = vpop.permute.xlu0 %1991 }
 0x4e6   : > { %v2060_v59 = vsel %vm2055_vm2, %v2059_v15, %v1976_v41  ;;  %v2064_v8 = vsel %vm2057_vm3, %v2063_v1, %v1992_v22 }
 0x4e7   : > { %3750 = vmatpush.msk.msra.mxu2 %vm2097_vm4, %v2064_v8  ;;  %v2061_v32 = vsel %vm2057_vm3, %v2060_v59, %v1980_v47 }
 0x4e8   : > { %3745 = vmatpush.msk.msrb.mxu1 %vm2097_vm4, %v2061_v32  ;;  %3751 = vmatmul.msk.f32.vlgmr.msra.gmra.mxu2 %vm2084_vm5, %v5486_v19  ;;  %v2020_v33 = vpop.permute.xlu2 %2019 }
 0x4e9   : > { %3742 = vmatmul.msk.f32.gmra.mxu0 %vm2084_vm5, %v5513_v31  ;;  %3746 = vmatmul.msk.f32.vlgmr.msrb.gmra.mxu1 %vm2084_vm5, %v5486_v19  ;;  %v2071_v40 = vsel %vm544_vm0, %v1843_v21, %v2020_v33 }
 0x4ed   : > { %v2000_v46 = vpop.permute.xlu1 %1999  ;;  %v1996_v58 = vpop.permute.xlu0 %1995 }
 0x4ee   : > { %v2065_v36 = vsel %vm544_vm0, %v1735_v4, %v1996_v58 }
 0x4ef   : > { %v2066_v51 = vsel %vm2055_vm2, %v2065_v36, %v2000_v46 }
 0x4f0   : > { %3752 = vmatmul.msk.f32.gmra.mxu2 %vm2084_vm5, %v5513_v31  ;;  %v2067_v17 = vsel %vm2057_vm3, %v2066_v51, %v2004_v26  ;;  %v2052_v16 = vpop.permute.xlu2 %2051 }
 0x4f1   : > { %3743 = vmatmul.msk.f32.gmra.mxu0 %vm2084_vm5, %v5540_v6  ;;  %3747 = vmatmul.msk.f32.gmra.mxu1 %vm2084_vm5, %v5513_v31 }
 0x4f2   : > { %3755 = vmatpush.msk.msra.mxu0 %vm2097_vm4, %v2067_v17 }
 0x4f5   : > { %v2024_v20 = vpop.permute.xlu1 %2023  ;;  %v2040_v54 = vpop.permute.xlu0 %2039 }
 0x4f6   : > { %v2072_v52 = vsel %vm2055_vm2, %v2071_v40, %v2024_v20 }
 0x4f7   : > { %v2073_v55 = vsel %vm2057_vm3, %v2072_v52, %v2028_v27 }
 0x4f8   : > { %3753 = vmatmul.msk.f32.gmra.mxu2 %vm2084_vm5, %v5540_v6  ;;  %3765 = vmatpush.msk.msra.mxu1 %vm2097_vm4, %v2073_v55  ;;  %v2016_v57 = vpop.permute.xlu2 %2015 }
 0x4f9   : > { %3744 = vmatmul.msk.f32.gmra.mxu0 %vm2084_vm5, %v2083_v37  ;;  %3748 = vmatmul.msk.f32.gmra.mxu1 %vm2084_vm5, %v5540_v6 }
 0x4fd   : > { %v2036_v43 = vpop.permute.xlu1 %2035  ;;  %v2032_v34 = vpop.permute.xlu0 %2031 }
 0x4fe   : > { %v2074_v5 = vsel %vm544_vm0, %v5381_v18, %v2032_v34  ;;  %v2746_v18 = vld [vmem:[%s6205_s9] sm:$0xff] }
 0x4ff   : > { %v2075_v50 = vsel %vm2055_vm2, %v2074_v5, %v2036_v43  ;;  %2752 = vperm.xlu2 %3962, %v2746_v18  }
 0x500   : > { %3754 = vmatmul.msk.f32.gmra.mxu2 %vm2084_vm5, %v2083_v37  ;;  %v2076_v2 = vsel %vm2057_vm3, %v2075_v50, %v2040_v54  ;;  %v5631_v7 = vpop.permute.xlu2 %2431  ;;  %v5661_v54 = vld [vmem:[%s6204_s8] sm:$0xff] }
 0x501   : > { %3749 = vmatmul.msk.f32.gmra.mxu1 %vm2084_vm5, %v2083_v37  ;;  %3756 = vmatmul.msk.f32.vlgmr.msra.gmra.mxu0 %vm2084_vm5, %v5486_v19 }
 0x502   : > { %3770 = vmatpush.msk.msrb.mxu2 %vm2097_vm4, %v2076_v2 }
 0x505   : > { %v2048_v35 = vpop.permute.xlu1 %2047  ;;  %v2044_v47 = vpop.permute.xlu0 %2043 }
 0x506   : > { %v2077_v45 = vsel %vm544_vm0, %v1951_v0, %v2044_v47 }
 0x507   : > { %v2078_v44 = vsel %vm2055_vm2, %v2077_v45, %v2048_v35 }
 0x508   : > { %3771 = vmatmul.msk.f32.vlgmr.msrb.gmra.mxu2 %vm2084_vm5, %v5486_v19  ;;  %v2079_v24 = vsel %vm2057_vm3, %v2078_v44, %v2052_v16  ;;  %v5637_v28 = vpop.permute.xlu2 %2426 }
 0x509   : > { %3757 = vmatmul.msk.f32.gmra.mxu0 %vm2084_vm5, %v5513_v31  ;;  %3775 = vmatpush.msk.msra.mxu3 %vm2097_vm4, %v2079_v24  ;;  %v5677_v24 = vld [vmem:[%s6204_s8 + $0x8] sm:$0xff] }
 0x50a   : > { %3766 = vmatmul.msk.f32.vlgmr.msra.gmra.mxu1 %vm2084_vm5, %v5486_v19  ;;  %3776 = vmatmul.msk.f32.vlgmr.msra.gmra.mxu3 %vm2084_vm5, %v5486_v19 }
 0x50d   : > { %v2012_v38 = vpop.permute.xlu1 %2011  ;;  %v2008_v48 = vpop.permute.xlu0 %2007 }
 0x50e   : > { %v2068_v12 = vsel %vm544_vm0, %v5346_v49, %v2008_v48 }
 0x50f   : > { %v2069_v9 = vsel %vm2055_vm2, %v2068_v12, %v2012_v38 }
 0x510   : > { %3772 = vmatmul.msk.f32.gmra.mxu2 %vm2084_vm5, %v5513_v31  ;;  %v2070_v10 = vsel %vm2057_vm3, %v2069_v9, %v2016_v57  ;;  %v5649_v25 = vpop.permute.xlu2 %2416 }
 0x511   : > { %3758 = vmatmul.msk.f32.gmra.mxu0 %vm2084_vm5, %v5540_v6 }
 0x512   : > { %3760 = vmatpush.msk.msrb.mxu0 %vm2097_vm4, %v2070_v10  ;;  %3767 = vmatmul.msk.f32.gmra.mxu1 %vm2084_vm5, %v5513_v31 }
 0x513   : > { %3777 = vmatmul.msk.f32.gmra.mxu3 %vm2084_vm5, %v5513_v31 }
 0x515   : > { %v5629_v26 = vpop.permute.xlu1 %2370  ;;  %v5633_v14 = vpop.permute.xlu0 %2375 }
 0x518   : > { %3773 = vmatmul.msk.f32.gmra.mxu2 %vm2084_vm5, %v5540_v6 }
 0x519   : > { %3759 = vmatmul.msk.f32.gmra.mxu0 %vm2084_vm5, %v2083_v37 }
 0x51a   : > { %3768 = vmatmul.msk.f32.gmra.mxu1 %vm2084_vm5, %v5540_v6 }
 0x51b   : > { %3778 = vmatmul.msk.f32.gmra.mxu3 %vm2084_vm5, %v5540_v6 }
 0x51d   : > { %v5635_v56 = vpop.permute.xlu1 %2365  ;;  %v5640_v1 = vpop.permute.xlu0 %2360 }
 0x520   : > { %3774 = vmatmul.msk.f32.gmra.mxu2 %vm2084_vm5, %v2083_v37 }
 0x521   : > { %3761 = vmatmul.msk.f32.vlgmr.msrb.gmra.mxu0 %vm2084_vm5, %v5486_v19 }
 0x522   : > { %3769 = vmatmul.msk.f32.gmra.mxu1 %vm2084_vm5, %v2083_v37 }
 0x523   : > { %3779 = vmatmul.msk.f32.gmra.mxu3 %vm2084_vm5, %v2083_v37 }
 0x525   : > { %v5647_v39 = vpop.permute.xlu1 %2421 }
 0x529   : > { %3762 = vmatmul.msk.f32.gmra.mxu0 %vm2084_vm5, %v5513_v31 }
 0x531   : > { %3763 = vmatmul.msk.f32.gmra.mxu0 %vm2084_vm5, %v5540_v6 }
 0x539   : > { %3764 = vmatmul.msk.f32.gmra.mxu0 %vm2084_vm5, %v2083_v37 }
 0x55e   : > { %v2139_v49 = vpop.f32.mrf.mxu0 }
 0x55f   : > { %v2378_v62 = vmul.f32 %v5640_v1, %v2139_v49 }
 0x561   : > { %v2434_v6 = vadd.f32 %v5649_v25, %v2378_v62  ;;  %v5709_v62 = vld [vmem:[%s6204_s8 + $0x18] sm:$0xff] }
 0x563   : > { %v2466_v20 = vmax.f32 %v2434_v6, 0.0 }
 0x566   : > { %v2142_v30 = vpop.f32.mrf.mxu0  ;;  %v2168_v3 = vpop.f32.mrf.mxu1 }
 0x567   : > { %v2386_v31 = vmul.f32 %v5635_v56, %v2142_v30  ;;  %v2379_v52 = vmul.f32 %v5640_v1, %v2168_v3 }
 0x569   : > { %v2442_v4 = vadd.f32 %v5647_v39, %v2386_v31  ;;  %v2435_v50 = vadd.f32 %v5649_v25, %v2379_v52 }
 0x56b   : > { %v2197_v19 = vpop.f32.mrf.mxu2  ;;  %v2474_v33 = vmax.f32 %v2442_v4, 0.0  ;;  %v2467_v44 = vmax.f32 %v2435_v50, 0.0 }
 0x56c   : > { %v2380_v47 = vmul.f32 %v5640_v1, %v2197_v19  ;;  %v5692_v19 = vld [vmem:[%s6204_s8 + $0x10] sm:$0xff] }
 0x56e   : > { %v2145_v61 = vpop.f32.mrf.mxu0  ;;  %v2171_v60 = vpop.f32.mrf.mxu1  ;;  %v2436_v57 = vadd.f32 %v5649_v25, %v2380_v47 }
 0x56f   : > { %v2394_v41 = vmul.f32 %v5629_v26, %v2145_v61  ;;  %v2387_v11 = vmul.f32 %v5635_v56, %v2171_v60 }
 0x570   : > { %v2468_v30 = vmax.f32 %v2436_v57, 0.0 }
 0x571   : > { %v2450_v27 = vadd.f32 %v5637_v28, %v2394_v41  ;;  %v2443_v43 = vadd.f32 %v5647_v39, %v2387_v11 }
 0x573   : > { %v2200_v15 = vpop.f32.mrf.mxu2  ;;  %v2482_v36 = vmax.f32 %v2450_v27, 0.0  ;;  %v2475_v35 = vmax.f32 %v2443_v43, 0.0 }
 0x574   : > { %v2388_v2 = vmul.f32 %v5635_v56, %v2200_v15 }
 0x576   : > { %v2148_v22 = vpop.f32.mrf.mxu0  ;;  %v2174_v59 = vpop.f32.mrf.mxu1  ;;  %v2444_v38 = vadd.f32 %v5647_v39, %v2388_v2 }
 0x577   : > { %v2402_v8 = vmul.f32 %v5633_v14, %v2148_v22  ;;  %v2395_v58 = vmul.f32 %v5629_v26, %v2174_v59 }
 0x578   : > { %v2476_v9 = vmax.f32 %v2444_v38, 0.0 }
 0x579   : > { %v2458_v32 = vadd.f32 %v5631_v7, %v2402_v8  ;;  %v2451_v21 = vadd.f32 %v5637_v28, %v2395_v58 }
 0x57b   : > { %v2490_v23 = vmax.f32 %v2458_v32, 0.0  ;;  %v2203_v46 = vpop.f32.mrf.mxu2  ;;  %v2483_v5 = vmax.f32 %v2451_v21, 0.0 }
 0x57c   : > { %v2396_v37 = vmul.f32 %v5629_v26, %v2203_v46 }
 0x57d   : > { %2526 = vmatpush.msra.mxu0 %v2490_v23 }
 0x57e   : > { %v2177_v51 = vpop.f32.mrf.mxu1  ;;  %v2226_v13 = vpop.f32.mrf.mxu0  ;;  %v2452_v18 = vadd.f32 %v5637_v28, %v2396_v37 }
 0x57f   : > { %v2403_v17 = vmul.f32 %v5633_v14, %v2177_v51  ;;  %2527 = vmatpush.msra.mxu0 %v2482_v36  ;;  %v2381_v31 = vmul.f32 %v5640_v1, %v2226_v13 }
 0x580   : > { %v2484_v48 = vmax.f32 %v2452_v18, 0.0 }
 0x581   : > { %v2459_v40 = vadd.f32 %v5631_v7, %v2403_v17  ;;  %2528 = vmatpush.msra.mxu0 %v2474_v33  ;;  %v2437_v58 = vadd.f32 %v5649_v25, %v2381_v31 }
 0x583   : > { %v2491_v55 = vmax.f32 %v2459_v40, 0.0  ;;  %v2206_v53 = vpop.f32.mrf.mxu2  ;;  %2529 = vmatpush.msra.mxu0 %v2466_v20  ;;  %v2469_v40 = vmax.f32 %v2437_v58, 0.0 }
 0x584   : > { %v2404_v34 = vmul.f32 %v5633_v14, %v2206_v53  ;;  %3780 = vmatmul.msk.f32.vlgmr.msra.gmra.mxu0 %vm544_vm0, %v5661_v54 }
 0x585   : > { %2555 = vmatpush.msrb.mxu1 %v2491_v55 }
 0x586   : > { %v2460_v63 = vadd.f32 %v5631_v7, %v2404_v34  ;;  %v2229_v16 = vpop.f32.mrf.mxu0 }
 0x587   : > { %2556 = vmatpush.msrb.mxu1 %v2483_v5  ;;  %v2284_v0 = vpop.f32.mrf.mxu1  ;;  %v2389_v22 = vmul.f32 %v5635_v56, %v2229_v16 }
 0x588   : > { %v2492_v45 = vmax.f32 %v2460_v63, 0.0  ;;  %v2383_v20 = vmul.f32 %v5640_v1, %v2284_v0 }
 0x589   : > { %2557 = vmatpush.msrb.mxu1 %v2475_v35  ;;  %v2445_v23 = vadd.f32 %v5647_v39, %v2389_v22 }
 0x58a   : > { %2584 = vmatpush.msra.mxu2 %v2492_v45  ;;  %v2439_v2 = vadd.f32 %v5649_v25, %v2383_v20 }
 0x58b   : > { %v5680_v12 = vpop.f32.mrf.mxu2  ;;  %2558 = vmatpush.msrb.mxu1 %v2467_v44  ;;  %v2477_v17 = vmax.f32 %v2445_v23, 0.0 }
 0x58c   : > { %3781 = vmatmul.msk.f32.gmra.mxu0 %vm544_vm0, %v5677_v24  ;;  %3784 = vmatmul.msk.f32.vlgmr.msrb.gmra.mxu1 %vm544_vm0, %v5661_v54  ;;  %v2384_v47 = vmul.f32 %v5640_v1, %v5680_v12  ;;  %v2471_v12 = vmax.f32 %v2439_v2, 0.0 }
 0x58d   : > { %2585 = vmatpush.msra.mxu2 %v2484_v48  ;;  %v5687_v10 = vpop.f32.mrf.mxu3 }
 0x58e   : > { %v2232_v49 = vpop.f32.mrf.mxu0 }
 0x58f   : > { %2586 = vmatpush.msra.mxu2 %v2476_v9  ;;  %v2287_v3 = vpop.f32.mrf.mxu1  ;;  %v2397_v60 = vmul.f32 %v5629_v26, %v2232_v49 }
 0x590   : > { %v2391_v11 = vmul.f32 %v5635_v56, %v2287_v3  ;;  %v2440_v3 = vadd.f32 %v5649_v25, %v2384_v47 }
 0x591   : > { %2587 = vmatpush.msra.mxu2 %v2468_v30  ;;  %v2453_v32 = vadd.f32 %v5637_v28, %v2397_v60  ;;  %v2385_v60 = vmul.f32 %v5640_v1, %v5687_v10 }
 0x592   : > { %3788 = vmatmul.msk.f32.vlgmr.msra.gmra.mxu2 %vm544_vm0, %v5661_v54  ;;  %v2447_v43 = vadd.f32 %v5647_v39, %v2391_v11  ;;  %v2472_v31 = vmax.f32 %v2440_v3, 0.0 }
 0x593   : > { %v2316_v61 = vpop.f32.mrf.mxu2  ;;  %v2485_v36 = vmax.f32 %v2453_v32, 0.0  ;;  %v2441_v32 = vadd.f32 %v5649_v25, %v2385_v60 }
 0x594   : > { %3782 = vmatmul.msk.f32.gmra.mxu0 %vm544_vm0, %v5692_v19  ;;  %3785 = vmatmul.msk.f32.gmra.mxu1 %vm544_vm0, %v5677_v24  ;;  %v2392_v50 = vmul.f32 %v5635_v56, %v2316_v61  ;;  %v2479_v57 = vmax.f32 %v2447_v43, 0.0 }
 0x596   : > { %v2235_v15 = vpop.f32.mrf.mxu0  ;;  %v2345_v41 = vpop.f32.mrf.mxu3  ;;  %v2448_v9 = vadd.f32 %v5647_v39, %v2392_v50 }
 0x597   : > { %v2405_v59 = vmul.f32 %v5633_v14, %v2235_v15  ;;  %v2290_v8 = vpop.f32.mrf.mxu1  ;;  %v2393_v48 = vmul.f32 %v5635_v56, %v2345_v41 }
 0x598   : > { %v2399_v51 = vmul.f32 %v5629_v26, %v2290_v8  ;;  %v2480_v22 = vmax.f32 %v2448_v9, 0.0 }
 0x599   : > { %v2461_v27 = vadd.f32 %v5631_v7, %v2405_v59  ;;  %v2449_v41 = vadd.f32 %v5647_v39, %v2393_v48 }
 0x59a   : > { %3789 = vmatmul.msk.f32.gmra.mxu2 %vm544_vm0, %v5677_v24  ;;  %v2455_v52 = vadd.f32 %v5637_v28, %v2399_v51 }
 0x59b   : > { %v2493_v46 = vmax.f32 %v2461_v27, 0.0  ;;  %v2319_v4 = vpop.f32.mrf.mxu2  ;;  %v2481_v10 = vmax.f32 %v2449_v41, 0.0  ;;  %v2473_v27 = vmax.f32 %v2441_v32, 0.0 }
 0x59c   : > { %3783 = vmatmul.msk.f32.gmra.mxu0 %vm544_vm0, %v5709_v62  ;;  %3786 = vmatmul.msk.f32.gmra.mxu1 %vm544_vm0, %v5692_v19  ;;  %v2400_v55 = vmul.f32 %v5629_v26, %v2319_v4  ;;  %v2487_v35 = vmax.f32 %v2455_v52, 0.0 }
 0x59d   : > { %2613 = vmatpush.msrb.mxu3 %v2493_v46 }
 0x59e   : > { %v5719_v6 = vpop.f32.mrf.mxu0  ;;  %v2348_v13 = vpop.f32.mrf.mxu3  ;;  %v2456_v45 = vadd.f32 %v5637_v28, %v2400_v55 }
 0x59f   : > { %2614 = vmatpush.msrb.mxu3 %v2485_v36  ;;  %v2293_v33 = vpop.f32.mrf.mxu1  ;;  %v2401_v18 = vmul.f32 %v5629_v26, %v2348_v13  ;;  %v2382_v36 = vmul.f32 %v5640_v1, %v5719_v6  ;;  %v5802_v1 = vpop.permute.xlu0 %2767 }
 0x5a0   : > { %v2407_v21 = vmul.f32 %v5633_v14, %v2293_v33  ;;  %v2488_v61 = vmax.f32 %v2456_v45, 0.0 }
 0x5a1   : > { %2615 = vmatpush.msrb.mxu3 %v2477_v17  ;;  %v2457_v30 = vadd.f32 %v5637_v28, %v2401_v18 }
 0x5a2   : > { %3790 = vmatmul.msk.f32.gmra.mxu2 %vm544_vm0, %v5692_v19  ;;  %v2463_v37 = vadd.f32 %v5631_v7, %v2407_v21 }
 0x5a3   : > { %v2322_v53 = vpop.f32.mrf.mxu2  ;;  %2616 = vmatpush.msrb.mxu3 %v2469_v40  ;;  %v2489_v8 = vmax.f32 %v2457_v30, 0.0  ;;  %v5834_v30 = vld [vmem:[%s6426_s30] sm:$0x7]  ;;  %s3578_s30 = sshll.u32 %s3575_s4, 4  ;;  %s3579_s30 = int_to_ptr.hbm [resolvable:$true] %s3578_s30 }
 0x5a4   : > { %v2408_v34 = vmul.f32 %v5633_v14, %v2322_v53  ;;  %3787 = vmatmul.msk.f32.gmra.mxu1 %vm544_vm0, %v5709_v62  ;;  %3792 = vmatmul.msk.f32.vlgmr.msrb.gmra.mxu3 %vm544_vm0, %v5661_v54  ;;  %v2495_v5 = vmax.f32 %v2463_v37, 0.0  ;;  %s4067_s12 = sshra.s32 %s3579_s30, 4  ;;  %s4068_s12 = int_to_ptr.hbm [resolvable:$true] %s4067_s12 }
 0x5a5   : > { %s4069_s11 = scalar_lea.hbm %s4068_s12, 192  ;;  %p4074_p9 = scmp.lt.s32.totalorder %s4068_s12, %s6453_s18 }
 0x5a6   : > { %v2464_v63 = vadd.f32 %v5631_v7, %v2408_v34  ;;  %v2258_v16 = vpop.f32.mrf.mxu0  ;;  %2671 = vmatpush.msra.mxu1 %v2495_v5  ;;  %v2351_v0 = vpop.f32.mrf.mxu3  ;;  %p4070_p1 = scmp.ne.s32.totalorder %s4068_s12, %s4069_s11  ;;  %p4075_p10 = scmp.lt.s32.totalorder %s4073_s14, %s4069_s11 }
 0x5a7   : > { %v2409_v44 = vmul.f32 %v5633_v14, %v2351_v0  ;;  %v2390_v4 = vmul.f32 %v5635_v56, %v2258_v16  ;;  %v2438_v56 = vadd.f32 %v5649_v25, %v2382_v36  ;;  %v5808_v21 = vpop.permute.xlu0 %2757 }
 0x5a8   : > { %v2496_v38 = vmax.f32 %v2464_v63, 0.0  ;;  %2672 = vmatpush.msra.mxu1 %v2487_v35  ;;  %p4071_p4 = pnand %p4070_p1, %p4274_p7  ;;  %p4076_p11 = por %p4075_p10, %p4074_p9 }
 0x5a9   : > { %v2465_v49 = vadd.f32 %v5631_v7, %v2409_v44 }
 0x5aa   : > { %3791 = vmatmul.msk.f32.gmra.mxu2 %vm544_vm0, %v5709_v62  ;;  %2673 = vmatpush.msra.mxu1 %v2479_v57  ;;  %p4072_p8 = pneg %p4071_p4 }
 0x5ab   : > { %2700 = vmatpush.msrb.mxu2 %v2496_v38  ;;  %v2497_v15 = vmax.f32 %v2465_v49, 0.0 }
 0x5ac   : > { %3793 = vmatmul.msk.f32.gmra.mxu3 %vm544_vm0, %v5677_v24  ;;  %2674 = vmatpush.msra.mxu1 %v2471_v12  ;;  %p4077_p2 = pnand %p4076_p11, %p4072_p8 }
 0x5ad   : > { %2701 = vmatpush.msrb.mxu2 %v2488_v61  ;;  %3800 = vmatmul.msk.f32.vlgmr.msra.gmra.mxu1 %vm544_vm0, %v5661_v54 }
 0x5ae   : > { %v2261_v59 = vpop.f32.mrf.mxu0  ;;  %2729 = vmatpush.msra.mxu3 %v2497_v15 }
 0x5af   : > { %2702 = vmatpush.msrb.mxu2 %v2480_v22  ;;  %v2398_v23 = vmul.f32 %v5629_v26, %v2261_v59  ;;  %v2446_v26 = vadd.f32 %v5647_v39, %v2390_v4  ;;  %v5820_v2 = vpop.permute.xlu0 %2813 }
 0x5b0   : > { %2730 = vmatpush.msra.mxu3 %v2489_v8 }
 0x5b1   : > { %2703 = vmatpush.msrb.mxu2 %v2472_v31  ;;  %v2454_v51 = vadd.f32 %v5637_v28, %v2398_v23  ;;  %v2470_v28 = vmax.f32 %v2438_v56, 0.0 }
 0x5b2   : > { %3804 = vmatmul.msk.f32.vlgmr.msrb.gmra.mxu2 %vm544_vm0, %v5661_v54  ;;  %2731 = vmatpush.msra.mxu3 %v2481_v10 }
 0x5b3   : > { %v2486_v33 = vmax.f32 %v2454_v51, 0.0 }
 0x5b4   : > { %3794 = vmatmul.msk.f32.gmra.mxu3 %vm544_vm0, %v5692_v19 }
 0x5b5   : > { %3801 = vmatmul.msk.f32.gmra.mxu1 %vm544_vm0, %v5677_v24  ;;  %2732 = vmatpush.msra.mxu3 %v2473_v27 }
 0x5b6   : > { %v2264_v46 = vpop.f32.mrf.mxu0 }
 0x5b7   : > { %v2406_v58 = vmul.f32 %v5633_v14, %v2264_v46  ;;  %v2478_v14 = vmax.f32 %v2446_v26, 0.0 }
 0x5b9   : > { %v2462_v13 = vadd.f32 %v5631_v7, %v2406_v58 }
 0x5ba   : > { %3805 = vmatmul.msk.f32.gmra.mxu2 %vm544_vm0, %v5677_v24 }
 0x5bb   : > { %v2494_v17 = vmax.f32 %v2462_v13, 0.0 }
 0x5bc   : > { %3795 = vmatmul.msk.f32.gmra.mxu3 %vm544_vm0, %v5709_v62 }
 0x5bd   : > { %2642 = vmatpush.msrb.mxu0 %v2494_v17  ;;  %3802 = vmatmul.msk.f32.gmra.mxu1 %vm544_vm0, %v5692_v19 }
 0x5bf   : > { %2643 = vmatpush.msrb.mxu0 %v2486_v33 }
 0x5c1   : > { %2644 = vmatpush.msrb.mxu0 %v2478_v14 }
 0x5c2   : > { %3806 = vmatmul.msk.f32.gmra.mxu2 %vm544_vm0, %v5692_v19 }
 0x5c3   : > { %2645 = vmatpush.msrb.mxu0 %v2470_v28 }
 0x5c4   : > { %3796 = vmatmul.msk.f32.vlgmr.msrb.gmra.mxu0 %vm544_vm0, %v5661_v54  ;;  %3808 = vmatmul.msk.f32.vlgmr.msra.gmra.mxu3 %vm544_vm0, %v5661_v54  ;;  %v5804_v54 = vpop.permute.xlu1 %2762 }
 0x5c5   : > { %3803 = vmatmul.msk.f32.gmra.mxu1 %vm544_vm0, %v5709_v62 }
 0x5ca   : > { %3807 = vmatmul.msk.f32.gmra.mxu2 %vm544_vm0, %v5709_v62 }
 0x5cc   : > { %3797 = vmatmul.msk.f32.gmra.mxu0 %vm544_vm0, %v5677_v24  ;;  %3809 = vmatmul.msk.f32.gmra.mxu3 %vm544_vm0, %v5677_v24  ;;  %v5806_v24 = vpop.permute.xlu2 %2823  ;;  %v5810_v40 = vpop.permute.xlu1 %2818 }
 0x5d4   : > { %3798 = vmatmul.msk.f32.gmra.mxu0 %vm544_vm0, %v5692_v19  ;;  %3810 = vmatmul.msk.f32.gmra.mxu3 %vm544_vm0, %v5692_v19  ;;  %v5815_v53 = vpop.permute.xlu2 %2752  ;;  %v5823_v18 = vpop.permute.xlu1 %2808 }
 0x5dc   : > { %3799 = vmatmul.msk.f32.gmra.mxu0 %vm544_vm0, %v5709_v62  ;;  %3811 = vmatmul.msk.f32.gmra.mxu3 %vm544_vm0, %v5709_v62 }
 0x601   : > { %v2531_v7 = vpop.f32.mrf.mxu0 }
 0x602   : > { %v2770_v5 = vmul.f32 %v5815_v53, %v2531_v7 }
 0x604   : > { %v2826_v47 = vadd.f32 %v5823_v18, %v2770_v5 }
 0x606   : > { %v2858_v49 = vmax.f32 %v2826_v47, 0.0 }
 0x609   : > { %v2534_v39 = vpop.f32.mrf.mxu0  ;;  %v2560_v25 = vpop.f32.mrf.mxu1 }
 0x60a   : > { %v2778_v55 = vmul.f32 %v5808_v21, %v2534_v39  ;;  %v2771_v12 = vmul.f32 %v5815_v53, %v2560_v25 }
 0x60c   : > { %v2834_v16 = vadd.f32 %v5820_v2, %v2778_v55  ;;  %v2827_v22 = vadd.f32 %v5823_v18, %v2771_v12 }
 0x60e   : > { %v2866_v38 = vmax.f32 %v2834_v16, 0.0  ;;  %v2859_v32 = vmax.f32 %v2827_v22, 0.0 }
 0x611   : > { %v2537_v6 = vpop.f32.mrf.mxu0  ;;  %v2563_v11 = vpop.f32.mrf.mxu1 }
 0x612   : > { %v2786_v20 = vmul.f32 %v5804_v54, %v2537_v6  ;;  %v2779_v48 = vmul.f32 %v5808_v21, %v2563_v11 }
 0x614   : > { %v2842_v34 = vadd.f32 %v5810_v40, %v2786_v20  ;;  %v2835_v60 = vadd.f32 %v5820_v2, %v2779_v48 }
 0x615   : > { %v2589_v19 = vpop.f32.mrf.mxu2 }
 0x616   : > { %v2874_v0 = vmax.f32 %v2842_v34, 0.0  ;;  %v2867_v59 = vmax.f32 %v2835_v60, 0.0  ;;  %v2772_v36 = vmul.f32 %v5815_v53, %v2589_v19 }
 0x618   : > { %v2828_v56 = vadd.f32 %v5823_v18, %v2772_v36 }
 0x619   : > { %v2540_v52 = vpop.f32.mrf.mxu0  ;;  %v2566_v62 = vpop.f32.mrf.mxu1 }
 0x61a   : > { %v2794_v37 = vmul.f32 %v5802_v1, %v2540_v52  ;;  %v2787_v35 = vmul.f32 %v5804_v54, %v2566_v62  ;;  %v2860_v7 = vmax.f32 %v2828_v56, 0.0 }
 0x61c   : > { %v2850_v43 = vadd.f32 %v5806_v24, %v2794_v37  ;;  %v2843_v57 = vadd.f32 %v5810_v40, %v2787_v35 }
 0x61d   : > { %v2592_v50 = vpop.f32.mrf.mxu2 }
 0x61e   : > { %v2882_v63 = vmax.f32 %v2850_v43, 0.0  ;;  %v2875_v41 = vmax.f32 %v2843_v57, 0.0  ;;  %v2780_v27 = vmul.f32 %v5808_v21, %v2592_v50 }
 0x620   : > { %2906 = vmatpush.msra.mxu0 %v2882_v63  ;;  %v2836_v26 = vadd.f32 %v5820_v2, %v2780_v27 }
 0x621   : > { %v2569_v45 = vpop.f32.mrf.mxu1 }
 0x622   : > { %v2795_v44 = vmul.f32 %v5802_v1, %v2569_v45  ;;  %2907 = vmatpush.msra.mxu0 %v2874_v0  ;;  %v2868_v14 = vmax.f32 %v2836_v26, 0.0 }
 0x624   : > { %v2851_v9 = vadd.f32 %v5806_v24, %v2795_v44  ;;  %2908 = vmatpush.msra.mxu0 %v2866_v38 }
 0x625   : > { %v2595_v3 = vpop.f32.mrf.mxu2 }
 0x626   : > { %v2883_v61 = vmax.f32 %v2851_v9, 0.0  ;;  %2909 = vmatpush.msra.mxu0 %v2858_v49  ;;  %v2788_v31 = vmul.f32 %v5804_v54, %v2595_v3 }
 0x627   : > { %v2618_v15 = vpop.f32.mrf.mxu3  ;;  %3812 = vmatmul.msk.f32.vlgmr.msra.gmra.mxu0 %vm544_vm0, %v5834_v30 }
 0x628   : > { %2926 = vmatpush.msrb.mxu0 %v2883_v61  ;;  %v2844_v4 = vadd.f32 %v5810_v40, %v2788_v31  ;;  %v2773_v37 = vmul.f32 %v5815_v53, %v2618_v15 }
 0x62a   : > { %2927 = vmatpush.msrb.mxu0 %v2875_v41  ;;  %v2676_v8 = vpop.f32.mrf.mxu1  ;;  %v2876_v17 = vmax.f32 %v2844_v4, 0.0  ;;  %v2829_v44 = vadd.f32 %v5823_v18, %v2773_v37 }
 0x62b   : > { %v2775_v35 = vmul.f32 %v5815_v53, %v2676_v8 }
 0x62c   : > { %2928 = vmatpush.msrb.mxu0 %v2867_v59  ;;  %v2861_v60 = vmax.f32 %v2829_v44, 0.0  ;;  %v3377_v44 = vld [vmem:[%s6427_s0 + $0x18] sm:$0xff] }
 0x62d   : > { %v2598_v10 = vpop.f32.mrf.mxu2  ;;  %v2831_v12 = vadd.f32 %v5823_v18, %v2775_v35  ;;  %3462 = vmatpush.msrb.mxu1 %v3377_v44 }
 0x62e   : > { %v2796_v23 = vmul.f32 %v5802_v1, %v2598_v10  ;;  %2929 = vmatpush.msrb.mxu0 %v2859_v32 }
 0x62f   : > { %v2621_v46 = vpop.f32.mrf.mxu3  ;;  %3813 = vmatmul.msk.f32.vlgmr.msrb.gmra.mxu0 %vm544_vm0, %v5834_v30  ;;  %v2863_v59 = vmax.f32 %v2831_v12, 0.0 }
 0x630   : > { %v2852_v58 = vadd.f32 %v5806_v24, %v2796_v23  ;;  %v2781_v19 = vmul.f32 %v5808_v21, %v2621_v46 }
 0x632   : > { %v2884_v51 = vmax.f32 %v2852_v58, 0.0  ;;  %v2679_v13 = vpop.f32.mrf.mxu1  ;;  %v2837_v63 = vadd.f32 %v5820_v2, %v2781_v19 }
 0x633   : > { %v2783_v5 = vmul.f32 %v5808_v21, %v2679_v13 }
 0x634   : > { %2946 = vmatpush.msra.mxu0 %v2884_v51  ;;  %v2869_v49 = vmax.f32 %v2837_v63, 0.0 }
 0x635   : > { %v2705_v33 = vpop.f32.mrf.mxu2  ;;  %v2839_v48 = vadd.f32 %v5820_v2, %v2783_v5 }
 0x636   : > { %2947 = vmatpush.msra.mxu0 %v2876_v17  ;;  %v2776_v10 = vmul.f32 %v5815_v53, %v2705_v33 }
 0x637   : > { %v2624_v28 = vpop.f32.mrf.mxu3  ;;  %v2871_v15 = vmax.f32 %v2839_v48, 0.0  ;;  %v3376_v48 = vld [vmem:[%s6427_s0 + $0x10] sm:$0xff] }
 0x638   : > { %2948 = vmatpush.msra.mxu0 %v2868_v14  ;;  %v2789_v6 = vmul.f32 %v5804_v54, %v2624_v28  ;;  %v2832_v36 = vadd.f32 %v5823_v18, %v2776_v10  ;;  %3463 = vmatpush.msrb.mxu1 %v3376_v48 }
 0x63a   : > { %2949 = vmatpush.msra.mxu0 %v2860_v7  ;;  %v2682_v39 = vpop.f32.mrf.mxu1  ;;  %v2845_v55 = vadd.f32 %v5810_v40, %v2789_v6  ;;  %v2864_v17 = vmax.f32 %v2832_v36, 0.0 }
 0x63b   : > { %3814 = vmatmul.msk.f32.vlgmr.msra.gmra.mxu0 %vm544_vm0, %v5834_v30  ;;  %v2791_v62 = vmul.f32 %v5804_v54, %v2682_v39 }
 0x63c   : > { %v2877_v38 = vmax.f32 %v2845_v55, 0.0 }
 0x63d   : > { %v2708_v25 = vpop.f32.mrf.mxu2  ;;  %v2847_v0 = vadd.f32 %v5810_v40, %v2791_v62 }
 0x63e   : > { %v2784_v8 = vmul.f32 %v5808_v21, %v2708_v25 }
 0x63f   : > { %v2627_v11 = vpop.f32.mrf.mxu3  ;;  %v2879_v61 = vmax.f32 %v2847_v0, 0.0 }
 0x640   : > { %v2797_v20 = vmul.f32 %v5802_v1, %v2627_v11  ;;  %v2840_v4 = vadd.f32 %v5820_v2, %v2784_v8 }
 0x641   : > { %v2647_v52 = vpop.f32.mrf.mxu0 }
 0x642   : > { %v2853_v43 = vadd.f32 %v5806_v24, %v2797_v20  ;;  %v2685_v34 = vpop.f32.mrf.mxu1  ;;  %v2872_v13 = vmax.f32 %v2840_v4, 0.0  ;;  %v2774_v7 = vmul.f32 %v5815_v53, %v2647_v52 }
 0x643   : > { %v2799_v50 = vmul.f32 %v5802_v1, %v2685_v34 }
 0x644   : > { %v2885_v16 = vmax.f32 %v2853_v43, 0.0  ;;  %v2830_v20 = vadd.f32 %v5823_v18, %v2774_v7 }
 0x645   : > { %v2711_v47 = vpop.f32.mrf.mxu2  ;;  %v2855_v45 = vadd.f32 %v5806_v24, %v2799_v50 }
 0x646   : > { %2966 = vmatpush.msrb.mxu0 %v2885_v16  ;;  %v2792_v41 = vmul.f32 %v5804_v54, %v2711_v47  ;;  %v2862_v5 = vmax.f32 %v2830_v20, 0.0 }
 0x647   : > { %v2734_v57 = vpop.f32.mrf.mxu3  ;;  %v2887_v9 = vmax.f32 %v2855_v45, 0.0 }
 0x648   : > { %2967 = vmatpush.msrb.mxu0 %v2877_v38  ;;  %v2848_v27 = vadd.f32 %v5810_v40, %v2792_v41  ;;  %v2777_v50 = vmul.f32 %v5815_v53, %v2734_v57  ;;  %v3375_v57 = vld [vmem:[%s6427_s0 + $0x8] sm:$0xff] }
 0x649   : > { %v2650_v3 = vpop.f32.mrf.mxu0  ;;  %3006 = vmatpush.msra.mxu2 %v2887_v9  ;;  %3464 = vmatpush.msrb.mxu1 %v3375_v57  ;;  %v3374_v9 = vld [vmem:[%s6427_s0] sm:$0xff] }
 0x64a   : > { %2968 = vmatpush.msrb.mxu0 %v2869_v49  ;;  %v2880_v51 = vmax.f32 %v2848_v27, 0.0  ;;  %v2782_v14 = vmul.f32 %v5808_v21, %v2650_v3 }
 0x64b   : > { %3007 = vmatpush.msra.mxu2 %v2879_v61  ;;  %3465 = vmatpush.msrb.mxu1 %v3374_v9 }
 0x64c   : > { %2969 = vmatpush.msrb.mxu0 %v2861_v60  ;;  %v2838_v6 = vadd.f32 %v5820_v2, %v2782_v14 }
 0x64d   : > { %v2714_v22 = vpop.f32.mrf.mxu2  ;;  %3815 = vmatmul.msk.f32.vlgmr.msrb.gmra.mxu0 %vm544_vm0, %v5834_v30  ;;  %3008 = vmatpush.msra.mxu2 %v2871_v15 }
 0x64e   : > { %v2800_v31 = vmul.f32 %v5802_v1, %v2714_v22  ;;  %v2870_v43 = vmax.f32 %v2838_v6, 0.0 }
 0x64f   : > { %v2737_v32 = vpop.f32.mrf.mxu3  ;;  %3009 = vmatpush.msra.mxu2 %v2863_v59 }
 0x650   : > { %v2856_v23 = vadd.f32 %v5806_v24, %v2800_v31  ;;  %3817 = vmatmul.msk.f32.vlgmr.msra.gmra.mxu2 %vm544_vm0, %v5834_v30  ;;  %v2785_v34 = vmul.f32 %v5808_v21, %v2737_v32 }
 0x651   : > { %v2653_v46 = vpop.f32.mrf.mxu0 }
 0x652   : > { %v2888_v58 = vmax.f32 %v2856_v23, 0.0  ;;  %v2790_v56 = vmul.f32 %v5804_v54, %v2653_v46  ;;  %v2841_v35 = vadd.f32 %v5820_v2, %v2785_v34 }
 0x654   : > { %3026 = vmatpush.msrb.mxu3 %v2888_v58  ;;  %v2846_v39 = vadd.f32 %v5810_v40, %v2790_v56  ;;  %v2873_v21 = vmax.f32 %v2841_v35, 0.0 }
 0x656   : > { %3027 = vmatpush.msrb.mxu3 %v2880_v51  ;;  %v2878_v62 = vmax.f32 %v2846_v39, 0.0 }
 0x657   : > { %v2740_v26 = vpop.f32.mrf.mxu3 }
 0x658   : > { %3028 = vmatpush.msrb.mxu3 %v2872_v13  ;;  %v2793_v37 = vmul.f32 %v5804_v54, %v2740_v26 }
 0x659   : > { %v2656_v33 = vpop.f32.mrf.mxu0 }
 0x65a   : > { %v2798_v28 = vmul.f32 %v5802_v1, %v2656_v33  ;;  %3029 = vmatpush.msrb.mxu3 %v2864_v17  ;;  %v2849_v63 = vadd.f32 %v5810_v40, %v2793_v37 }
 0x65b   : > { %3818 = vmatmul.msk.f32.vlgmr.msrb.gmra.mxu3 %vm544_vm0, %v5834_v30 }
 0x65c   : > { %v2854_v25 = vadd.f32 %v5806_v24, %v2798_v28  ;;  %v2881_v54 = vmax.f32 %v2849_v63, 0.0 }
 0x65e   : > { %v2886_v11 = vmax.f32 %v2854_v25, 0.0 }
 0x65f   : > { %v2743_v19 = vpop.f32.mrf.mxu3 }
 0x660   : > { %2986 = vmatpush.msra.mxu0 %v2886_v11  ;;  %v2801_v55 = vmul.f32 %v5802_v1, %v2743_v19  ;;  %v2833_v1 = vadd.f32 %v5823_v18, %v2777_v50 }
 0x662   : > { %v2857_v52 = vadd.f32 %v5806_v24, %v2801_v55  ;;  %2987 = vmatpush.msra.mxu0 %v2878_v62  ;;  %v2865_v24 = vmax.f32 %v2833_v1, 0.0 }
 0x664   : > { %v2889_v16 = vmax.f32 %v2857_v52, 0.0  ;;  %2988 = vmatpush.msra.mxu0 %v2870_v43 }
 0x666   : > { %2989 = vmatpush.msra.mxu0 %v2862_v5 }
 0x667   : > { %3816 = vmatmul.msk.f32.vlgmr.msra.gmra.mxu0 %vm544_vm0, %v5834_v30 }
 0x668   : > { %3046 = vmatpush.msrb.mxu0 %v2889_v16 }
 0x66a   : > { %3047 = vmatpush.msrb.mxu0 %v2881_v54 }
 0x66c   : > { %3048 = vmatpush.msrb.mxu0 %v2873_v21 }
 0x66e   : > { %3049 = vmatpush.msrb.mxu0 %v2865_v24 }
 0x66f   : > { %3819 = vmatmul.msk.f32.vlgmr.msrb.gmra.mxu0 %vm544_vm0, %v5834_v30 }
 0x6a4   : > { %v2911_v40 = vpop.f32.mrf.mxu0 }
 0x6a5   : > { %3058 = vrot.lane.b32.xlu1 %v2911_v40, %s4138_s20  ;;  %3061 = vrot.lane.b32.xlu0 %v2911_v40, %s4137_s29 }
 0x6ac   : > { %v2931_v53 = vpop.f32.mrf.mxu0 }
 0x6ad   : > { %3055 = vrot.lane.b32.xlu0 %v2911_v40, %s4136_s23  ;;  %3065 = vrot.lane.b32.xlu1 %v2931_v53, %s4136_s23 }
 0x6ae   : > { %3071 = vrot.lane.b32.xlu2 %v2931_v53, %s4137_s29 }
 0x6b6   : > { %3068 = vrot.lane.b32.xlu2 %v2931_v53, %s4138_s20 }
 0x6b8   : > { %v5909_v2 = vpop.f32.mrf.mxu0 }
 0x6b9   : > { %3081 = vrot.lane.b32.xlu0 %v5909_v2, %s4137_s29  ;;  %3078 = vrot.lane.b32.xlu1 %v5909_v2, %s4138_s20 }
 0x6c1   : > { %3075 = vrot.lane.b32.xlu0 %v5909_v2, %s4136_s23 }
 0x6ca   : > { %v5917_v18 = vpop.f32.mrf.mxu0 }
 0x6cb   : > { %3085 = vrot.lane.b32.xlu1 %v5917_v18, %s4136_s23  ;;  %3091 = vrot.lane.b32.xlu2 %v5917_v18, %s4137_s29 }
 0x6d3   : > { %v5923_v30 = vpop.f32.mrf.mxu2  ;;  %3088 = vrot.lane.b32.xlu2 %v5917_v18, %s4138_s20 }
 0x6d4   : > { %3105 = vrot.lane.b32.xlu1 %v5923_v30, %s4136_s23 }
 0x6db   : > { %3111 = vrot.lane.b32.xlu2 %v5923_v30, %s4137_s29 }
 0x6de   : > { %v5931_v0 = vpop.f32.mrf.mxu3 }
 0x6df   : > { %3121 = vrot.lane.b32.xlu0 %v5931_v0, %s4137_s29 }
 0x6e3   : > { %3108 = vrot.lane.b32.xlu2 %v5923_v30, %s4138_s20 }
 0x6e4   : > { %v5937_v47 = vpop.f32.mrf.mxu0 }
 0x6e5   : > { %3098 = vrot.lane.b32.xlu1 %v5937_v47, %s4138_s20 }
 0x6e7   : > { %3101 = vrot.lane.b32.xlu0 %v5937_v47, %s4137_s29 }
 0x6ec   : > { %v5943_v45 = vpop.f32.mrf.mxu0 }
 0x6ed   : > { %3125 = vrot.lane.b32.xlu1 %v5943_v45, %s4136_s23  ;;  %3131 = vrot.lane.b32.xlu2 %v5943_v45, %s4137_s29 }
 0x6ef   : > { %3095 = vrot.lane.b32.xlu0 %v5937_v47, %s4136_s23 }
 0x6f5   : > { %3118 = vrot.lane.b32.xlu1 %v5931_v0, %s4138_s20  ;;  %3128 = vrot.lane.b32.xlu2 %v5943_v45, %s4138_s20 }
 0x6f7   : > { %3115 = vrot.lane.b32.xlu0 %v5931_v0, %s4136_s23  ;;  %s3884_s23 = smul.u32 192, %s4326_s28 }
 0x6f9   : > { %s6089_s26 = scalar_lea.vmem [#allocation8], %s3884_s23 }
 0x6fa   : > { %s3576_s13 = sshll.u32 %s6089_s26, 4  ;;  %s3577_s13 = int_to_ptr.vmem [resolvable:$true] %s3576_s13 }
 0x708   : > { %v3072_v38 = vpop.permute.xlu2 %3071 }
 0x709   : > { %v3152_v22 = vrot.slane %v3072_v38, 4 }
 0x710   : > { %v3069_v49 = vpop.permute.xlu2 %3068 }
 0x711   : > { %v3146_v12 = vrot.slane %v3069_v49, 4 }
 0x713   : > { %v3147_v41 = vsel %vm1526_vm1, %v3146_v12, %v2931_v53 }
 0x714   : > { %v3151_v31 = vperm.slane %v3147_v41, %v5117_v29 }
 0x716   : > { %v3172_v4 = vrot.slane %v3151_v31, 4 }
 0x717   : > { %v3059_v3 = vpop.permute.xlu1 %3058  ;;  %v3062_v61 = vpop.permute.xlu0 %3061 }
 0x718   : > { %v3134_v60 = vrot.slane %v3059_v3, 4  ;;  %v3140_v59 = vrot.slane %v3062_v61, 4 }
 0x71a   : > { %v3135_v15 = vsel %vm1526_vm1, %v3134_v60, %v2911_v40 }
 0x71b   : > { %v3139_v8 = vperm.slane %v3135_v15, %v5117_v29 }
 0x71d   : > { %v3160_v46 = vrot.slane %v3139_v8, 4 }
 0x71f   : > { %v3056_v32 = vpop.permute.xlu0 %3055  ;;  %v3066_v10 = vpop.permute.xlu1 %3065 }
 0x720   : > { %v3141_v27 = vsel %vm1526_vm1, %v3140_v59, %v3056_v32  ;;  %v3153_v23 = vsel %vm1526_vm1, %v3152_v22, %v3066_v10 }
 0x721   : > { %v3145_v58 = vperm.slane %v3141_v27, %v5117_v29  ;;  %v3157_v36 = vperm.slane %v3153_v23, %v5117_v29 }
 0x723   : > { %v3158_v51 = vrot.slane %v3145_v58, 4  ;;  %v3161_v13 = vsel %vm1526_vm1, %v3145_v58, %v3160_v46  ;;  %v3170_v26 = vrot.slane %v3157_v36, 4  ;;  %v3173_v17 = vsel %vm1526_vm1, %v3157_v36, %v3172_v4 }
 0x724   : > { %v3181_v56 = vperm.slane %v3173_v17, %v5167_v42  ;;  %v3169_v39 = vperm.slane %v3161_v13, %v5167_v42 }
 0x725   : > { %v3159_v33 = vsel %vm1526_vm1, %v3158_v51, %v3139_v8  ;;  %v3171_v14 = vsel %vm1526_vm1, %v3170_v26, %v3151_v31  ;;  %v3092_v6 = vpop.permute.xlu2 %3091 }
 0x726   : > { %v3165_v28 = vperm.slane %v3159_v33, %v5167_v42  ;;  %v3177_v7 = vperm.slane %v3171_v14, %v5167_v42  ;;  %v3186_v25 = vrot.slane %v3181_v56, 4  ;;  %v3206_v44 = vrot.slane %v3092_v6, 4 }
 0x728   : > { %v3182_v11 = vrot.slane %v3177_v7, 4  ;;  %v3184_v19 = vrot.slane %v3165_v28, 4  ;;  %v5986_v20 = vsel %vm1526_vm1, %v3186_v25, %v3169_v39 }
 0x72a   : > { %v5989_v62 = vsel %vm1526_vm1, %v3182_v11, %v3165_v28  ;;  %v5992_v37 = vsel %vm1526_vm1, %v3177_v7, %v3184_v19 }
 0x72b   : > { %v3082_v55 = vpop.permute.xlu0 %3081  ;;  %v3079_v43 = vpop.permute.xlu1 %3078  ;;  %3820 = vmatmul.msk.f32.vlgmr.msrb.gmra.mxu1 %vm544_vm0, %v5989_v62 }
 0x72c   : > { %v3188_v34 = vrot.slane %v3079_v43, 4  ;;  %v3194_v5 = vrot.slane %v3082_v55, 4 }
 0x72d   : > { %v3089_v63 = vpop.permute.xlu2 %3088 }
 0x72e   : > { %v3189_v52 = vsel %vm1526_vm1, %v3188_v34, %v5909_v2  ;;  %v3200_v35 = vrot.slane %v3089_v63, 4 }
 0x72f   : > { %v3193_v50 = vperm.slane %v3189_v52, %v5117_v29 }
 0x730   : > { %v3201_v40 = vsel %vm1526_vm1, %v3200_v35, %v5917_v18 }
 0x731   : > { %v3214_v54 = vrot.slane %v3193_v50, 4  ;;  %v3205_v53 = vperm.slane %v3201_v40, %v5117_v29 }
 0x733   : > { %v3076_v16 = vpop.permute.xlu0 %3075  ;;  %v3226_v57 = vrot.slane %v3205_v53, 4 }
 0x734   : > { %v3195_v1 = vsel %vm1526_vm1, %v3194_v5, %v3076_v16 }
 0x735   : > { %v3199_v21 = vperm.slane %v3195_v1, %v5117_v29  ;;  %v3112_v38 = vpop.permute.xlu2 %3111 }
 0x736   : > { %v3260_v58 = vrot.slane %v3112_v38, 4 }
 0x737   : > { %v3215_v24 = vsel %vm1526_vm1, %v3199_v21, %v3214_v54  ;;  %v3212_v9 = vrot.slane %v3199_v21, 4 }
 0x738   : > { %v3223_v41 = vperm.slane %v3215_v24, %v5167_v42 }
 0x739   : > { %v3213_v18 = vsel %vm1526_vm1, %v3212_v9, %v3193_v50 }
 0x73a   : > { %v6016_v59 = vperm.slane %v3213_v18, %v5167_v42 }
 0x73d   : > { %v3086_v2 = vpop.permute.xlu1 %3085  ;;  %v3109_v32 = vpop.permute.xlu2 %3108 }
 0x73e   : > { %v3207_v48 = vsel %vm1526_vm1, %v3206_v44, %v3086_v2  ;;  %v3254_v4 = vrot.slane %v3109_v32, 4 }
 0x73f   : > { %v3211_v49 = vperm.slane %v3207_v48, %v5117_v29 }
 0x740   : > { %v3255_v51 = vsel %vm1526_vm1, %v3254_v4, %v5923_v30 }
 0x741   : > { %v3224_v12 = vrot.slane %v3211_v49, 4  ;;  %v3227_v3 = vsel %vm1526_vm1, %v3211_v49, %v3226_v57  ;;  %v3259_v56 = vperm.slane %v3255_v51, %v5117_v29 }
 0x742   : > { %v3235_v61 = vperm.slane %v3227_v3, %v5167_v42 }
 0x743   : > { %v3225_v60 = vsel %vm1526_vm1, %v3224_v12, %v3205_v53  ;;  %v3280_v25 = vrot.slane %v3259_v56, 4 }
 0x744   : > { %v6012_v15 = vperm.slane %v3225_v60, %v5167_v42  ;;  %v3240_v22 = vrot.slane %v3235_v61, 4 }
 0x746   : > { %v3236_v8 = vrot.slane %v6012_v15, 4  ;;  %v6020_v31 = vsel %vm1526_vm1, %v3240_v22, %v3223_v41  ;;  %v3106_v27 = vpop.permute.xlu1 %3105 }
 0x747   : > { %v3132_v23 = vpop.permute.xlu2 %3131  ;;  %v3261_v36 = vsel %vm1526_vm1, %v3260_v58, %v3106_v27 }
 0x748   : > { %v6024_v10 = vsel %vm1526_vm1, %v3236_v8, %v6016_v59  ;;  %v3265_v26 = vperm.slane %v3261_v36, %v5117_v29  ;;  %v3314_v6 = vrot.slane %v3132_v23, 4 }
 0x749   : > { %3821 = vmatmul.msk.f32.gmra.mxu1 %vm544_vm0, %v6024_v10 }
 0x74a   : > { %v3278_v28 = vrot.slane %v3265_v26, 4  ;;  %v3281_v30 = vsel %vm1526_vm1, %v3265_v26, %v3280_v25  ;;  %v6429_v25 = vld [vmem:[#allocation101_spill] sm:$0xff] }
 0x74b   : > { %v3289_v63 = vperm.slane %v3281_v30, %v5167_v42  ;;  %v6431_v30 = vld [vmem:[#allocation102_spill] sm:$0xff] }
 0x74c   : > { %v3279_v55 = vsel %vm1526_vm1, %v3278_v28, %v3259_v56  ;;  %v3238_v56 = vrot.slane %v6016_v59, 4  ;;  %v6428_v59 = vld [vmem:[#allocation89_spill] sm:$0xff] }
 0x74d   : > { %v3285_v54 = vperm.slane %v3279_v55, %v5167_v42  ;;  %v3294_v53 = vrot.slane %v3289_v63, 4  ;;  %v6435_v63 = vld [vmem:[#allocation104_spill] sm:$0xff] }
 0x74f   : > { %v3129_v14 = vpop.permute.xlu2 %3128  ;;  %v3290_v48 = vrot.slane %v3285_v54, 4 }
 0x750   : > { %v3308_v39 = vrot.slane %v3129_v14, 4 }
 0x751   : > { %v3122_v46 = vpop.permute.xlu0 %3121 }
 0x752   : > { %v3309_v52 = vsel %vm1526_vm1, %v3308_v39, %v5943_v45  ;;  %v3302_v57 = vrot.slane %v3122_v46, 4  ;;  %v3350_v39 = vmul.f32 %v5989_v62, %v6428_v59  ;;  %v6434_v62 = vld [vmem:[#allocation92_spill] sm:$0xff] }
 0x753   : > { %v3313_v1 = vperm.slane %v3309_v52, %v5117_v29 }
 0x755   : > { %v3334_v44 = vrot.slane %v3313_v1, 4 }
 0x757   : > { %v3099_v13 = vpop.permute.xlu1 %3098 }
 0x758   : > { %v3242_v17 = vrot.slane %v3099_v13, 4 }
 0x759   : > { %v3102_v33 = vpop.permute.xlu0 %3101 }
 0x75a   : > { %v3243_v7 = vsel %vm1526_vm1, %v3242_v17, %v5937_v47  ;;  %v3248_v43 = vrot.slane %v3102_v33, 4  ;;  %v3239_v33 = vsel %vm1526_vm1, %v6012_v15, %v3238_v56 }
 0x75b   : > { %v3247_v11 = vperm.slane %v3243_v7, %v5117_v29 }
 0x75d   : > { %v3268_v16 = vrot.slane %v3247_v11, 4 }
 0x75f   : > { %v3126_v19 = vpop.permute.xlu1 %3125 }
 0x760   : > { %v3315_v34 = vsel %vm1526_vm1, %v3314_v6, %v3126_v19  ;;  %v3362_v6 = vsub.f32 %v6429_v25, %v3350_v39 }
 0x761   : > { %v3319_v5 = vperm.slane %v3315_v34, %v5117_v29  ;;  %v3096_v50 = vpop.permute.xlu0 %3095 }
 0x762   : > { %v3249_v47 = vsel %vm1526_vm1, %v3248_v43, %v3096_v50  ;;  %v6432_v43 = vld [vmem:[#allocation91_spill] sm:$0xff] }
 0x763   : > { %v3253_v35 = vperm.slane %v3249_v47, %v5117_v29  ;;  %v3332_v21 = vrot.slane %v3319_v5, 4  ;;  %v3335_v60 = vsel %vm1526_vm1, %v3319_v5, %v3334_v44  ;;  %v6433_v5 = vld [vmem:[#allocation103_spill] sm:$0xff] }
 0x764   : > { %v3343_v23 = vperm.slane %v3335_v60, %v5167_v42 }
 0x765   : > { %v3266_v24 = vrot.slane %v3253_v35, 4  ;;  %v3269_v40 = vsel %vm1526_vm1, %v3253_v35, %v3268_v16  ;;  %v3333_v3 = vsel %vm1526_vm1, %v3332_v21, %v3313_v1  ;;  %v6437_v1 = vld [vmem:[#allocation105_spill] sm:$0xff]  ;;  %v6438_v21 = vld [vmem:[#allocation94_spill] sm:$0xff] }
 0x766   : > { %v3277_v45 = vperm.slane %v3269_v40, %v5167_v42  ;;  %v3339_v27 = vperm.slane %v3333_v3, %v5167_v42  ;;  %v3348_v26 = vrot.slane %v3343_v23, 4  ;;  %v6439_v40 = vld [vmem:[#allocation62_spill] sm:$0xff]  ;;  %v6447_v23 = vld [vmem:[#allocation69_spill] sm:$0xff] }
 0x767   : > { %v3119_v2 = vpop.permute.xlu1 %3118  ;;  %v3267_v38 = vsel %vm1526_vm1, %v3266_v24, %v3247_v11  ;;  %v6430_v11 = vld [vmem:[#allocation90_spill] sm:$0xff]  ;;  %v3355_v24 = vmul.f32 %v3239_v33, %v6438_v21 }
 0x768   : > { %v3296_v9 = vrot.slane %v3119_v2, 4  ;;  %v3273_v49 = vperm.slane %v3267_v38, %v5167_v42  ;;  %v6052_v12 = vsel %vm1526_vm1, %v3294_v53, %v3277_v45  ;;  %v3344_v51 = vrot.slane %v3339_v27, 4  ;;  %v6440_v53 = vld [vmem:[#allocation95_spill] sm:$0xff]  ;;  %v6441_v38 = vld [vmem:[#allocation36_spill] sm:$0xff] }
 0x769   : > { %v3116_v61 = vpop.permute.xlu0 %3115  ;;  %v3351_v19 = vmul.f32 %v6024_v10, %v6430_v11  ;;  %v6436_v10 = vld [vmem:[#allocation93_spill] sm:$0xff]  ;;  %v3367_v45 = vsub.f32 %v6439_v40, %v3355_v24 }
 0x76a   : > { %v3297_v18 = vsel %vm1526_vm1, %v3296_v9, %v5931_v0  ;;  %v3303_v41 = vsel %vm1526_vm1, %v3302_v57, %v3116_v61  ;;  %v3291_v22 = vsel %vm1526_vm1, %v3290_v48, %v3273_v49  ;;  %v3354_v35 = vmul.f32 %v5992_v37, %v6436_v10  ;;  %v6444_v61 = vld [vmem:[#allocation97_spill] sm:$0xff] }
 0x76b   : > { %v3301_v8 = vperm.slane %v3297_v18, %v5117_v29  ;;  %v3307_v32 = vperm.slane %v3303_v41, %v5117_v29  ;;  %3822 = vmatmul.msk.f32.gmra.mxu1 %vm544_vm0, %v3291_v22  ;;  %v3363_v55 = vsub.f32 %v6431_v30, %v3351_v19  ;;  %v3352_v34 = vmul.f32 %v3291_v22, %v6432_v43  ;;  %v6445_v41 = vld [vmem:[#allocation37_spill] sm:$0xff] }
 0x76c   : > { %v3358_v60 = vmul.f32 %v5986_v20, %v6444_v61 }
 0x76d   : > { %v3322_v46 = vrot.slane %v3301_v8, 4  ;;  %v3320_v4 = vrot.slane %v3307_v32, 4  ;;  %v3364_v50 = vsub.f32 %v6433_v5, %v3352_v34 }
 0x76e   : > { %v3370_v22 = vsub.f32 %v6445_v41, %v3358_v60 }
 0x76f   : > { %v3323_v58 = vsel %vm1526_vm1, %v3307_v32, %v3322_v46  ;;  %v3321_v0 = vsel %vm1526_vm1, %v3320_v4, %v3301_v8  ;;  %v6446_v8 = vld [vmem:[#allocation98_spill] sm:$0xff]  ;;  %v6448_v4 = vld [vmem:[#allocation99_spill] sm:$0xff] }
 0x770   : > { %v3327_v36 = vperm.slane %v3321_v0, %v5167_v42  ;;  %v3331_v13 = vperm.slane %v3323_v58, %v5167_v42  ;;  %v3292_v42 = vrot.slane %v3273_v49, 4  ;;  %v6443_v49 = vld [vmem:[#allocation66_spill] sm:$0xff]  ;;  %v3359_v32 = vmul.f32 %v6020_v31, %v6446_v8 }
 0x771   : > { %v6449_v0 = vld [vmem:[#allocation38_spill] sm:$0xff] }
 0x772   : > { %v3345_v29 = vsel %vm1526_vm1, %v3344_v51, %v3327_v36  ;;  %v6071_v17 = vsel %vm1526_vm1, %v3348_v26, %v3331_v13  ;;  %v3293_v14 = vsel %vm1526_vm1, %v3285_v54, %v3292_v42  ;;  %v3346_v28 = vrot.slane %v3327_v36, 4  ;;  %v6451_v26 = vld [vmem:[#allocation19_spill] sm:$0xff] }
 0x773   : > { %3823 = vmatmul.msk.f32.gmra.mxu1 %vm544_vm0, %v3345_v29  ;;  %v3353_v47 = vmul.f32 %v3345_v29, %v6434_v62  ;;  %v3366_v54 = vsub.f32 %v6437_v1, %v3354_v35  ;;  %v3356_v44 = vmul.f32 %v3293_v14, %v6440_v53  ;;  %v3371_v46 = vsub.f32 %v6447_v23, %v3359_v32 }
 0x774   : > { %v3347_v7 = vsel %vm1526_vm1, %v3339_v27, %v3346_v28 }
 0x775   : > { %v3365_v16 = vsub.f32 %v6435_v63, %v3353_v47  ;;  %v3368_v48 = vsub.f32 %v6441_v38, %v3356_v44 }
 0x77b   : > { %3824 = vmatmul.msk.f32.gmra.mxu1 %vm544_vm0, %v5992_v37  ;;  %v6442_v37 = vld [vmem:[#allocation96_spill] sm:$0xff] }
 0x77c   : > { %v3357_v57 = vmul.f32 %v3347_v7, %v6442_v37 }
 0x77e   : > { %v3369_v3 = vsub.f32 %v6443_v49, %v3357_v57 }
 0x783   : > { %3825 = vmatmul.msk.f32.gmra.mxu1 %vm544_vm0, %v3239_v33 }
 0x78b   : > { %3826 = vmatmul.msk.f32.gmra.mxu1 %vm544_vm0, %v3293_v14 }
 0x793   : > { %3827 = vmatmul.msk.f32.gmra.mxu1 %vm544_vm0, %v3347_v7 }
 0x79b   : > { %3828 = vmatmul.msk.f32.gmra.mxu1 %vm544_vm0, %v5986_v20  ;;  %v3360_v20 = vmul.f32 %v6052_v12, %v6448_v4 }
 0x79d   : > { %v3372_v36 = vsub.f32 %v6449_v0, %v3360_v20 }
 0x7a3   : > { %3829 = vmatmul.msk.f32.gmra.mxu1 %vm544_vm0, %v6020_v31  ;;  %v6450_v31 = vld [vmem:[#allocation100_spill] sm:$0xff] }
 0x7a4   : > { %v3361_v51 = vmul.f32 %v6071_v17, %v6450_v31 }
 0x7a6   : > { %v3373_v29 = vsub.f32 %v6451_v26, %v3361_v51 }
 0x7a8   : > { %v3467_v15 = vpop.f32.mrf.mxu1 }
 0x7a9   : > { %3539 = vst [vmem:[%s6089_s26] sm:$0xff] %v3467_v15 }
 0x7ab   : > { %3830 = vmatmul.msk.f32.gmra.mxu1 %vm544_vm0, %v6052_v12 }
 0x7b3   : > { %3831 = vmatmul.msk.f32.gmra.mxu1 %vm544_vm0, %v6071_v17 }
 0x7bb   : > { %3832 = vmatmul.msk.f32.gmra.mxu1 %vm544_vm0, %v3362_v6 }
 0x7c3   : > { %3833 = vmatmul.msk.f32.gmra.mxu1 %vm544_vm0, %v3363_v55 }
 0x7c6   : > { %v3470_v52 = vpop.f32.mrf.mxu1 }
 0x7c7   : > { %3540 = vst [vmem:[%s6089_s26 + $0x30] sm:$0xff] %v3470_v52 }
 0x7cb   : > { %3834 = vmatmul.msk.f32.gmra.mxu1 %vm544_vm0, %v3364_v50 }
 0x7d3   : > { %3835 = vmatmul.msk.f32.gmra.mxu1 %vm544_vm0, %v3365_v16 }
 0x7db   : > { %3836 = vmatmul.msk.f32.gmra.mxu1 %vm544_vm0, %v3366_v54 }
 0x7e3   : > { %3837 = vmatmul.msk.f32.gmra.mxu1 %vm544_vm0, %v3367_v45 }
 0x7e8   : > { %v3473_v2 = vpop.f32.mrf.mxu1 }
 0x7e9   : > { %3541 = vst [vmem:[%s6089_s26 + $0x60] sm:$0xff] %v3473_v2 }
 0x7eb   : > { %3838 = vmatmul.msk.f32.gmra.mxu1 %vm544_vm0, %v3368_v48 }
 0x7f0   : > { %v3476_v9 = vpop.f32.mrf.mxu1 }
 0x7f1   : > { %3542 = vst [vmem:[%s6089_s26 + $0x90] sm:$0xff] %v3476_v9 }
 0x7f3   : > { %3839 = vmatmul.msk.f32.gmra.mxu1 %vm544_vm0, %v3369_v3 }
 0x7f8   : > { %v3479_v18 = vpop.f32.mrf.mxu1 }
 0x7f9   : > { %3547 = vst [vmem:[%s6089_s26 + $0x10] sm:$0xff] %v3479_v18 }
 0x7fb   : > { %3840 = vmatmul.msk.f32.gmra.mxu1 %vm544_vm0, %v3370_v22 }
 0x800   : > { %v3482_v27 = vpop.f32.mrf.mxu1 }
 0x801   : > { %3548 = vst [vmem:[%s6089_s26 + $0x40] sm:$0xff] %v3482_v27 }
 0x803   : > { %3841 = vmatmul.msk.f32.gmra.mxu1 %vm544_vm0, %v3371_v46 }
 0x808   : > { %v3485_v58 = vpop.f32.mrf.mxu1 }
 0x809   : > { %3549 = vst [vmem:[%s6089_s26 + $0x70] sm:$0xff] %v3485_v58 }
 0x80b   : > { %3842 = vmatmul.msk.f32.gmra.mxu1 %vm544_vm0, %v3372_v36 }
 0x810   : > { %v3488_v13 = vpop.f32.mrf.mxu1 }
 0x811   : > { %3550 = vst [vmem:[%s6089_s26 + $0xa0] sm:$0xff] %v3488_v13 }
 0x813   : > { %3843 = vmatmul.msk.f32.gmra.mxu1 %vm544_vm0, %v3373_v29 }
 0x818   : > { %v3491_v12 = vpop.f32.mrf.mxu1 }
 0x819   : > { %3555 = vst [vmem:[%s6089_s26 + $0x20] sm:$0xff] %v3491_v12 }
 0x820   : > { %v3494_v56 = vpop.f32.mrf.mxu1 }
 0x821   : > { %3556 = vst [vmem:[%s6089_s26 + $0x50] sm:$0xff] %v3494_v56 }
 0x828   : > { %v3497_v33 = vpop.f32.mrf.mxu1 }
 0x829   : > { %3557 = vst [vmem:[%s6089_s26 + $0x80] sm:$0xff] %v3497_v33 }
 0x830   : > { %v3500_v42 = vpop.f32.mrf.mxu1 }
 0x831   : > { %3558 = vst [vmem:[%s6089_s26 + $0xb0] sm:$0xff] %v3500_v42 }
 0x838   : > { %v3503_v17 = vpop.f32.mrf.mxu1 }
 0x839   : > { %3543 = vst [vmem:[%s6089_s26 + $0x8] sm:$0xff] %v3503_v17 }
 0x840   : > { %v3506_v14 = vpop.f32.mrf.mxu1 }
 0x841   : > { %3544 = vst [vmem:[%s6089_s26 + $0x38] sm:$0xff] %v3506_v14 }
 0x848   : > { %v3509_v28 = vpop.f32.mrf.mxu1 }
 0x849   : > { %3545 = vst [vmem:[%s6089_s26 + $0x68] sm:$0xff] %v3509_v28 }
 0x850   : > { %v3512_v7 = vpop.f32.mrf.mxu1 }
 0x851   : > { %3546 = vst [vmem:[%s6089_s26 + $0x98] sm:$0xff] %v3512_v7 }
 0x858   : > { %v3515_v15 = vpop.f32.mrf.mxu1 }
 0x859   : > { %3551 = vst [vmem:[%s6089_s26 + $0x18] sm:$0xff] %v3515_v15 }
 0x860   : > { %v3518_v59 = vpop.f32.mrf.mxu1 }
 0x861   : > { %3552 = vst [vmem:[%s6089_s26 + $0x48] sm:$0xff] %v3518_v59 }
 0x868   : > { %v3521_v39 = vpop.f32.mrf.mxu1 }
 0x869   : > { %3553 = vst [vmem:[%s6089_s26 + $0x78] sm:$0xff] %v3521_v39 }
 0x870   : > { %v3524_v25 = vpop.f32.mrf.mxu1 }
 0x871   : > { %3554 = vst [vmem:[%s6089_s26 + $0xa8] sm:$0xff] %v3524_v25 }
 0x878   : > { %v3527_v6 = vpop.f32.mrf.mxu1 }
 0x879   : > { %3559 = vst [vmem:[%s6089_s26 + $0x28] sm:$0xff] %v3527_v6 }
 0x880   : > { %v3530_v11 = vpop.f32.mrf.mxu1 }
 0x881   : > { %3560 = vst [vmem:[%s6089_s26 + $0x58] sm:$0xff] %v3530_v11 }
 0x888   : > { %v3533_v19 = vpop.f32.mrf.mxu1 }
 0x889   : > { %3561 = vst [vmem:[%s6089_s26 + $0x88] sm:$0xff] %v3533_v19 }
 0x890   : > { %v3536_v30 = vpop.f32.mrf.mxu1 }
 0x891   : > { %3562 = vst [vmem:[%s6089_s26 + $0xb8] sm:$0xff] %v3536_v30 }
 0x892   : > { %4080 = shalt.err (!%p4077_p2)
}
 0x893   : > { %s4140_s28 = smov 768   ;;  %s4141_s15 = smov 48  }
 0x894   : > { %3894 = dma.vmem_to_hbm [thread:$0]  (%p4274_p7), %s3577_s13, 3072, %s3579_s30, %s3564_s16, %s4140_s28, %s4140_s28, %s4141_s15  }
 0x895 PF: > { %s6454_s23 = sld [smem:[#allocation13_spill]]  ;;  %p6456_p12 = scmp.ge.s32.totalorder %s4127_s24, 2 }
 0x897   : > { %p3908_p13 = pnand %p6456_p12, %p4242_p6 }
 0x899   : > { %p3909_p0 = pneg %p3908_p13 }
 0x89b   : > { %s3593_s27 = sand.u32 1, %s6454_s23  }
 0x89c   : > { %s3594_s2 = scalar_lea.sflag [#allocation4], %s3593_s27 }
 0x89d   : > { %4110 = dma.done.wait (%p3909_p0), %s3594_s2, 3072  }
 0x89e   : > { %4112 = vsyncadd (%p3909_p0), %s3594_s2, 4294964224  ;;  %s6457_s24 = sld [smem:[#allocation16_spill]]  ;;  %s6460_s21 = smov %s4119_s22 }
 0x89f   : > { %s6458_s4 = sld [smem:[#allocation14_spill]] }
 0x8a0   : > { %s6459_s23 = sld [smem:[#allocation17_spill]] }
 0x8a4   : > { %p28_p3 = scmp.ge.s32.totalorder %s6457_s24, 4  }
 0x8a5   : > { %s6461_s22 = smov %s6458_s4 }
 0x8a6   :  { %30 = sbr.rel (!%p28_p3) target bundleno = 13 (0xd), region = 130 }
 0x8ab   :  { %3600 = vsyncpa [#allocation3], 1 }
 0x8ac   :  { %3602 = vsyncpa [#allocation3 + $0x1], 1 }
 0x8ad   :  { %3603 = vsyncpa [#allocation6], 1 }
 0x8ae   :  { %3605 = vsyncpa [#allocation6 + $0x1], 1 }
 0x8af   :  { %3606 = vsyncpa [#allocation4], 1 }
 0x8b0   :  { %3608 = vsyncpa [#allocation4 + $0x1], 1 }

</bundles_post_ra>
